<compile_context>
chip_gen: v6e
topology: v6e:2x2x1
jax: 0.10.0
libtpu: 0.0.40
codegen_flags: <defaults>
</compile_context>

<pallas_src>
import functools

import jax
import jax.numpy as jnp
from jax.experimental import pallas as pl
from jax.experimental.pallas import tpu as pltpu

KSIZE = 7
PAD = 3  # Conv2d(2, 1, kernel_size=7, padding=3, bias=False)


def _spatial_attention_kernel(w_ref, x_ref, o_ref, sum_sc, mx_sc, pa_ref, pm_ref,
                              *, h, w, hw, c_total, c_tile):
    # w_ref  : SMEM (2*7*7,)        flattened conv weight, layout [in_ch, kh, kw]
    # x_ref  : VMEM (c_tile, H*W)   one channel chunk of one batch element (lane-dense)
    # o_ref  : VMEM (1, H*W)        flat attention map for this batch element
    # sum_sc : VMEM (8, H*W) f32    running channel sum, folded mod 8
    # mx_sc  : VMEM (8, H*W) f32    running channel max, folded mod 8
    # pa_ref : VMEM (H+6, W+6) f32  zero-bordered avg map (conv staging frame)
    # pm_ref : VMEM (H+6, W+6) f32  zero-bordered max map (conv staging frame)
    ci = pl.program_id(1)
    nc = pl.num_programs(1)

    @pl.when(ci == 0)
    def _init():
        sum_sc[...] = jnp.zeros_like(sum_sc)
        mx_sc[...] = jnp.full_like(mx_sc, -jnp.inf)

    # f32 accumulation (mandatory on v5e: no bf16 VALU).
    x = x_ref[...].astype(jnp.float32)  # (c_tile, H*W)

    def _accumulate(xs, xm):
        # xs is masked to 0 for the sum path, xm to -inf for the max path.
        if c_tile % 8 == 0:
            g = c_tile // 8
            # Split the leading (sublane) dim on an 8-boundary: free relayout,
            # then the reduction over `g` is pure elementwise VPU work.
            sum_sc[...] = sum_sc[...] + jnp.sum(xs.reshape(g, 8, hw), axis=0)
            mx_sc[...] = jnp.maximum(mx_sc[...], jnp.max(xm.reshape(g, 8, hw), axis=0))
        else:
            # Only hit when c_tile == C < 8 (single block): fold onto sublane 0;
            # sublanes 1..7 keep their init values (0 / -inf).
            sum_sc[0:1, :] = sum_sc[0:1, :] + jnp.sum(xs, axis=0, keepdims=True)
            mx_sc[0:1, :] = jnp.maximum(mx_sc[0:1, :],
                                        jnp.max(xm, axis=0, keepdims=True))

    if c_total % c_tile != 0:
        # The last block carries a channel tail (plus unspecified out-of-bounds
        # data from the boundary DMA): mask only there, keep the hot path clean.
        @pl.when(ci == nc - 1)
        def _tail_block():
            ch = ci * c_tile + jax.lax.broadcasted_iota(jnp.int32, (c_tile, 1), 0)
            valid = ch < c_total
            _accumulate(jnp.where(valid, x, 0.0), jnp.where(valid, x, -jnp.inf))

        @pl.when(ci != nc - 1)
        def _full_block():
            _accumulate(x, x)
    else:
        _accumulate(x, x)

    @pl.when(ci == nc - 1)
    def _finalize():
        # Collapse the 8-sublane partials (torch.mean / torch.max over dim=1).
        avg_flat = jnp.sum(sum_sc[...], axis=0, keepdims=True) * (1.0 / c_total)
        mx_flat = jnp.max(mx_sc[...], axis=0, keepdims=True)          # (1, H*W)

        # Stage [avg, max] into zero-bordered frames (Conv2d padding=3): zero
        # the whole frame, overwrite the interior row by row with static lane
        # slices of the flat pooled maps (no in-register concatenates).
        pa_ref[...] = jnp.zeros_like(pa_ref)
        pm_ref[...] = jnp.zeros_like(pm_ref)
        for i in range(h):
            s = i * w
            pa_ref[PAD + i:PAD + i + 1, PAD:PAD + w] = avg_flat[:, s:s + w]
            pm_ref[PAD + i:PAD + i + 1, PAD:PAD + w] = mx_flat[:, s:s + w]

        # 7x7 cross-correlation (PyTorch Conv2d, no bias) over the 2-channel
        # [avg, max] map: the 49 shifted windows per channel are read straight
        # from the padded VMEM frames (static ref slices -> load slots), with
        # scalar taps from SMEM.
        acc = jnp.zeros((h, w), jnp.float32)
        for di in range(KSIZE):
            for dj in range(KSIZE):
                wa = w_ref[di * KSIZE + dj]                  # avg-channel tap
                wm = w_ref[KSIZE * KSIZE + di * KSIZE + dj]  # max-channel tap
                acc = acc + wa * pa_ref[di:di + h, dj:dj + w]
                acc = acc + wm * pm_ref[di:di + h, dj:dj + w]

        # Lane-dense store: fill the flat (1, H*W) output row (one wide
        # writeback DMA per batch element instead of 16-wide partial stores).
        sig = jax.nn.sigmoid(acc)                            # (H, W)
        for i in range(h):
            o_ref[:, i * w:(i + 1) * w] = sig[i:i + 1, :]


def _pick_c_tile(c, hw, itemsize):
    """Channel tile: multiple of 8, ~1 MiB blocks, >= ~4 reduction steps."""
    if c <= 8:
        return c  # single full-channel block (block dim == array dim is legal)
    bytes_per_ch = max(1, hw * itemsize)
    cap = max(8, ((1 << 20) // bytes_per_ch) // 8 * 8)    # ~1 MiB per input block
    quarter = ((c + 3) // 4 + 7) // 8 * 8                 # ~4 pipeline steps/batch
    ct = max(8, min(cap, quarter))
    return min(ct, ((c + 7) // 8) * 8)


def spatial_attention(x, weight, *, c_tile=None, extra_input_buffering=False):
    """x: (N, C, H, W); weight: (1, 2, 7, 7) -> (N, 1, H, W) float32."""
    n, c, h, w = x.shape
    hw = h * w

    # Lane-dense view of the activations: (N, C, H*W) -- free metadata reshape.
    x_flat = x.reshape(n, c, hw)

    if c_tile is None:
        c_tile = _pick_c_tile(c, hw, x.dtype.itemsize)
    if c <= 8:
        c_tile = c                                   # full channel dim, 1 block
    else:
        c_tile = max(8, min((c_tile // 8) * 8, ((c + 7) // 8) * 8))
    num_c = -(-c // c_tile)

    # Flatten the tiny conv weight for SMEM scalar reads: [in_ch, kh, kw].
    w_flat = weight.reshape(-1).astype(jnp.float32)  # (98,)

    # Advisory cost estimate (streamed reduction + 98-tap conv + sigmoid).
    cost = pl.CostEstimate(
        flops=int(2 * n * (c + 2 * KSIZE * KSIZE) * hw),
        transcendentals=int(n * hw),
        bytes_accessed=int(x.size * x.dtype.itemsize + n * hw * 4 + w_flat.size * 4))

    # VMEM budget: multi-buffered input blocks + output block + scratch +
    # headroom, clamped well below v7x's 64 MiB physical VMEM.
    in_block = c_tile * hw * x.dtype.itemsize
    scratch = 2 * 8 * hw * 4 + 2 * (h + 2 * PAD) * (w + 2 * PAD) * 4
    need = 3 * in_block + 2 * hw * 4 + scratch + (4 << 20)
    vmem_limit = int(min(max(need, 16 << 20), 48 << 20))

    # Optional 3-deep input buffering so the finalize conv spike never bubbles
    # the HBM stream; off by default (only useful once num_c >= 3).
    x_spec_kwargs = {}
    if extra_input_buffering and num_c >= 3:
        x_spec_kwargs["pipeline_mode"] = pl.Buffered(3)
    x_spec = pl.BlockSpec((None, c_tile, hw), lambda b, ci: (b, ci, 0),
                          **x_spec_kwargs)

    kernel = functools.partial(_spatial_attention_kernel,
                               h=h, w=w, hw=hw, c_total=c, c_tile=c_tile)
    out_flat = pl.pallas_call(
        kernel,
        out_shape=jax.ShapeDtypeStruct((n, 1, hw), jnp.float32),
        grid=(n, num_c),
        in_specs=[
            pl.BlockSpec(memory_space=pltpu.MemorySpace.SMEM),   # conv weights
            x_spec,                                              # x channel chunk
        ],
        out_specs=pl.BlockSpec((None, 1, hw), lambda b, ci: (b, 0, 0)),
        scratch_shapes=[
            pltpu.VMEM((8, hw), jnp.float32),                    # running channel sum
            pltpu.VMEM((8, hw), jnp.float32),                    # running channel max
            pltpu.VMEM((h + 2 * PAD, w + 2 * PAD), jnp.float32),  # padded avg frame
            pltpu.VMEM((h + 2 * PAD, w + 2 * PAD), jnp.float32),  # padded max frame
        ],
        compiler_params=pltpu.CompilerParams(
            dimension_semantics=("parallel", "arbitrary"),
            vmem_limit_bytes=vmem_limit,
        ),
        cost_estimate=cost,
    )(w_flat, x_flat)

    return out_flat.reshape(n, 1, h, w)


def _reference(x, weight):
    avg = jnp.mean(x, axis=1, keepdims=True)
    mx = jnp.max(x, axis=1, keepdims=True)
    xc = jnp.concatenate([avg, mx], axis=1)
    y = jax.lax.conv_general_dilated(
        xc, weight, window_strides=(1, 1),
        padding=((PAD, PAD), (PAD, PAD)),
        dimension_numbers=("NCHW", "OIHW", "NCHW"))
    return jax.nn.sigmoid(y)


if __name__ == "__main__":
    key = jax.random.PRNGKey(0)
    kx1, kx2, kw_ = jax.random.split(key, 3)

    # Deterministic weight init, PyTorch-Conv2d-like uniform(+-1/sqrt(fan_in)).
    fan_in = 2 * KSIZE * KSIZE
    bound = 1.0 / (fan_in ** 0.5)
    weight = jax.random.uniform(kw_, (1, 2, KSIZE, KSIZE),
                                minval=-bound, maxval=bound, dtype=jnp.float32)

    # Case 1: module-spec shapes (single-block channel path, C < 8).
    N, C, H, W = 2, 4, 16, 16
    x1 = jax.random.normal(kx1, (N, C, H, W), dtype=jnp.float32)
    out1 = jax.block_until_ready(spatial_attention(x1, weight))
    ref1 = _reference(x1, weight)
    assert out1.shape == (N, 1, H, W), out1.shape
    assert jnp.allclose(out1, ref1, atol=1e-5, rtol=1e-5), \
        float(jnp.max(jnp.abs(out1 - ref1)))

    # Case 2: streamed multi-step reduction with a masked channel tail
    # (C=40 -> c_tile=16, 3 reduction steps, last step half out-of-range).
    x2 = jax.random.normal(kx2, (N, 40, H, W), dtype=jnp.float32)
    out2 = jax.block_until_ready(spatial_attention(x2, weight))
    ref2 = _reference(x2, weight)
    assert out2.shape == (N, 1, H, W), out2.shape
    assert jnp.allclose(out2, ref2, atol=1e-5, rtol=1e-5), \
        float(jnp.max(jnp.abs(out2 - ref2)))

    print("KERNEL_OK")
</pallas_src>

<mosaic_0001>
module attributes {stable_mosaic.version = 11 : i64} {
  func.func @_spatial_attention_kernel(%arg0: i32, %arg1: i32, %arg2: memref<98xf32, #tpu.memory_space<smem>>, %arg3: memref<1x4x256xf32, #tpu.memory_space<vmem>>, %arg4: memref<1x1x256xf32, #tpu.memory_space<vmem>>, %arg5: memref<8x256xf32, #tpu.memory_space<vmem>>, %arg6: memref<8x256xf32, #tpu.memory_space<vmem>>, %arg7: memref<22x22xf32, #tpu.memory_space<vmem>>, %arg8: memref<22x22xf32, #tpu.memory_space<vmem>>) attributes {dimension_semantics = [#tpu.dimension_semantics<parallel>, #tpu.dimension_semantics<arbitrary>], iteration_bounds = array<i64: 2, 1>, scalar_prefetch = 0 : i64, scratch_operands = 4 : i64, tpu.core_type = #tpu.core_type<tc>, window_params = [{transform_indices = @transform_0, window_bounds = array<i64: 98>}, {transform_indices = @transform_1, window_bounds = array<i64: 1, 4, 256>}, {transform_indices = @transform_2, window_bounds = array<i64: 1, 1, 256>}]} {
    %c0_i32 = arith.constant 0 : i32
    %0 = arith.cmpi eq, %arg1, %c0_i32 : i32
    %1 = arith.extui %0 : i1 to i32
    %c0_i32_0 = arith.constant 0 : i32
    %2 = arith.cmpi ne, %1, %c0_i32_0 : i32
    scf.if %2 {
      %cst_14 = arith.constant 0.000000e+00 : f32
      %18 = vector.broadcast %cst_14 : f32 to vector<8x256xf32>
      %c0_15 = arith.constant 0 : index
      %c0_16 = arith.constant 0 : index
      %19 = vector.load %arg5[%c0_15, %c0_16] : memref<8x256xf32, #tpu.memory_space<vmem>>, vector<8x256xf32>
      tpu.vector_store %arg5[%c0_15, %c0_16], %18 {strides = array<i32>} : memref<8x256xf32, #tpu.memory_space<vmem>>, vector<8x256xf32>,
      %cst_17 = arith.constant 0xFF800000 : f32
      %20 = vector.broadcast %cst_17 : f32 to vector<8x256xf32>
      %c0_18 = arith.constant 0 : index
      %c0_19 = arith.constant 0 : index
      %21 = vector.load %arg6[%c0_18, %c0_19] : memref<8x256xf32, #tpu.memory_space<vmem>>, vector<8x256xf32>
      tpu.vector_store %arg6[%c0_18, %c0_19], %20 {strides = array<i32>} : memref<8x256xf32, #tpu.memory_space<vmem>>, vector<8x256xf32>,
    } else {
    }
    %c0 = arith.constant 0 : index
    %c0_1 = arith.constant 0 : index
    %c0_2 = arith.constant 0 : index
    %3 = vector.load %arg3[%c0, %c0_1, %c0_2] : memref<1x4x256xf32, #tpu.memory_space<vmem>>, vector<1x4x256xf32>
    %4 = vector.shape_cast %3 : vector<1x4x256xf32> to vector<4x256xf32>
    %c0_3 = arith.constant 0 : index
    %c0_4 = arith.constant 0 : index
    %5 = vector.load %arg5[%c0_3, %c0_4] : memref<8x256xf32, #tpu.memory_space<vmem>>, vector<1x256xf32>
    %cst = arith.constant dense<0.000000e+00> : vector<256xf32>
    %6 = vector.multi_reduction <add>, %4, %cst [0] : vector<4x256xf32> to vector<256xf32>
    %7 = vector.shape_cast %6 : vector<256xf32> to vector<1x256xf32>
    %8 = arith.addf %5, %7 : vector<1x256xf32>
    %c0_5 = arith.constant 0 : index
    %c0_6 = arith.constant 0 : index
    %9 = vector.load %arg5[%c0_5, %c0_6] : memref<8x256xf32, #tpu.memory_space<vmem>>, vector<1x256xf32>
    tpu.vector_store %arg5[%c0_5, %c0_6], %8 {strides = array<i32>} : memref<8x256xf32, #tpu.memory_space<vmem>>, vector<1x256xf32>,
    %c0_7 = arith.constant 0 : index
    %c0_8 = arith.constant 0 : index
    %10 = vector.load %arg6[%c0_7, %c0_8] : memref<8x256xf32, #tpu.memory_space<vmem>>, vector<1x256xf32>
    %cst_9 = arith.constant dense<0xFF800000> : vector<256xf32>
    %11 = vector.multi_reduction <maximumf>, %4, %cst_9 [0] : vector<4x256xf32> to vector<256xf32>
    %12 = vector.shape_cast %11 : vector<256xf32> to vector<1x256xf32>
    %13 = arith.maximumf %10, %12 : vector<1x256xf32>
    %c0_10 = arith.constant 0 : index
    %c0_11 = arith.constant 0 : index
    %14 = vector.load %arg6[%c0_10, %c0_11] : memref<8x256xf32, #tpu.memory_space<vmem>>, vector<1x256xf32>
    tpu.vector_store %arg6[%c0_10, %c0_11], %13 {strides = array<i32>} : memref<8x256xf32, #tpu.memory_space<vmem>>, vector<1x256xf32>,
    %c0_i32_12 = arith.constant 0 : i32
    %15 = arith.cmpi eq, %arg1, %c0_i32_12 : i32
    %16 = arith.extui %15 : i1 to i32
    %c0_i32_13 = arith.constant 0 : i32
    %17 = arith.cmpi ne, %16, %c0_i32_13 : i32
    scf.if %17 {
      %c0_14 = arith.constant 0 : index
      %c0_15 = arith.constant 0 : index
      %18 = vector.load %arg5[%c0_14, %c0_15] : memref<8x256xf32, #tpu.memory_space<vmem>>, vector<8x256xf32>
      %cst_16 = arith.constant dense<0.000000e+00> : vector<256xf32>
      %19 = vector.multi_reduction <add>, %18, %cst_16 [0] : vector<8x256xf32> to vector<256xf32>
      %20 = vector.shape_cast %19 : vector<256xf32> to vector<1x256xf32>
      %cst_17 = arith.constant 2.500000e-01 : f32
      %21 = vector.broadcast %cst_17 : f32 to vector<1x256xf32>
      %22 = arith.mulf %20, %21 : vector<1x256xf32>
      %c0_18 = arith.constant 0 : index
      %c0_19 = arith.constant 0 : index
      %23 = vector.load %arg6[%c0_18, %c0_19] : memref<8x256xf32, #tpu.memory_space<vmem>>, vector<8x256xf32>
      %cst_20 = arith.constant dense<0xFF800000> : vector<256xf32>
      %24 = vector.multi_reduction <maximumf>, %23, %cst_20 [0] : vector<8x256xf32> to vector<256xf32>
      %25 = vector.shape_cast %24 : vector<256xf32> to vector<1x256xf32>
      %cst_21 = arith.constant 0.000000e+00 : f32
      %26 = vector.broadcast %cst_21 : f32 to vector<22x22xf32>
      %c0_22 = arith.constant 0 : index
      %c0_23 = arith.constant 0 : index
      %27 = vector.load %arg7[%c0_22, %c0_23] : memref<22x22xf32, #tpu.memory_space<vmem>>, vector<22x22xf32>
      tpu.vector_store %arg7[%c0_22, %c0_23], %26 {strides = array<i32>} : memref<22x22xf32, #tpu.memory_space<vmem>>, vector<22x22xf32>,
      %cst_24 = arith.constant 0.000000e+00 : f32
      %28 = vector.broadcast %cst_24 : f32 to vector<22x22xf32>
      %c0_25 = arith.constant 0 : index
      %c0_26 = arith.constant 0 : index
      %29 = vector.load %arg8[%c0_25, %c0_26] : memref<22x22xf32, #tpu.memory_space<vmem>>, vector<22x22xf32>
      tpu.vector_store %arg8[%c0_25, %c0_26], %28 {strides = array<i32>} : memref<22x22xf32, #tpu.memory_space<vmem>>, vector<22x22xf32>,
      %30 = vector.extract_strided_slice %22 {offsets = [0, 0], sizes = [1, 16], strides = [1, 1]} : vector<1x256xf32> to vector<1x16xf32>
      %c3 = arith.constant 3 : index
      %c3_27 = arith.constant 3 : index
      %31 = vector.load %arg7[%c3, %c3_27] : memref<22x22xf32, #tpu.memory_space<vmem>>, vector<1x16xf32>
      tpu.vector_store %arg7[%c3, %c3_27], %30 {strides = array<i32>} : memref<22x22xf32, #tpu.memory_space<vmem>>, vector<1x16xf32>,
      %32 = vector.extract_strided_slice %25 {offsets = [0, 0], sizes = [1, 16], strides = [1, 1]} : vector<1x256xf32> to vector<1x16xf32>
      %c3_28 = arith.constant 3 : index
      %c3_29 = arith.constant 3 : index
      %33 = vector.load %arg8[%c3_28, %c3_29] : memref<22x22xf32, #tpu.memory_space<vmem>>, vector<1x16xf32>
      tpu.vector_store %arg8[%c3_28, %c3_29], %32 {strides = array<i32>} : memref<22x22xf32, #tpu.memory_space<vmem>>, vector<1x16xf32>,
      %34 = vector.extract_strided_slice %22 {offsets = [0, 16], sizes = [1, 16], strides = [1, 1]} : vector<1x256xf32> to vector<1x16xf32>
      %c4 = arith.constant 4 : index
      %c3_30 = arith.constant 3 : index
      %35 = vector.load %arg7[%c4, %c3_30] : memref<22x22xf32, #tpu.memory_space<vmem>>, vector<1x16xf32>
      tpu.vector_store %arg7[%c4, %c3_30], %34 {strides = array<i32>} : memref<22x22xf32, #tpu.memory_space<vmem>>, vector<1x16xf32>,
      %36 = vector.extract_strided_slice %25 {offsets = [0, 16], sizes = [1, 16], strides = [1, 1]} : vector<1x256xf32> to vector<1x16xf32>
      %c4_31 = arith.constant 4 : index
      %c3_32 = arith.constant 3 : index
      %37 = vector.load %arg8[%c4_31, %c3_32] : memref<22x22xf32, #tpu.memory_space<vmem>>, vector<1x16xf32>
      tpu.vector_store %arg8[%c4_31, %c3_32], %36 {strides = array<i32>} : memref<22x22xf32, #tpu.memory_space<vmem>>, vector<1x16xf32>,
      %38 = vector.extract_strided_slice %22 {offsets = [0, 32], sizes = [1, 16], strides = [1, 1]} : vector<1x256xf32> to vector<1x16xf32>
      %c5 = arith.constant 5 : index
      %c3_33 = arith.constant 3 : index
      %39 = vector.load %arg7[%c5, %c3_33] : memref<22x22xf32, #tpu.memory_space<vmem>>, vector<1x16xf32>
      tpu.vector_store %arg7[%c5, %c3_33], %38 {strides = array<i32>} : memref<22x22xf32, #tpu.memory_space<vmem>>, vector<1x16xf32>,
      %40 = vector.extract_strided_slice %25 {offsets = [0, 32], sizes = [1, 16], strides = [1, 1]} : vector<1x256xf32> to vector<1x16xf32>
      %c5_34 = arith.constant 5 : index
      %c3_35 = arith.constant 3 : index
      %41 = vector.load %arg8[%c5_34, %c3_35] : memref<22x22xf32, #tpu.memory_space<vmem>>, vector<1x16xf32>
      tpu.vector_store %arg8[%c5_34, %c3_35], %40 {strides = array<i32>} : memref<22x22xf32, #tpu.memory_space<vmem>>, vector<1x16xf32>,
      %42 = vector.extract_strided_slice %22 {offsets = [0, 48], sizes = [1, 16], strides = [1, 1]} : vector<1x256xf32> to vector<1x16xf32>
      %c6 = arith.constant 6 : index
      %c3_36 = arith.constant 3 : index
      %43 = vector.load %arg7[%c6, %c3_36] : memref<22x22xf32, #tpu.memory_space<vmem>>, vector<1x16xf32>
      tpu.vector_store %arg7[%c6, %c3_36], %42 {strides = array<i32>} : memref<22x22xf32, #tpu.memory_space<vmem>>, vector<1x16xf32>,
      %44 = vector.extract_strided_slice %25 {offsets = [0, 48], sizes = [1, 16], strides = [1, 1]} : vector<1x256xf32> to vector<1x16xf32>
      %c6_37 = arith.constant 6 : index
      %c3_38 = arith.constant 3 : index
      %45 = vector.load %arg8[%c6_37, %c3_38] : memref<22x22xf32, #tpu.memory_space<vmem>>, vector<1x16xf32>
      tpu.vector_store %arg8[%c6_37, %c3_38], %44 {strides = array<i32>} : memref<22x22xf32, #tpu.memory_space<vmem>>, vector<1x16xf32>,
      %46 = vector.extract_strided_slice %22 {offsets = [0, 64], sizes = [1, 16], strides = [1, 1]} : vector<1x256xf32> to vector<1x16xf32>
      %c7 = arith.constant 7 : index
      %c3_39 = arith.constant 3 : index
      %47 = vector.load %arg7[%c7, %c3_39] : memref<22x22xf32, #tpu.memory_space<vmem>>, vector<1x16xf32>
      tpu.vector_store %arg7[%c7, %c3_39], %46 {strides = array<i32>} : memref<22x22xf32, #tpu.memory_space<vmem>>, vector<1x16xf32>,
      %48 = vector.extract_strided_slice %25 {offsets = [0, 64], sizes = [1, 16], strides = [1, 1]} : vector<1x256xf32> to vector<1x16xf32>
      %c7_40 = arith.constant 7 : index
      %c3_41 = arith.constant 3 : index
      %49 = vector.load %arg8[%c7_40, %c3_41] : memref<22x22xf32, #tpu.memory_space<vmem>>, vector<1x16xf32>
      tpu.vector_store %arg8[%c7_40, %c3_41], %48 {strides = array<i32>} : memref<22x22xf32, #tpu.memory_space<vmem>>, vector<1x16xf32>,
      %50 = vector.extract_strided_slice %22 {offsets = [0, 80], sizes = [1, 16], strides = [1, 1]} : vector<1x256xf32> to vector<1x16xf32>
      %c8 = arith.constant 8 : index
      %c3_42 = arith.constant 3 : index
      %51 = vector.load %arg7[%c8, %c3_42] : memref<22x22xf32, #tpu.memory_space<vmem>>, vector<1x16xf32>
      tpu.vector_store %arg7[%c8, %c3_42], %50 {strides = array<i32>} : memref<22x22xf32, #tpu.memory_space<vmem>>, vector<1x16xf32>,
      %52 = vector.extract_strided_slice %25 {offsets = [0, 80], sizes = [1, 16], strides = [1, 1]} : vector<1x256xf32> to vector<1x16xf32>
      %c8_43 = arith.constant 8 : index
      %c3_44 = arith.constant 3 : index
      %53 = vector.load %arg8[%c8_43, %c3_44] : memref<22x22xf32, #tpu.memory_space<vmem>>, vector<1x16xf32>
      tpu.vector_store %arg8[%c8_43, %c3_44], %52 {strides = array<i32>} : memref<22x22xf32, #tpu.memory_space<vmem>>, vector<1x16xf32>,
      %54 = vector.extract_strided_slice %22 {offsets = [0, 96], sizes = [1, 16], strides = [1, 1]} : vector<1x256xf32> to vector<1x16xf32>
      %c9 = arith.constant 9 : index
      %c3_45 = arith.constant 3 : index
      %55 = vector.load %arg7[%c9, %c3_45] : memref<22x22xf32, #tpu.memory_space<vmem>>, vector<1x16xf32>
      tpu.vector_store %arg7[%c9, %c3_45], %54 {strides = array<i32>} : memref<22x22xf32, #tpu.memory_space<vmem>>, vector<1x16xf32>,
      %56 = vector.extract_strided_slice %25 {offsets = [0, 96], sizes = [1, 16], strides = [1, 1]} : vector<1x256xf32> to vector<1x16xf32>
      %c9_46 = arith.constant 9 : index
      %c3_47 = arith.constant 3 : index
      %57 = vector.load %arg8[%c9_46, %c3_47] : memref<22x22xf32, #tpu.memory_space<vmem>>, vector<1x16xf32>
      tpu.vector_store %arg8[%c9_46, %c3_47], %56 {strides = array<i32>} : memref<22x22xf32, #tpu.memory_space<vmem>>, vector<1x16xf32>,
      %58 = vector.extract_strided_slice %22 {offsets = [0, 112], sizes = [1, 16], strides = [1, 1]} : vector<1x256xf32> to vector<1x16xf32>
      %c10 = arith.constant 10 : index
      %c3_48 = arith.constant 3 : index
      %59 = vector.load %arg7[%c10, %c3_48] : memref<22x22xf32, #tpu.memory_space<vmem>>, vector<1x16xf32>
      tpu.vector_store %arg7[%c10, %c3_48], %58 {strides = array<i32>} : memref<22x22xf32, #tpu.memory_space<vmem>>, vector<1x16xf32>,
      %60 = vector.extract_strided_slice %25 {offsets = [0, 112], sizes = [1, 16], strides = [1, 1]} : vector<1x256xf32> to vector<1x16xf32>
      %c10_49 = arith.constant 10 : index
      %c3_50 = arith.constant 3 : index
      %61 = vector.load %arg8[%c10_49, %c3_50] : memref<22x22xf32, #tpu.memory_space<vmem>>, vector<1x16xf32>
      tpu.vector_store %arg8[%c10_49, %c3_50], %60 {strides = array<i32>} : memref<22x22xf32, #tpu.memory_space<vmem>>, vector<1x16xf32>,
      %62 = vector.extract_strided_slice %22 {offsets = [0, 128], sizes = [1, 16], strides = [1, 1]} : vector<1x256xf32> to vector<1x16xf32>
      %c11 = arith.constant 11 : index
      %c3_51 = arith.constant 3 : index
      %63 = vector.load %arg7[%c11, %c3_51] : memref<22x22xf32, #tpu.memory_space<vmem>>, vector<1x16xf32>
      tpu.vector_store %arg7[%c11, %c3_51], %62 {strides = array<i32>} : memref<22x22xf32, #tpu.memory_space<vmem>>, vector<1x16xf32>,
      %64 = vector.extract_strided_slice %25 {offsets = [0, 128], sizes = [1, 16], strides = [1, 1]} : vector<1x256xf32> to vector<1x16xf32>
      %c11_52 = arith.constant 11 : index
      %c3_53 = arith.constant 3 : index
      %65 = vector.load %arg8[%c11_52, %c3_53] : memref<22x22xf32, #tpu.memory_space<vmem>>, vector<1x16xf32>
      tpu.vector_store %arg8[%c11_52, %c3_53], %64 {strides = array<i32>} : memref<22x22xf32, #tpu.memory_space<vmem>>, vector<1x16xf32>,
      %66 = vector.extract_strided_slice %22 {offsets = [0, 144], sizes = [1, 16], strides = [1, 1]} : vector<1x256xf32> to vector<1x16xf32>
      %c12 = arith.constant 12 : index
      %c3_54 = arith.constant 3 : index
      %67 = vector.load %arg7[%c12, %c3_54] : memref<22x22xf32, #tpu.memory_space<vmem>>, vector<1x16xf32>
      tpu.vector_store %arg7[%c12, %c3_54], %66 {strides = array<i32>} : memref<22x22xf32, #tpu.memory_space<vmem>>, vector<1x16xf32>,
      %68 = vector.extract_strided_slice %25 {offsets = [0, 144], sizes = [1, 16], strides = [1, 1]} : vector<1x256xf32> to vector<1x16xf32>
      %c12_55 = arith.constant 12 : index
      %c3_56 = arith.constant 3 : index
      %69 = vector.load %arg8[%c12_55, %c3_56] : memref<22x22xf32, #tpu.memory_space<vmem>>, vector<1x16xf32>
      tpu.vector_store %arg8[%c12_55, %c3_56], %68 {strides = array<i32>} : memref<22x22xf32, #tpu.memory_space<vmem>>, vector<1x16xf32>,
      %70 = vector.extract_strided_slice %22 {offsets = [0, 160], sizes = [1, 16], strides = [1, 1]} : vector<1x256xf32> to vector<1x16xf32>
      %c13 = arith.constant 13 : index
      %c3_57 = arith.constant 3 : index
      %71 = vector.load %arg7[%c13, %c3_57] : memref<22x22xf32, #tpu.memory_space<vmem>>, vector<1x16xf32>
      tpu.vector_store %arg7[%c13, %c3_57], %70 {strides = array<i32>} : memref<22x22xf32, #tpu.memory_space<vmem>>, vector<1x16xf32>,
      %72 = vector.extract_strided_slice %25 {offsets = [0, 160], sizes = [1, 16], strides = [1, 1]} : vector<1x256xf32> to vector<1x16xf32>
      %c13_58 = arith.constant 13 : index
      %c3_59 = arith.constant 3 : index
      %73 = vector.load %arg8[%c13_58, %c3_59] : memref<22x22xf32, #tpu.memory_space<vmem>>, vector<1x16xf32>
      tpu.vector_store %arg8[%c13_58, %c3_59], %72 {strides = array<i32>} : memref<22x22xf32, #tpu.memory_space<vmem>>, vector<1x16xf32>,
      %74 = vector.extract_strided_slice %22 {offsets = [0, 176], sizes = [1, 16], strides = [1, 1]} : vector<1x256xf32> to vector<1x16xf32>
      %c14 = arith.constant 14 : index
      %c3_60 = arith.constant 3 : index
      %75 = vector.load %arg7[%c14, %c3_60] : memref<22x22xf32, #tpu.memory_space<vmem>>, vector<1x16xf32>
      tpu.vector_store %arg7[%c14, %c3_60], %74 {strides = array<i32>} : memref<22x22xf32, #tpu.memory_space<vmem>>, vector<1x16xf32>,
      %76 = vector.extract_strided_slice %25 {offsets = [0, 176], sizes = [1, 16], strides = [1, 1]} : vector<1x256xf32> to vector<1x16xf32>
      %c14_61 = arith.constant 14 : index
      %c3_62 = arith.constant 3 : index
      %77 = vector.load %arg8[%c14_61, %c3_62] : memref<22x22xf32, #tpu.memory_space<vmem>>, vector<1x16xf32>
      tpu.vector_store %arg8[%c14_61, %c3_62], %76 {strides = array<i32>} : memref<22x22xf32, #tpu.memory_space<vmem>>, vector<1x16xf32>,
      %78 = vector.extract_strided_slice %22 {offsets = [0, 192], sizes = [1, 16], strides = [1, 1]} : vector<1x256xf32> to vector<1x16xf32>
      %c15 = arith.constant 15 : index
      %c3_63 = arith.constant 3 : index
      %79 = vector.load %arg7[%c15, %c3_63] : memref<22x22xf32, #tpu.memory_space<vmem>>, vector<1x16xf32>
      tpu.vector_store %arg7[%c15, %c3_63], %78 {strides = array<i32>} : memref<22x22xf32, #tpu.memory_space<vmem>>, vector<1x16xf32>,
      %80 = vector.extract_strided_slice %25 {offsets = [0, 192], sizes = [1, 16], strides = [1, 1]} : vector<1x256xf32> to vector<1x16xf32>
      %c15_64 = arith.constant 15 : index
      %c3_65 = arith.constant 3 : index
      %81 = vector.load %arg8[%c15_64, %c3_65] : memref<22x22xf32, #tpu.memory_space<vmem>>, vector<1x16xf32>
      tpu.vector_store %arg8[%c15_64, %c3_65], %80 {strides = array<i32>} : memref<22x22xf32, #tpu.memory_space<vmem>>, vector<1x16xf32>,
      %82 = vector.extract_strided_slice %22 {offsets = [0, 208], sizes = [1, 16], strides = [1, 1]} : vector<1x256xf32> to vector<1x16xf32>
      %c16 = arith.constant 16 : index
      %c3_66 = arith.constant 3 : index
      %83 = vector.load %arg7[%c16, %c3_66] : memref<22x22xf32, #tpu.memory_space<vmem>>, vector<1x16xf32>
      tpu.vector_store %arg7[%c16, %c3_66], %82 {strides = array<i32>} : memref<22x22xf32, #tpu.memory_space<vmem>>, vector<1x16xf32>,
      %84 = vector.extract_strided_slice %25 {offsets = [0, 208], sizes = [1, 16], strides = [1, 1]} : vector<1x256xf32> to vector<1x16xf32>
      %c16_67 = arith.constant 16 : index
      %c3_68 = arith.constant 3 : index
      %85 = vector.load %arg8[%c16_67, %c3_68] : memref<22x22xf32, #tpu.memory_space<vmem>>, vector<1x16xf32>
      tpu.vector_store %arg8[%c16_67, %c3_68], %84 {strides = array<i32>} : memref<22x22xf32, #tpu.memory_space<vmem>>, vector<1x16xf32>,
      %86 = vector.extract_strided_slice %22 {offsets = [0, 224], sizes = [1, 16], strides = [1, 1]} : vector<1x256xf32> to vector<1x16xf32>
      %c17 = arith.constant 17 : index
      %c3_69 = arith.constant 3 : index
      %87 = vector.load %arg7[%c17, %c3_69] : memref<22x22xf32, #tpu.memory_space<vmem>>, vector<1x16xf32>
      tpu.vector_store %arg7[%c17, %c3_69], %86 {strides = array<i32>} : memref<22x22xf32, #tpu.memory_space<vmem>>, vector<1x16xf32>,
      %88 = vector.extract_strided_slice %25 {offsets = [0, 224], sizes = [1, 16], strides = [1, 1]} : vector<1x256xf32> to vector<1x16xf32>
      %c17_70 = arith.constant 17 : index
      %c3_71 = arith.constant 3 : index
      %89 = vector.load %arg8[%c17_70, %c3_71] : memref<22x22xf32, #tpu.memory_space<vmem>>, vector<1x16xf32>
      tpu.vector_store %arg8[%c17_70, %c3_71], %88 {strides = array<i32>} : memref<22x22xf32, #tpu.memory_space<vmem>>, vector<1x16xf32>,
      %90 = vector.extract_strided_slice %22 {offsets = [0, 240], sizes = [1, 16], strides = [1, 1]} : vector<1x256xf32> to vector<1x16xf32>
      %c18 = arith.constant 18 : index
      %c3_72 = arith.constant 3 : index
      %91 = vector.load %arg7[%c18, %c3_72] : memref<22x22xf32, #tpu.memory_space<vmem>>, vector<1x16xf32>
      tpu.vector_store %arg7[%c18, %c3_72], %90 {strides = array<i32>} : memref<22x22xf32, #tpu.memory_space<vmem>>, vector<1x16xf32>,
      %92 = vector.extract_strided_slice %25 {offsets = [0, 240], sizes = [1, 16], strides = [1, 1]} : vector<1x256xf32> to vector<1x16xf32>
      %c18_73 = arith.constant 18 : index
      %c3_74 = arith.constant 3 : index
      %93 = vector.load %arg8[%c18_73, %c3_74] : memref<22x22xf32, #tpu.memory_space<vmem>>, vector<1x16xf32>
      tpu.vector_store %arg8[%c18_73, %c3_74], %92 {strides = array<i32>} : memref<22x22xf32, #tpu.memory_space<vmem>>, vector<1x16xf32>,
      %cst_75 = arith.constant 0.000000e+00 : f32
      %94 = vector.broadcast %cst_75 : f32 to vector<16x16xf32>
      %c0_76 = arith.constant 0 : index
      %95 = memref.load %arg2[%c0_76] : memref<98xf32, #tpu.memory_space<smem>>
      %c49 = arith.constant 49 : index
      %96 = memref.load %arg2[%c49] : memref<98xf32, #tpu.memory_space<smem>>
      %c0_77 = arith.constant 0 : index
      %c0_78 = arith.constant 0 : index
      %97 = vector.load %arg7[%c0_77, %c0_78] : memref<22x22xf32, #tpu.memory_space<vmem>>, vector<16x16xf32>
      %98 = vector.broadcast %95 : f32 to vector<16x16xf32>
      %99 = arith.mulf %98, %97 : vector<16x16xf32>
      %100 = arith.addf %94, %99 : vector<16x16xf32>
      %c0_79 = arith.constant 0 : index
      %c0_80 = arith.constant 0 : index
      %101 = vector.load %arg8[%c0_79, %c0_80] : memref<22x22xf32, #tpu.memory_space<vmem>>, vector<16x16xf32>
      %102 = vector.broadcast %96 : f32 to vector<16x16xf32>
      %103 = arith.mulf %102, %101 : vector<16x16xf32>
      %104 = arith.addf %100, %103 : vector<16x16xf32>
      %c1 = arith.constant 1 : index
      %105 = memref.load %arg2[%c1] : memref<98xf32, #tpu.memory_space<smem>>
      %c50 = arith.constant 50 : index
      %106 = memref.load %arg2[%c50] : memref<98xf32, #tpu.memory_space<smem>>
      %c0_81 = arith.constant 0 : index
      %c1_82 = arith.constant 1 : index
      %107 = vector.load %arg7[%c0_81, %c1_82] : memref<22x22xf32, #tpu.memory_space<vmem>>, vector<16x16xf32>
      %108 = vector.broadcast %105 : f32 to vector<16x16xf32>
      %109 = arith.mulf %108, %107 : vector<16x16xf32>
      %110 = arith.addf %104, %109 : vector<16x16xf32>
      %c0_83 = arith.constant 0 : index
      %c1_84 = arith.constant 1 : index
      %111 = vector.load %arg8[%c0_83, %c1_84] : memref<22x22xf32, #tpu.memory_space<vmem>>, vector<16x16xf32>
      %112 = vector.broadcast %106 : f32 to vector<16x16xf32>
      %113 = arith.mulf %112, %111 : vector<16x16xf32>
      %114 = arith.addf %110, %113 : vector<16x16xf32>
      %c2 = arith.constant 2 : index
      %115 = memref.load %arg2[%c2] : memref<98xf32, #tpu.memory_space<smem>>
      %c51 = arith.constant 51 : index
      %116 = memref.load %arg2[%c51] : memref<98xf32, #tpu.memory_space<smem>>
      %c0_85 = arith.constant 0 : index
      %c2_86 = arith.constant 2 : index
      %117 = vector.load %arg7[%c0_85, %c2_86] : memref<22x22xf32, #tpu.memory_space<vmem>>, vector<16x16xf32>
      %118 = vector.broadcast %115 : f32 to vector<16x16xf32>
      %119 = arith.mulf %118, %117 : vector<16x16xf32>
      %120 = arith.addf %114, %119 : vector<16x16xf32>
      %c0_87 = arith.constant 0 : index
      %c2_88 = arith.constant 2 : index
      %121 = vector.load %arg8[%c0_87, %c2_88] : memref<22x22xf32, #tpu.memory_space<vmem>>, vector<16x16xf32>
      %122 = vector.broadcast %116 : f32 to vector<16x16xf32>
      %123 = arith.mulf %122, %121 : vector<16x16xf32>
      %124 = arith.addf %120, %123 : vector<16x16xf32>
      %c3_89 = arith.constant 3 : index
      %125 = memref.load %arg2[%c3_89] : memref<98xf32, #tpu.memory_space<smem>>
      %c52 = arith.constant 52 : index
      %126 = memref.load %arg2[%c52] : memref<98xf32, #tpu.memory_space<smem>>
      %c0_90 = arith.constant 0 : index
      %c3_91 = arith.constant 3 : index
      %127 = vector.load %arg7[%c0_90, %c3_91] : memref<22x22xf32, #tpu.memory_space<vmem>>, vector<16x16xf32>
      %128 = vector.broadcast %125 : f32 to vector<16x16xf32>
      %129 = arith.mulf %128, %127 : vector<16x16xf32>
      %130 = arith.addf %124, %129 : vector<16x16xf32>
      %c0_92 = arith.constant 0 : index
      %c3_93 = arith.constant 3 : index
      %131 = vector.load %arg8[%c0_92, %c3_93] : memref<22x22xf32, #tpu.memory_space<vmem>>, vector<16x16xf32>
      %132 = vector.broadcast %126 : f32 to vector<16x16xf32>
      %133 = arith.mulf %132, %131 : vector<16x16xf32>
      %134 = arith.addf %130, %133 : vector<16x16xf32>
      %c4_94 = arith.constant 4 : index
      %135 = memref.load %arg2[%c4_94] : memref<98xf32, #tpu.memory_space<smem>>
      %c53 = arith.constant 53 : index
      %136 = memref.load %arg2[%c53] : memref<98xf32, #tpu.memory_space<smem>>
      %c0_95 = arith.constant 0 : index
      %c4_96 = arith.constant 4 : index
      %137 = vector.load %arg7[%c0_95, %c4_96] : memref<22x22xf32, #tpu.memory_space<vmem>>, vector<16x16xf32>
      %138 = vector.broadcast %135 : f32 to vector<16x16xf32>
      %139 = arith.mulf %138, %137 : vector<16x16xf32>
      %140 = arith.addf %134, %139 : vector<16x16xf32>
      %c0_97 = arith.constant 0 : index
      %c4_98 = arith.constant 4 : index
      %141 = vector.load %arg8[%c0_97, %c4_98] : memref<22x22xf32, #tpu.memory_space<vmem>>, vector<16x16xf32>
      %142 = vector.broadcast %136 : f32 to vector<16x16xf32>
      %143 = arith.mulf %142, %141 : vector<16x16xf32>
      %144 = arith.addf %140, %143 : vector<16x16xf32>
      %c5_99 = arith.constant 5 : index
      %145 = memref.load %arg2[%c5_99] : memref<98xf32, #tpu.memory_space<smem>>
      %c54 = arith.constant 54 : index
      %146 = memref.load %arg2[%c54] : memref<98xf32, #tpu.memory_space<smem>>
      %c0_100 = arith.constant 0 : index
      %c5_101 = arith.constant 5 : index
      %147 = vector.load %arg7[%c0_100, %c5_101] : memref<22x22xf32, #tpu.memory_space<vmem>>, vector<16x16xf32>
      %148 = vector.broadcast %145 : f32 to vector<16x16xf32>
      %149 = arith.mulf %148, %147 : vector<16x16xf32>
      %150 = arith.addf %144, %149 : vector<16x16xf32>
      %c0_102 = arith.constant 0 : index
      %c5_103 = arith.constant 5 : index
      %151 = vector.load %arg8[%c0_102, %c5_103] : memref<22x22xf32, #tpu.memory_space<vmem>>, vector<16x16xf32>
      %152 = vector.broadcast %146 : f32 to vector<16x16xf32>
      %153 = arith.mulf %152, %151 : vector<16x16xf32>
      %154 = arith.addf %150, %153 : vector<16x16xf32>
      %c6_104 = arith.constant 6 : index
      %155 = memref.load %arg2[%c6_104] : memref<98xf32, #tpu.memory_space<smem>>
      %c55 = arith.constant 55 : index
      %156 = memref.load %arg2[%c55] : memref<98xf32, #tpu.memory_space<smem>>
      %c0_105 = arith.constant 0 : index
      %c6_106 = arith.constant 6 : index
      %157 = vector.load %arg7[%c0_105, %c6_106] : memref<22x22xf32, #tpu.memory_space<vmem>>, vector<16x16xf32>
      %158 = vector.broadcast %155 : f32 to vector<16x16xf32>
      %159 = arith.mulf %158, %157 : vector<16x16xf32>
      %160 = arith.addf %154, %159 : vector<16x16xf32>
      %c0_107 = arith.constant 0 : index
      %c6_108 = arith.constant 6 : index
      %161 = vector.load %arg8[%c0_107, %c6_108] : memref<22x22xf32, #tpu.memory_space<vmem>>, vector<16x16xf32>
      %162 = vector.broadcast %156 : f32 to vector<16x16xf32>
      %163 = arith.mulf %162, %161 : vector<16x16xf32>
      %164 = arith.addf %160, %163 : vector<16x16xf32>
      %c7_109 = arith.constant 7 : index
      %165 = memref.load %arg2[%c7_109] : memref<98xf32, #tpu.memory_space<smem>>
      %c56 = arith.constant 56 : index
      %166 = memref.load %arg2[%c56] : memref<98xf32, #tpu.memory_space<smem>>
      %c1_110 = arith.constant 1 : index
      %c0_111 = arith.constant 0 : index
      %167 = vector.load %arg7[%c1_110, %c0_111] : memref<22x22xf32, #tpu.memory_space<vmem>>, vector<16x16xf32>
      %168 = vector.broadcast %165 : f32 to vector<16x16xf32>
      %169 = arith.mulf %168, %167 : vector<16x16xf32>
      %170 = arith.addf %164, %169 : vector<16x16xf32>
      %c1_112 = arith.constant 1 : index
      %c0_113 = arith.constant 0 : index
      %171 = vector.load %arg8[%c1_112, %c0_113] : memref<22x22xf32, #tpu.memory_space<vmem>>, vector<16x16xf32>
      %172 = vector.broadcast %166 : f32 to vector<16x16xf32>
      %173 = arith.mulf %172, %171 : vector<16x16xf32>
      %174 = arith.addf %170, %173 : vector<16x16xf32>
      %c8_114 = arith.constant 8 : index
      %175 = memref.load %arg2[%c8_114] : memref<98xf32, #tpu.memory_space<smem>>
      %c57 = arith.constant 57 : index
      %176 = memref.load %arg2[%c57] : memref<98xf32, #tpu.memory_space<smem>>
      %c1_115 = arith.constant 1 : index
      %c1_116 = arith.constant 1 : index
      %177 = vector.load %arg7[%c1_115, %c1_116] : memref<22x22xf32, #tpu.memory_space<vmem>>, vector<16x16xf32>
      %178 = vector.broadcast %175 : f32 to vector<16x16xf32>
      %179 = arith.mulf %178, %177 : vector<16x16xf32>
      %180 = arith.addf %174, %179 : vector<16x16xf32>
      %c1_117 = arith.constant 1 : index
      %c1_118 = arith.constant 1 : index
      %181 = vector.load %arg8[%c1_117, %c1_118] : memref<22x22xf32, #tpu.memory_space<vmem>>, vector<16x16xf32>
      %182 = vector.broadcast %176 : f32 to vector<16x16xf32>
      %183 = arith.mulf %182, %181 : vector<16x16xf32>
      %184 = arith.addf %180, %183 : vector<16x16xf32>
      %c9_119 = arith.constant 9 : index
      %185 = memref.load %arg2[%c9_119] : memref<98xf32, #tpu.memory_space<smem>>
      %c58 = arith.constant 58 : index
      %186 = memref.load %arg2[%c58] : memref<98xf32, #tpu.memory_space<smem>>
      %c1_120 = arith.constant 1 : index
      %c2_121 = arith.constant 2 : index
      %187 = vector.load %arg7[%c1_120, %c2_121] : memref<22x22xf32, #tpu.memory_space<vmem>>, vector<16x16xf32>
      %188 = vector.broadcast %185 : f32 to vector<16x16xf32>
      %189 = arith.mulf %188, %187 : vector<16x16xf32>
      %190 = arith.addf %184, %189 : vector<16x16xf32>
      %c1_122 = arith.constant 1 : index
      %c2_123 = arith.constant 2 : index
      %191 = vector.load %arg8[%c1_122, %c2_123] : memref<22x22xf32, #tpu.memory_space<vmem>>, vector<16x16xf32>
      %192 = vector.broadcast %186 : f32 to vector<16x16xf32>
      %193 = arith.mulf %192, %191 : vector<16x16xf32>
      %194 = arith.addf %190, %193 : vector<16x16xf32>
      %c10_124 = arith.constant 10 : index
      %195 = memref.load %arg2[%c10_124] : memref<98xf32, #tpu.memory_space<smem>>
      %c59 = arith.constant 59 : index
      %196 = memref.load %arg2[%c59] : memref<98xf32, #tpu.memory_space<smem>>
      %c1_125 = arith.constant 1 : index
      %c3_126 = arith.constant 3 : index
      %197 = vector.load %arg7[%c1_125, %c3_126] : memref<22x22xf32, #tpu.memory_space<vmem>>, vector<16x16xf32>
      %198 = vector.broadcast %195 : f32 to vector<16x16xf32>
      %199 = arith.mulf %198, %197 : vector<16x16xf32>
      %200 = arith.addf %194, %199 : vector<16x16xf32>
      %c1_127 = arith.constant 1 : index
      %c3_128 = arith.constant 3 : index
      %201 = vector.load %arg8[%c1_127, %c3_128] : memref<22x22xf32, #tpu.memory_space<vmem>>, vector<16x16xf32>
      %202 = vector.broadcast %196 : f32 to vector<16x16xf32>
      %203 = arith.mulf %202, %201 : vector<16x16xf32>
      %204 = arith.addf %200, %203 : vector<16x16xf32>
      %c11_129 = arith.constant 11 : index
      %205 = memref.load %arg2[%c11_129] : memref<98xf32, #tpu.memory_space<smem>>
      %c60 = arith.constant 60 : index
      %206 = memref.load %arg2[%c60] : memref<98xf32, #tpu.memory_space<smem>>
      %c1_130 = arith.constant 1 : index
      %c4_131 = arith.constant 4 : index
      %207 = vector.load %arg7[%c1_130, %c4_131] : memref<22x22xf32, #tpu.memory_space<vmem>>, vector<16x16xf32>
      %208 = vector.broadcast %205 : f32 to vector<16x16xf32>
      %209 = arith.mulf %208, %207 : vector<16x16xf32>
      %210 = arith.addf %204, %209 : vector<16x16xf32>
      %c1_132 = arith.constant 1 : index
      %c4_133 = arith.constant 4 : index
      %211 = vector.load %arg8[%c1_132, %c4_133] : memref<22x22xf32, #tpu.memory_space<vmem>>, vector<16x16xf32>
      %212 = vector.broadcast %206 : f32 to vector<16x16xf32>
      %213 = arith.mulf %212, %211 : vector<16x16xf32>
      %214 = arith.addf %210, %213 : vector<16x16xf32>
      %c12_134 = arith.constant 12 : index
      %215 = memref.load %arg2[%c12_134] : memref<98xf32, #tpu.memory_space<smem>>
      %c61 = arith.constant 61 : index
      %216 = memref.load %arg2[%c61] : memref<98xf32, #tpu.memory_space<smem>>
      %c1_135 = arith.constant 1 : index
      %c5_136 = arith.constant 5 : index
      %217 = vector.load %arg7[%c1_135, %c5_136] : memref<22x22xf32, #tpu.memory_space<vmem>>, vector<16x16xf32>
      %218 = vector.broadcast %215 : f32 to vector<16x16xf32>
      %219 = arith.mulf %218, %217 : vector<16x16xf32>
      %220 = arith.addf %214, %219 : vector<16x16xf32>
      %c1_137 = arith.constant 1 : index
      %c5_138 = arith.constant 5 : index
      %221 = vector.load %arg8[%c1_137, %c5_138] : memref<22x22xf32, #tpu.memory_space<vmem>>, vector<16x16xf32>
      %222 = vector.broadcast %216 : f32 to vector<16x16xf32>
      %223 = arith.mulf %222, %221 : vector<16x16xf32>
      %224 = arith.addf %220, %223 : vector<16x16xf32>
      %c13_139 = arith.constant 13 : index
      %225 = memref.load %arg2[%c13_139] : memref<98xf32, #tpu.memory_space<smem>>
      %c62 = arith.constant 62 : index
      %226 = memref.load %arg2[%c62] : memref<98xf32, #tpu.memory_space<smem>>
      %c1_140 = arith.constant 1 : index
      %c6_141 = arith.constant 6 : index
      %227 = vector.load %arg7[%c1_140, %c6_141] : memref<22x22xf32, #tpu.memory_space<vmem>>, vector<16x16xf32>
      %228 = vector.broadcast %225 : f32 to vector<16x16xf32>
      %229 = arith.mulf %228, %227 : vector<16x16xf32>
      %230 = arith.addf %224, %229 : vector<16x16xf32>
      %c1_142 = arith.constant 1 : index
      %c6_143 = arith.constant 6 : index
      %231 = vector.load %arg8[%c1_142, %c6_143] : memref<22x22xf32, #tpu.memory_space<vmem>>, vector<16x16xf32>
      %232 = vector.broadcast %226 : f32 to vector<16x16xf32>
      %233 = arith.mulf %232, %231 : vector<16x16xf32>
      %234 = arith.addf %230, %233 : vector<16x16xf32>
      %c14_144 = arith.constant 14 : index
      %235 = memref.load %arg2[%c14_144] : memref<98xf32, #tpu.memory_space<smem>>
      %c63 = arith.constant 63 : index
      %236 = memref.load %arg2[%c63] : memref<98xf32, #tpu.memory_space<smem>>
      %c2_145 = arith.constant 2 : index
      %c0_146 = arith.constant 0 : index
      %237 = vector.load %arg7[%c2_145, %c0_146] : memref<22x22xf32, #tpu.memory_space<vmem>>, vector<16x16xf32>
      %238 = vector.broadcast %235 : f32 to vector<16x16xf32>
      %239 = arith.mulf %238, %237 : vector<16x16xf32>
      %240 = arith.addf %234, %239 : vector<16x16xf32>
      %c2_147 = arith.constant 2 : index
      %c0_148 = arith.constant 0 : index
      %241 = vector.load %arg8[%c2_147, %c0_148] : memref<22x22xf32, #tpu.memory_space<vmem>>, vector<16x16xf32>
      %242 = vector.broadcast %236 : f32 to vector<16x16xf32>
      %243 = arith.mulf %242, %241 : vector<16x16xf32>
      %244 = arith.addf %240, %243 : vector<16x16xf32>
      %c15_149 = arith.constant 15 : index
      %245 = memref.load %arg2[%c15_149] : memref<98xf32, #tpu.memory_space<smem>>
      %c64 = arith.constant 64 : index
      %246 = memref.load %arg2[%c64] : memref<98xf32, #tpu.memory_space<smem>>
      %c2_150 = arith.constant 2 : index
      %c1_151 = arith.constant 1 : index
      %247 = vector.load %arg7[%c2_150, %c1_151] : memref<22x22xf32, #tpu.memory_space<vmem>>, vector<16x16xf32>
      %248 = vector.broadcast %245 : f32 to vector<16x16xf32>
      %249 = arith.mulf %248, %247 : vector<16x16xf32>
      %250 = arith.addf %244, %249 : vector<16x16xf32>
      %c2_152 = arith.constant 2 : index
      %c1_153 = arith.constant 1 : index
      %251 = vector.load %arg8[%c2_152, %c1_153] : memref<22x22xf32, #tpu.memory_space<vmem>>, vector<16x16xf32>
      %252 = vector.broadcast %246 : f32 to vector<16x16xf32>
      %253 = arith.mulf %252, %251 : vector<16x16xf32>
      %254 = arith.addf %250, %253 : vector<16x16xf32>
      %c16_154 = arith.constant 16 : index
      %255 = memref.load %arg2[%c16_154] : memref<98xf32, #tpu.memory_space<smem>>
      %c65 = arith.constant 65 : index
      %256 = memref.load %arg2[%c65] : memref<98xf32, #tpu.memory_space<smem>>
      %c2_155 = arith.constant 2 : index
      %c2_156 = arith.constant 2 : index
      %257 = vector.load %arg7[%c2_155, %c2_156] : memref<22x22xf32, #tpu.memory_space<vmem>>, vector<16x16xf32>
      %258 = vector.broadcast %255 : f32 to vector<16x16xf32>
      %259 = arith.mulf %258, %257 : vector<16x16xf32>
      %260 = arith.addf %254, %259 : vector<16x16xf32>
      %c2_157 = arith.constant 2 : index
      %c2_158 = arith.constant 2 : index
      %261 = vector.load %arg8[%c2_157, %c2_158] : memref<22x22xf32, #tpu.memory_space<vmem>>, vector<16x16xf32>
      %262 = vector.broadcast %256 : f32 to vector<16x16xf32>
      %263 = arith.mulf %262, %261 : vector<16x16xf32>
      %264 = arith.addf %260, %263 : vector<16x16xf32>
      %c17_159 = arith.constant 17 : index
      %265 = memref.load %arg2[%c17_159] : memref<98xf32, #tpu.memory_space<smem>>
      %c66 = arith.constant 66 : index
      %266 = memref.load %arg2[%c66] : memref<98xf32, #tpu.memory_space<smem>>
      %c2_160 = arith.constant 2 : index
      %c3_161 = arith.constant 3 : index
      %267 = vector.load %arg7[%c2_160, %c3_161] : memref<22x22xf32, #tpu.memory_space<vmem>>, vector<16x16xf32>
      %268 = vector.broadcast %265 : f32 to vector<16x16xf32>
      %269 = arith.mulf %268, %267 : vector<16x16xf32>
      %270 = arith.addf %264, %269 : vector<16x16xf32>
      %c2_162 = arith.constant 2 : index
      %c3_163 = arith.constant 3 : index
      %271 = vector.load %arg8[%c2_162, %c3_163] : memref<22x22xf32, #tpu.memory_space<vmem>>, vector<16x16xf32>
      %272 = vector.broadcast %266 : f32 to vector<16x16xf32>
      %273 = arith.mulf %272, %271 : vector<16x16xf32>
      %274 = arith.addf %270, %273 : vector<16x16xf32>
      %c18_164 = arith.constant 18 : index
      %275 = memref.load %arg2[%c18_164] : memref<98xf32, #tpu.memory_space<smem>>
      %c67 = arith.constant 67 : index
      %276 = memref.load %arg2[%c67] : memref<98xf32, #tpu.memory_space<smem>>
      %c2_165 = arith.constant 2 : index
      %c4_166 = arith.constant 4 : index
      %277 = vector.load %arg7[%c2_165, %c4_166] : memref<22x22xf32, #tpu.memory_space<vmem>>, vector<16x16xf32>
      %278 = vector.broadcast %275 : f32 to vector<16x16xf32>
      %279 = arith.mulf %278, %277 : vector<16x16xf32>
      %280 = arith.addf %274, %279 : vector<16x16xf32>
      %c2_167 = arith.constant 2 : index
      %c4_168 = arith.constant 4 : index
      %281 = vector.load %arg8[%c2_167, %c4_168] : memref<22x22xf32, #tpu.memory_space<vmem>>, vector<16x16xf32>
      %282 = vector.broadcast %276 : f32 to vector<16x16xf32>
      %283 = arith.mulf %282, %281 : vector<16x16xf32>
      %284 = arith.addf %280, %283 : vector<16x16xf32>
      %c19 = arith.constant 19 : index
      %285 = memref.load %arg2[%c19] : memref<98xf32, #tpu.memory_space<smem>>
      %c68 = arith.constant 68 : index
      %286 = memref.load %arg2[%c68] : memref<98xf32, #tpu.memory_space<smem>>
      %c2_169 = arith.constant 2 : index
      %c5_170 = arith.constant 5 : index
      %287 = vector.load %arg7[%c2_169, %c5_170] : memref<22x22xf32, #tpu.memory_space<vmem>>, vector<16x16xf32>
      %288 = vector.broadcast %285 : f32 to vector<16x16xf32>
      %289 = arith.mulf %288, %287 : vector<16x16xf32>
      %290 = arith.addf %284, %289 : vector<16x16xf32>
      %c2_171 = arith.constant 2 : index
      %c5_172 = arith.constant 5 : index
      %291 = vector.load %arg8[%c2_171, %c5_172] : memref<22x22xf32, #tpu.memory_space<vmem>>, vector<16x16xf32>
      %292 = vector.broadcast %286 : f32 to vector<16x16xf32>
      %293 = arith.mulf %292, %291 : vector<16x16xf32>
      %294 = arith.addf %290, %293 : vector<16x16xf32>
      %c20 = arith.constant 20 : index
      %295 = memref.load %arg2[%c20] : memref<98xf32, #tpu.memory_space<smem>>
      %c69 = arith.constant 69 : index
      %296 = memref.load %arg2[%c69] : memref<98xf32, #tpu.memory_space<smem>>
      %c2_173 = arith.constant 2 : index
      %c6_174 = arith.constant 6 : index
      %297 = vector.load %arg7[%c2_173, %c6_174] : memref<22x22xf32, #tpu.memory_space<vmem>>, vector<16x16xf32>
      %298 = vector.broadcast %295 : f32 to vector<16x16xf32>
      %299 = arith.mulf %298, %297 : vector<16x16xf32>
      %300 = arith.addf %294, %299 : vector<16x16xf32>
      %c2_175 = arith.constant 2 : index
      %c6_176 = arith.constant 6 : index
      %301 = vector.load %arg8[%c2_175, %c6_176] : memref<22x22xf32, #tpu.memory_space<vmem>>, vector<16x16xf32>
      %302 = vector.broadcast %296 : f32 to vector<16x16xf32>
      %303 = arith.mulf %302, %301 : vector<16x16xf32>
      %304 = arith.addf %300, %303 : vector<16x16xf32>
      %c21 = arith.constant 21 : index
      %305 = memref.load %arg2[%c21] : memref<98xf32, #tpu.memory_space<smem>>
      %c70 = arith.constant 70 : index
      %306 = memref.load %arg2[%c70] : memref<98xf32, #tpu.memory_space<smem>>
      %c3_177 = arith.constant 3 : index
      %c0_178 = arith.constant 0 : index
      %307 = vector.load %arg7[%c3_177, %c0_178] : memref<22x22xf32, #tpu.memory_space<vmem>>, vector<16x16xf32>
      %308 = vector.broadcast %305 : f32 to vector<16x16xf32>
      %309 = arith.mulf %308, %307 : vector<16x16xf32>
      %310 = arith.addf %304, %309 : vector<16x16xf32>
      %c3_179 = arith.constant 3 : index
      %c0_180 = arith.constant 0 : index
      %311 = vector.load %arg8[%c3_179, %c0_180] : memref<22x22xf32, #tpu.memory_space<vmem>>, vector<16x16xf32>
      %312 = vector.broadcast %306 : f32 to vector<16x16xf32>
      %313 = arith.mulf %312, %311 : vector<16x16xf32>
      %314 = arith.addf %310, %313 : vector<16x16xf32>
      %c22 = arith.constant 22 : index
      %315 = memref.load %arg2[%c22] : memref<98xf32, #tpu.memory_space<smem>>
      %c71 = arith.constant 71 : index
      %316 = memref.load %arg2[%c71] : memref<98xf32, #tpu.memory_space<smem>>
      %c3_181 = arith.constant 3 : index
      %c1_182 = arith.constant 1 : index
      %317 = vector.load %arg7[%c3_181, %c1_182] : memref<22x22xf32, #tpu.memory_space<vmem>>, vector<16x16xf32>
      %318 = vector.broadcast %315 : f32 to vector<16x16xf32>
      %319 = arith.mulf %318, %317 : vector<16x16xf32>
      %320 = arith.addf %314, %319 : vector<16x16xf32>
      %c3_183 = arith.constant 3 : index
      %c1_184 = arith.constant 1 : index
      %321 = vector.load %arg8[%c3_183, %c1_184] : memref<22x22xf32, #tpu.memory_space<vmem>>, vector<16x16xf32>
      %322 = vector.broadcast %316 : f32 to vector<16x16xf32>
      %323 = arith.mulf %322, %321 : vector<16x16xf32>
      %324 = arith.addf %320, %323 : vector<16x16xf32>
      %c23 = arith.constant 23 : index
      %325 = memref.load %arg2[%c23] : memref<98xf32, #tpu.memory_space<smem>>
      %c72 = arith.constant 72 : index
      %326 = memref.load %arg2[%c72] : memref<98xf32, #tpu.memory_space<smem>>
      %c3_185 = arith.constant 3 : index
      %c2_186 = arith.constant 2 : index
      %327 = vector.load %arg7[%c3_185, %c2_186] : memref<22x22xf32, #tpu.memory_space<vmem>>, vector<16x16xf32>
      %328 = vector.broadcast %325 : f32 to vector<16x16xf32>
      %329 = arith.mulf %328, %327 : vector<16x16xf32>
      %330 = arith.addf %324, %329 : vector<16x16xf32>
      %c3_187 = arith.constant 3 : index
      %c2_188 = arith.constant 2 : index
      %331 = vector.load %arg8[%c3_187, %c2_188] : memref<22x22xf32, #tpu.memory_space<vmem>>, vector<16x16xf32>
      %332 = vector.broadcast %326 : f32 to vector<16x16xf32>
      %333 = arith.mulf %332, %331 : vector<16x16xf32>
      %334 = arith.addf %330, %333 : vector<16x16xf32>
      %c24 = arith.constant 24 : index
      %335 = memref.load %arg2[%c24] : memref<98xf32, #tpu.memory_space<smem>>
      %c73 = arith.constant 73 : index
      %336 = memref.load %arg2[%c73] : memref<98xf32, #tpu.memory_space<smem>>
      %c3_189 = arith.constant 3 : index
      %c3_190 = arith.constant 3 : index
      %337 = vector.load %arg7[%c3_189, %c3_190] : memref<22x22xf32, #tpu.memory_space<vmem>>, vector<16x16xf32>
      %338 = vector.broadcast %335 : f32 to vector<16x16xf32>
      %339 = arith.mulf %338, %337 : vector<16x16xf32>
      %340 = arith.addf %334, %339 : vector<16x16xf32>
      %c3_191 = arith.constant 3 : index
      %c3_192 = arith.constant 3 : index
      %341 = vector.load %arg8[%c3_191, %c3_192] : memref<22x22xf32, #tpu.memory_space<vmem>>, vector<16x16xf32>
      %342 = vector.broadcast %336 : f32 to vector<16x16xf32>
      %343 = arith.mulf %342, %341 : vector<16x16xf32>
      %344 = arith.addf %340, %343 : vector<16x16xf32>
      %c25 = arith.constant 25 : index
      %345 = memref.load %arg2[%c25] : memref<98xf32, #tpu.memory_space<smem>>
      %c74 = arith.constant 74 : index
      %346 = memref.load %arg2[%c74] : memref<98xf32, #tpu.memory_space<smem>>
      %c3_193 = arith.constant 3 : index
      %c4_194 = arith.constant 4 : index
      %347 = vector.load %arg7[%c3_193, %c4_194] : memref<22x22xf32, #tpu.memory_space<vmem>>, vector<16x16xf32>
      %348 = vector.broadcast %345 : f32 to vector<16x16xf32>
      %349 = arith.mulf %348, %347 : vector<16x16xf32>
      %350 = arith.addf %344, %349 : vector<16x16xf32>
      %c3_195 = arith.constant 3 : index
      %c4_196 = arith.constant 4 : index
      %351 = vector.load %arg8[%c3_195, %c4_196] : memref<22x22xf32, #tpu.memory_space<vmem>>, vector<16x16xf32>
      %352 = vector.broadcast %346 : f32 to vector<16x16xf32>
      %353 = arith.mulf %352, %351 : vector<16x16xf32>
      %354 = arith.addf %350, %353 : vector<16x16xf32>
      %c26 = arith.constant 26 : index
      %355 = memref.load %arg2[%c26] : memref<98xf32, #tpu.memory_space<smem>>
      %c75 = arith.constant 75 : index
      %356 = memref.load %arg2[%c75] : memref<98xf32, #tpu.memory_space<smem>>
      %c3_197 = arith.constant 3 : index
      %c5_198 = arith.constant 5 : index
      %357 = vector.load %arg7[%c3_197, %c5_198] : memref<22x22xf32, #tpu.memory_space<vmem>>, vector<16x16xf32>
      %358 = vector.broadcast %355 : f32 to vector<16x16xf32>
      %359 = arith.mulf %358, %357 : vector<16x16xf32>
      %360 = arith.addf %354, %359 : vector<16x16xf32>
      %c3_199 = arith.constant 3 : index
      %c5_200 = arith.constant 5 : index
      %361 = vector.load %arg8[%c3_199, %c5_200] : memref<22x22xf32, #tpu.memory_space<vmem>>, vector<16x16xf32>
      %362 = vector.broadcast %356 : f32 to vector<16x16xf32>
      %363 = arith.mulf %362, %361 : vector<16x16xf32>
      %364 = arith.addf %360, %363 : vector<16x16xf32>
      %c27 = arith.constant 27 : index
      %365 = memref.load %arg2[%c27] : memref<98xf32, #tpu.memory_space<smem>>
      %c76 = arith.constant 76 : index
      %366 = memref.load %arg2[%c76] : memref<98xf32, #tpu.memory_space<smem>>
      %c3_201 = arith.constant 3 : index
      %c6_202 = arith.constant 6 : index
      %367 = vector.load %arg7[%c3_201, %c6_202] : memref<22x22xf32, #tpu.memory_space<vmem>>, vector<16x16xf32>
      %368 = vector.broadcast %365 : f32 to vector<16x16xf32>
      %369 = arith.mulf %368, %367 : vector<16x16xf32>
      %370 = arith.addf %364, %369 : vector<16x16xf32>
      %c3_203 = arith.constant 3 : index
      %c6_204 = arith.constant 6 : index
      %371 = vector.load %arg8[%c3_203, %c6_204] : memref<22x22xf32, #tpu.memory_space<vmem>>, vector<16x16xf32>
      %372 = vector.broadcast %366 : f32 to vector<16x16xf32>
      %373 = arith.mulf %372, %371 : vector<16x16xf32>
      %374 = arith.addf %370, %373 : vector<16x16xf32>
      %c28 = arith.constant 28 : index
      %375 = memref.load %arg2[%c28] : memref<98xf32, #tpu.memory_space<smem>>
      %c77 = arith.constant 77 : index
      %376 = memref.load %arg2[%c77] : memref<98xf32, #tpu.memory_space<smem>>
      %c4_205 = arith.constant 4 : index
      %c0_206 = arith.constant 0 : index
      %377 = vector.load %arg7[%c4_205, %c0_206] : memref<22x22xf32, #tpu.memory_space<vmem>>, vector<16x16xf32>
      %378 = vector.broadcast %375 : f32 to vector<16x16xf32>
      %379 = arith.mulf %378, %377 : vector<16x16xf32>
      %380 = arith.addf %374, %379 : vector<16x16xf32>
      %c4_207 = arith.constant 4 : index
      %c0_208 = arith.constant 0 : index
      %381 = vector.load %arg8[%c4_207, %c0_208] : memref<22x22xf32, #tpu.memory_space<vmem>>, vector<16x16xf32>
      %382 = vector.broadcast %376 : f32 to vector<16x16xf32>
      %383 = arith.mulf %382, %381 : vector<16x16xf32>
      %384 = arith.addf %380, %383 : vector<16x16xf32>
      %c29 = arith.constant 29 : index
      %385 = memref.load %arg2[%c29] : memref<98xf32, #tpu.memory_space<smem>>
      %c78 = arith.constant 78 : index
      %386 = memref.load %arg2[%c78] : memref<98xf32, #tpu.memory_space<smem>>
      %c4_209 = arith.constant 4 : index
      %c1_210 = arith.constant 1 : index
      %387 = vector.load %arg7[%c4_209, %c1_210] : memref<22x22xf32, #tpu.memory_space<vmem>>, vector<16x16xf32>
      %388 = vector.broadcast %385 : f32 to vector<16x16xf32>
      %389 = arith.mulf %388, %387 : vector<16x16xf32>
      %390 = arith.addf %384, %389 : vector<16x16xf32>
      %c4_211 = arith.constant 4 : index
      %c1_212 = arith.constant 1 : index
      %391 = vector.load %arg8[%c4_211, %c1_212] : memref<22x22xf32, #tpu.memory_space<vmem>>, vector<16x16xf32>
      %392 = vector.broadcast %386 : f32 to vector<16x16xf32>
      %393 = arith.mulf %392, %391 : vector<16x16xf32>
      %394 = arith.addf %390, %393 : vector<16x16xf32>
      %c30 = arith.constant 30 : index
      %395 = memref.load %arg2[%c30] : memref<98xf32, #tpu.memory_space<smem>>
      %c79 = arith.constant 79 : index
      %396 = memref.load %arg2[%c79] : memref<98xf32, #tpu.memory_space<smem>>
      %c4_213 = arith.constant 4 : index
      %c2_214 = arith.constant 2 : index
      %397 = vector.load %arg7[%c4_213, %c2_214] : memref<22x22xf32, #tpu.memory_space<vmem>>, vector<16x16xf32>
      %398 = vector.broadcast %395 : f32 to vector<16x16xf32>
      %399 = arith.mulf %398, %397 : vector<16x16xf32>
      %400 = arith.addf %394, %399 : vector<16x16xf32>
      %c4_215 = arith.constant 4 : index
      %c2_216 = arith.constant 2 : index
      %401 = vector.load %arg8[%c4_215, %c2_216] : memref<22x22xf32, #tpu.memory_space<vmem>>, vector<16x16xf32>
      %402 = vector.broadcast %396 : f32 to vector<16x16xf32>
      %403 = arith.mulf %402, %401 : vector<16x16xf32>
      %404 = arith.addf %400, %403 : vector<16x16xf32>
      %c31 = arith.constant 31 : index
      %405 = memref.load %arg2[%c31] : memref<98xf32, #tpu.memory_space<smem>>
      %c80 = arith.constant 80 : index
      %406 = memref.load %arg2[%c80] : memref<98xf32, #tpu.memory_space<smem>>
      %c4_217 = arith.constant 4 : index
      %c3_218 = arith.constant 3 : index
      %407 = vector.load %arg7[%c4_217, %c3_218] : memref<22x22xf32, #tpu.memory_space<vmem>>, vector<16x16xf32>
      %408 = vector.broadcast %405 : f32 to vector<16x16xf32>
      %409 = arith.mulf %408, %407 : vector<16x16xf32>
      %410 = arith.addf %404, %409 : vector<16x16xf32>
      %c4_219 = arith.constant 4 : index
      %c3_220 = arith.constant 3 : index
      %411 = vector.load %arg8[%c4_219, %c3_220] : memref<22x22xf32, #tpu.memory_space<vmem>>, vector<16x16xf32>
      %412 = vector.broadcast %406 : f32 to vector<16x16xf32>
      %413 = arith.mulf %412, %411 : vector<16x16xf32>
      %414 = arith.addf %410, %413 : vector<16x16xf32>
      %c32 = arith.constant 32 : index
      %415 = memref.load %arg2[%c32] : memref<98xf32, #tpu.memory_space<smem>>
      %c81 = arith.constant 81 : index
      %416 = memref.load %arg2[%c81] : memref<98xf32, #tpu.memory_space<smem>>
      %c4_221 = arith.constant 4 : index
      %c4_222 = arith.constant 4 : index
      %417 = vector.load %arg7[%c4_221, %c4_222] : memref<22x22xf32, #tpu.memory_space<vmem>>, vector<16x16xf32>
      %418 = vector.broadcast %415 : f32 to vector<16x16xf32>
      %419 = arith.mulf %418, %417 : vector<16x16xf32>
      %420 = arith.addf %414, %419 : vector<16x16xf32>
      %c4_223 = arith.constant 4 : index
      %c4_224 = arith.constant 4 : index
      %421 = vector.load %arg8[%c4_223, %c4_224] : memref<22x22xf32, #tpu.memory_space<vmem>>, vector<16x16xf32>
      %422 = vector.broadcast %416 : f32 to vector<16x16xf32>
      %423 = arith.mulf %422, %421 : vector<16x16xf32>
      %424 = arith.addf %420, %423 : vector<16x16xf32>
      %c33 = arith.constant 33 : index
      %425 = memref.load %arg2[%c33] : memref<98xf32, #tpu.memory_space<smem>>
      %c82 = arith.constant 82 : index
      %426 = memref.load %arg2[%c82] : memref<98xf32, #tpu.memory_space<smem>>
      %c4_225 = arith.constant 4 : index
      %c5_226 = arith.constant 5 : index
      %427 = vector.load %arg7[%c4_225, %c5_226] : memref<22x22xf32, #tpu.memory_space<vmem>>, vector<16x16xf32>
      %428 = vector.broadcast %425 : f32 to vector<16x16xf32>
      %429 = arith.mulf %428, %427 : vector<16x16xf32>
      %430 = arith.addf %424, %429 : vector<16x16xf32>
      %c4_227 = arith.constant 4 : index
      %c5_228 = arith.constant 5 : index
      %431 = vector.load %arg8[%c4_227, %c5_228] : memref<22x22xf32, #tpu.memory_space<vmem>>, vector<16x16xf32>
      %432 = vector.broadcast %426 : f32 to vector<16x16xf32>
      %433 = arith.mulf %432, %431 : vector<16x16xf32>
      %434 = arith.addf %430, %433 : vector<16x16xf32>
      %c34 = arith.constant 34 : index
      %435 = memref.load %arg2[%c34] : memref<98xf32, #tpu.memory_space<smem>>
      %c83 = arith.constant 83 : index
      %436 = memref.load %arg2[%c83] : memref<98xf32, #tpu.memory_space<smem>>
      %c4_229 = arith.constant 4 : index
      %c6_230 = arith.constant 6 : index
      %437 = vector.load %arg7[%c4_229, %c6_230] : memref<22x22xf32, #tpu.memory_space<vmem>>, vector<16x16xf32>
      %438 = vector.broadcast %435 : f32 to vector<16x16xf32>
      %439 = arith.mulf %438, %437 : vector<16x16xf32>
      %440 = arith.addf %434, %439 : vector<16x16xf32>
      %c4_231 = arith.constant 4 : index
      %c6_232 = arith.constant 6 : index
      %441 = vector.load %arg8[%c4_231, %c6_232] : memref<22x22xf32, #tpu.memory_space<vmem>>, vector<16x16xf32>
      %442 = vector.broadcast %436 : f32 to vector<16x16xf32>
      %443 = arith.mulf %442, %441 : vector<16x16xf32>
      %444 = arith.addf %440, %443 : vector<16x16xf32>
      %c35 = arith.constant 35 : index
      %445 = memref.load %arg2[%c35] : memref<98xf32, #tpu.memory_space<smem>>
      %c84 = arith.constant 84 : index
      %446 = memref.load %arg2[%c84] : memref<98xf32, #tpu.memory_space<smem>>
      %c5_233 = arith.constant 5 : index
      %c0_234 = arith.constant 0 : index
      %447 = vector.load %arg7[%c5_233, %c0_234] : memref<22x22xf32, #tpu.memory_space<vmem>>, vector<16x16xf32>
      %448 = vector.broadcast %445 : f32 to vector<16x16xf32>
      %449 = arith.mulf %448, %447 : vector<16x16xf32>
      %450 = arith.addf %444, %449 : vector<16x16xf32>
      %c5_235 = arith.constant 5 : index
      %c0_236 = arith.constant 0 : index
      %451 = vector.load %arg8[%c5_235, %c0_236] : memref<22x22xf32, #tpu.memory_space<vmem>>, vector<16x16xf32>
      %452 = vector.broadcast %446 : f32 to vector<16x16xf32>
      %453 = arith.mulf %452, %451 : vector<16x16xf32>
      %454 = arith.addf %450, %453 : vector<16x16xf32>
      %c36 = arith.constant 36 : index
      %455 = memref.load %arg2[%c36] : memref<98xf32, #tpu.memory_space<smem>>
      %c85 = arith.constant 85 : index
      %456 = memref.load %arg2[%c85] : memref<98xf32, #tpu.memory_space<smem>>
      %c5_237 = arith.constant 5 : index
      %c1_238 = arith.constant 1 : index
      %457 = vector.load %arg7[%c5_237, %c1_238] : memref<22x22xf32, #tpu.memory_space<vmem>>, vector<16x16xf32>
      %458 = vector.broadcast %455 : f32 to vector<16x16xf32>
      %459 = arith.mulf %458, %457 : vector<16x16xf32>
      %460 = arith.addf %454, %459 : vector<16x16xf32>
      %c5_239 = arith.constant 5 : index
      %c1_240 = arith.constant 1 : index
      %461 = vector.load %arg8[%c5_239, %c1_240] : memref<22x22xf32, #tpu.memory_space<vmem>>, vector<16x16xf32>
      %462 = vector.broadcast %456 : f32 to vector<16x16xf32>
      %463 = arith.mulf %462, %461 : vector<16x16xf32>
      %464 = arith.addf %460, %463 : vector<16x16xf32>
      %c37 = arith.constant 37 : index
      %465 = memref.load %arg2[%c37] : memref<98xf32, #tpu.memory_space<smem>>
      %c86 = arith.constant 86 : index
      %466 = memref.load %arg2[%c86] : memref<98xf32, #tpu.memory_space<smem>>
      %c5_241 = arith.constant 5 : index
      %c2_242 = arith.constant 2 : index
      %467 = vector.load %arg7[%c5_241, %c2_242] : memref<22x22xf32, #tpu.memory_space<vmem>>, vector<16x16xf32>
      %468 = vector.broadcast %465 : f32 to vector<16x16xf32>
      %469 = arith.mulf %468, %467 : vector<16x16xf32>
      %470 = arith.addf %464, %469 : vector<16x16xf32>
      %c5_243 = arith.constant 5 : index
      %c2_244 = arith.constant 2 : index
      %471 = vector.load %arg8[%c5_243, %c2_244] : memref<22x22xf32, #tpu.memory_space<vmem>>, vector<16x16xf32>
      %472 = vector.broadcast %466 : f32 to vector<16x16xf32>
      %473 = arith.mulf %472, %471 : vector<16x16xf32>
      %474 = arith.addf %470, %473 : vector<16x16xf32>
      %c38 = arith.constant 38 : index
      %475 = memref.load %arg2[%c38] : memref<98xf32, #tpu.memory_space<smem>>
      %c87 = arith.constant 87 : index
      %476 = memref.load %arg2[%c87] : memref<98xf32, #tpu.memory_space<smem>>
      %c5_245 = arith.constant 5 : index
      %c3_246 = arith.constant 3 : index
      %477 = vector.load %arg7[%c5_245, %c3_246] : memref<22x22xf32, #tpu.memory_space<vmem>>, vector<16x16xf32>
      %478 = vector.broadcast %475 : f32 to vector<16x16xf32>
      %479 = arith.mulf %478, %477 : vector<16x16xf32>
      %480 = arith.addf %474, %479 : vector<16x16xf32>
      %c5_247 = arith.constant 5 : index
      %c3_248 = arith.constant 3 : index
      %481 = vector.load %arg8[%c5_247, %c3_248] : memref<22x22xf32, #tpu.memory_space<vmem>>, vector<16x16xf32>
      %482 = vector.broadcast %476 : f32 to vector<16x16xf32>
      %483 = arith.mulf %482, %481 : vector<16x16xf32>
      %484 = arith.addf %480, %483 : vector<16x16xf32>
      %c39 = arith.constant 39 : index
      %485 = memref.load %arg2[%c39] : memref<98xf32, #tpu.memory_space<smem>>
      %c88 = arith.constant 88 : index
      %486 = memref.load %arg2[%c88] : memref<98xf32, #tpu.memory_space<smem>>
      %c5_249 = arith.constant 5 : index
      %c4_250 = arith.constant 4 : index
      %487 = vector.load %arg7[%c5_249, %c4_250] : memref<22x22xf32, #tpu.memory_space<vmem>>, vector<16x16xf32>
      %488 = vector.broadcast %485 : f32 to vector<16x16xf32>
      %489 = arith.mulf %488, %487 : vector<16x16xf32>
      %490 = arith.addf %484, %489 : vector<16x16xf32>
      %c5_251 = arith.constant 5 : index
      %c4_252 = arith.constant 4 : index
      %491 = vector.load %arg8[%c5_251, %c4_252] : memref<22x22xf32, #tpu.memory_space<vmem>>, vector<16x16xf32>
      %492 = vector.broadcast %486 : f32 to vector<16x16xf32>
      %493 = arith.mulf %492, %491 : vector<16x16xf32>
      %494 = arith.addf %490, %493 : vector<16x16xf32>
      %c40 = arith.constant 40 : index
      %495 = memref.load %arg2[%c40] : memref<98xf32, #tpu.memory_space<smem>>
      %c89 = arith.constant 89 : index
      %496 = memref.load %arg2[%c89] : memref<98xf32, #tpu.memory_space<smem>>
      %c5_253 = arith.constant 5 : index
      %c5_254 = arith.constant 5 : index
      %497 = vector.load %arg7[%c5_253, %c5_254] : memref<22x22xf32, #tpu.memory_space<vmem>>, vector<16x16xf32>
      %498 = vector.broadcast %495 : f32 to vector<16x16xf32>
      %499 = arith.mulf %498, %497 : vector<16x16xf32>
      %500 = arith.addf %494, %499 : vector<16x16xf32>
      %c5_255 = arith.constant 5 : index
      %c5_256 = arith.constant 5 : index
      %501 = vector.load %arg8[%c5_255, %c5_256] : memref<22x22xf32, #tpu.memory_space<vmem>>, vector<16x16xf32>
      %502 = vector.broadcast %496 : f32 to vector<16x16xf32>
      %503 = arith.mulf %502, %501 : vector<16x16xf32>
      %504 = arith.addf %500, %503 : vector<16x16xf32>
      %c41 = arith.constant 41 : index
      %505 = memref.load %arg2[%c41] : memref<98xf32, #tpu.memory_space<smem>>
      %c90 = arith.constant 90 : index
      %506 = memref.load %arg2[%c90] : memref<98xf32, #tpu.memory_space<smem>>
      %c5_257 = arith.constant 5 : index
      %c6_258 = arith.constant 6 : index
      %507 = vector.load %arg7[%c5_257, %c6_258] : memref<22x22xf32, #tpu.memory_space<vmem>>, vector<16x16xf32>
      %508 = vector.broadcast %505 : f32 to vector<16x16xf32>
      %509 = arith.mulf %508, %507 : vector<16x16xf32>
      %510 = arith.addf %504, %509 : vector<16x16xf32>
      %c5_259 = arith.constant 5 : index
      %c6_260 = arith.constant 6 : index
      %511 = vector.load %arg8[%c5_259, %c6_260] : memref<22x22xf32, #tpu.memory_space<vmem>>, vector<16x16xf32>
      %512 = vector.broadcast %506 : f32 to vector<16x16xf32>
      %513 = arith.mulf %512, %511 : vector<16x16xf32>
      %514 = arith.addf %510, %513 : vector<16x16xf32>
      %c42 = arith.constant 42 : index
      %515 = memref.load %arg2[%c42] : memref<98xf32, #tpu.memory_space<smem>>
      %c91 = arith.constant 91 : index
      %516 = memref.load %arg2[%c91] : memref<98xf32, #tpu.memory_space<smem>>
      %c6_261 = arith.constant 6 : index
      %c0_262 = arith.constant 0 : index
      %517 = vector.load %arg7[%c6_261, %c0_262] : memref<22x22xf32, #tpu.memory_space<vmem>>, vector<16x16xf32>
      %518 = vector.broadcast %515 : f32 to vector<16x16xf32>
      %519 = arith.mulf %518, %517 : vector<16x16xf32>
      %520 = arith.addf %514, %519 : vector<16x16xf32>
      %c6_263 = arith.constant 6 : index
      %c0_264 = arith.constant 0 : index
      %521 = vector.load %arg8[%c6_263, %c0_264] : memref<22x22xf32, #tpu.memory_space<vmem>>, vector<16x16xf32>
      %522 = vector.broadcast %516 : f32 to vector<16x16xf32>
      %523 = arith.mulf %522, %521 : vector<16x16xf32>
      %524 = arith.addf %520, %523 : vector<16x16xf32>
      %c43 = arith.constant 43 : index
      %525 = memref.load %arg2[%c43] : memref<98xf32, #tpu.memory_space<smem>>
      %c92 = arith.constant 92 : index
      %526 = memref.load %arg2[%c92] : memref<98xf32, #tpu.memory_space<smem>>
      %c6_265 = arith.constant 6 : index
      %c1_266 = arith.constant 1 : index
      %527 = vector.load %arg7[%c6_265, %c1_266] : memref<22x22xf32, #tpu.memory_space<vmem>>, vector<16x16xf32>
      %528 = vector.broadcast %525 : f32 to vector<16x16xf32>
      %529 = arith.mulf %528, %527 : vector<16x16xf32>
      %530 = arith.addf %524, %529 : vector<16x16xf32>
      %c6_267 = arith.constant 6 : index
      %c1_268 = arith.constant 1 : index
      %531 = vector.load %arg8[%c6_267, %c1_268] : memref<22x22xf32, #tpu.memory_space<vmem>>, vector<16x16xf32>
      %532 = vector.broadcast %526 : f32 to vector<16x16xf32>
      %533 = arith.mulf %532, %531 : vector<16x16xf32>
      %534 = arith.addf %530, %533 : vector<16x16xf32>
      %c44 = arith.constant 44 : index
      %535 = memref.load %arg2[%c44] : memref<98xf32, #tpu.memory_space<smem>>
      %c93 = arith.constant 93 : index
      %536 = memref.load %arg2[%c93] : memref<98xf32, #tpu.memory_space<smem>>
      %c6_269 = arith.constant 6 : index
      %c2_270 = arith.constant 2 : index
      %537 = vector.load %arg7[%c6_269, %c2_270] : memref<22x22xf32, #tpu.memory_space<vmem>>, vector<16x16xf32>
      %538 = vector.broadcast %535 : f32 to vector<16x16xf32>
      %539 = arith.mulf %538, %537 : vector<16x16xf32>
      %540 = arith.addf %534, %539 : vector<16x16xf32>
      %c6_271 = arith.constant 6 : index
      %c2_272 = arith.constant 2 : index
      %541 = vector.load %arg8[%c6_271, %c2_272] : memref<22x22xf32, #tpu.memory_space<vmem>>, vector<16x16xf32>
      %542 = vector.broadcast %536 : f32 to vector<16x16xf32>
      %543 = arith.mulf %542, %541 : vector<16x16xf32>
      %544 = arith.addf %540, %543 : vector<16x16xf32>
      %c45 = arith.constant 45 : index
      %545 = memref.load %arg2[%c45] : memref<98xf32, #tpu.memory_space<smem>>
      %c94 = arith.constant 94 : index
      %546 = memref.load %arg2[%c94] : memref<98xf32, #tpu.memory_space<smem>>
      %c6_273 = arith.constant 6 : index
      %c3_274 = arith.constant 3 : index
      %547 = vector.load %arg7[%c6_273, %c3_274] : memref<22x22xf32, #tpu.memory_space<vmem>>, vector<16x16xf32>
      %548 = vector.broadcast %545 : f32 to vector<16x16xf32>
      %549 = arith.mulf %548, %547 : vector<16x16xf32>
      %550 = arith.addf %544, %549 : vector<16x16xf32>
      %c6_275 = arith.constant 6 : index
      %c3_276 = arith.constant 3 : index
      %551 = vector.load %arg8[%c6_275, %c3_276] : memref<22x22xf32, #tpu.memory_space<vmem>>, vector<16x16xf32>
      %552 = vector.broadcast %546 : f32 to vector<16x16xf32>
      %553 = arith.mulf %552, %551 : vector<16x16xf32>
      %554 = arith.addf %550, %553 : vector<16x16xf32>
      %c46 = arith.constant 46 : index
      %555 = memref.load %arg2[%c46] : memref<98xf32, #tpu.memory_space<smem>>
      %c95 = arith.constant 95 : index
      %556 = memref.load %arg2[%c95] : memref<98xf32, #tpu.memory_space<smem>>
      %c6_277 = arith.constant 6 : index
      %c4_278 = arith.constant 4 : index
      %557 = vector.load %arg7[%c6_277, %c4_278] : memref<22x22xf32, #tpu.memory_space<vmem>>, vector<16x16xf32>
      %558 = vector.broadcast %555 : f32 to vector<16x16xf32>
      %559 = arith.mulf %558, %557 : vector<16x16xf32>
      %560 = arith.addf %554, %559 : vector<16x16xf32>
      %c6_279 = arith.constant 6 : index
      %c4_280 = arith.constant 4 : index
      %561 = vector.load %arg8[%c6_279, %c4_280] : memref<22x22xf32, #tpu.memory_space<vmem>>, vector<16x16xf32>
      %562 = vector.broadcast %556 : f32 to vector<16x16xf32>
      %563 = arith.mulf %562, %561 : vector<16x16xf32>
      %564 = arith.addf %560, %563 : vector<16x16xf32>
      %c47 = arith.constant 47 : index
      %565 = memref.load %arg2[%c47] : memref<98xf32, #tpu.memory_space<smem>>
      %c96 = arith.constant 96 : index
      %566 = memref.load %arg2[%c96] : memref<98xf32, #tpu.memory_space<smem>>
      %c6_281 = arith.constant 6 : index
      %c5_282 = arith.constant 5 : index
      %567 = vector.load %arg7[%c6_281, %c5_282] : memref<22x22xf32, #tpu.memory_space<vmem>>, vector<16x16xf32>
      %568 = vector.broadcast %565 : f32 to vector<16x16xf32>
      %569 = arith.mulf %568, %567 : vector<16x16xf32>
      %570 = arith.addf %564, %569 : vector<16x16xf32>
      %c6_283 = arith.constant 6 : index
      %c5_284 = arith.constant 5 : index
      %571 = vector.load %arg8[%c6_283, %c5_284] : memref<22x22xf32, #tpu.memory_space<vmem>>, vector<16x16xf32>
      %572 = vector.broadcast %566 : f32 to vector<16x16xf32>
      %573 = arith.mulf %572, %571 : vector<16x16xf32>
      %574 = arith.addf %570, %573 : vector<16x16xf32>
      %c48 = arith.constant 48 : index
      %575 = memref.load %arg2[%c48] : memref<98xf32, #tpu.memory_space<smem>>
      %c97 = arith.constant 97 : index
      %576 = memref.load %arg2[%c97] : memref<98xf32, #tpu.memory_space<smem>>
      %c6_285 = arith.constant 6 : index
      %c6_286 = arith.constant 6 : index
      %577 = vector.load %arg7[%c6_285, %c6_286] : memref<22x22xf32, #tpu.memory_space<vmem>>, vector<16x16xf32>
      %578 = vector.broadcast %575 : f32 to vector<16x16xf32>
      %579 = arith.mulf %578, %577 : vector<16x16xf32>
      %580 = arith.addf %574, %579 : vector<16x16xf32>
      %c6_287 = arith.constant 6 : index
      %c6_288 = arith.constant 6 : index
      %581 = vector.load %arg8[%c6_287, %c6_288] : memref<22x22xf32, #tpu.memory_space<vmem>>, vector<16x16xf32>
      %582 = vector.broadcast %576 : f32 to vector<16x16xf32>
      %583 = arith.mulf %582, %581 : vector<16x16xf32>
      %584 = arith.addf %580, %583 : vector<16x16xf32>
      %585 = arith.negf %584 : vector<16x16xf32>
      %586 = math.exp %585 : vector<16x16xf32>
      %cst_289 = arith.constant 1.000000e+00 : f32
      %587 = vector.broadcast %cst_289 : f32 to vector<16x16xf32>
      %588 = arith.addf %587, %586 : vector<16x16xf32>
      %589 = arith.divf %587, %588 : vector<16x16xf32>
      %590 = vector.extract_strided_slice %589 {offsets = [0, 0], sizes = [1, 16], strides = [1, 1]} : vector<16x16xf32> to vector<1x16xf32>
      %c0_290 = arith.constant 0 : index
      %c0_291 = arith.constant 0 : index
      %c0_292 = arith.constant 0 : index
      %591 = vector.load %arg4[%c0_290, %c0_291, %c0_292] : memref<1x1x256xf32, #tpu.memory_space<vmem>>, vector<1x1x16xf32>
      %592 = vector.shape_cast %591 : vector<1x1x16xf32> to vector<1x16xf32>
      %593 = vector.shape_cast %590 : vector<1x16xf32> to vector<1x1x16xf32>
      tpu.vector_store %arg4[%c0_290, %c0_291, %c0_292], %593 {strides = array<i32>} : memref<1x1x256xf32, #tpu.memory_space<vmem>>, vector<1x1x16xf32>,
      %594 = vector.extract_strided_slice %589 {offsets = [1, 0], sizes = [1, 16], strides = [1, 1]} : vector<16x16xf32> to vector<1x16xf32>
      %c0_293 = arith.constant 0 : index
      %c0_294 = arith.constant 0 : index
      %c16_295 = arith.constant 16 : index
      %595 = vector.load %arg4[%c0_293, %c0_294, %c16_295] : memref<1x1x256xf32, #tpu.memory_space<vmem>>, vector<1x1x16xf32>
      %596 = vector.shape_cast %595 : vector<1x1x16xf32> to vector<1x16xf32>
      %597 = vector.shape_cast %594 : vector<1x16xf32> to vector<1x1x16xf32>
      tpu.vector_store %arg4[%c0_293, %c0_294, %c16_295], %597 {strides = array<i32>} : memref<1x1x256xf32, #tpu.memory_space<vmem>>, vector<1x1x16xf32>,
      %598 = vector.extract_strided_slice %589 {offsets = [2, 0], sizes = [1, 16], strides = [1, 1]} : vector<16x16xf32> to vector<1x16xf32>
      %c0_296 = arith.constant 0 : index
      %c0_297 = arith.constant 0 : index
      %c32_298 = arith.constant 32 : index
      %599 = vector.load %arg4[%c0_296, %c0_297, %c32_298] : memref<1x1x256xf32, #tpu.memory_space<vmem>>, vector<1x1x16xf32>
      %600 = vector.shape_cast %599 : vector<1x1x16xf32> to vector<1x16xf32>
      %601 = vector.shape_cast %598 : vector<1x16xf32> to vector<1x1x16xf32>
      tpu.vector_store %arg4[%c0_296, %c0_297, %c32_298], %601 {strides = array<i32>} : memref<1x1x256xf32, #tpu.memory_space<vmem>>, vector<1x1x16xf32>,
      %602 = vector.extract_strided_slice %589 {offsets = [3, 0], sizes = [1, 16], strides = [1, 1]} : vector<16x16xf32> to vector<1x16xf32>
      %c0_299 = arith.constant 0 : index
      %c0_300 = arith.constant 0 : index
      %c48_301 = arith.constant 48 : index
      %603 = vector.load %arg4[%c0_299, %c0_300, %c48_301] : memref<1x1x256xf32, #tpu.memory_space<vmem>>, vector<1x1x16xf32>
      %604 = vector.shape_cast %603 : vector<1x1x16xf32> to vector<1x16xf32>
      %605 = vector.shape_cast %602 : vector<1x16xf32> to vector<1x1x16xf32>
      tpu.vector_store %arg4[%c0_299, %c0_300, %c48_301], %605 {strides = array<i32>} : memref<1x1x256xf32, #tpu.memory_space<vmem>>, vector<1x1x16xf32>,
      %606 = vector.extract_strided_slice %589 {offsets = [4, 0], sizes = [1, 16], strides = [1, 1]} : vector<16x16xf32> to vector<1x16xf32>
      %c0_302 = arith.constant 0 : index
      %c0_303 = arith.constant 0 : index
      %c64_304 = arith.constant 64 : index
      %607 = vector.load %arg4[%c0_302, %c0_303, %c64_304] : memref<1x1x256xf32, #tpu.memory_space<vmem>>, vector<1x1x16xf32>
      %608 = vector.shape_cast %607 : vector<1x1x16xf32> to vector<1x16xf32>
      %609 = vector.shape_cast %606 : vector<1x16xf32> to vector<1x1x16xf32>
      tpu.vector_store %arg4[%c0_302, %c0_303, %c64_304], %609 {strides = array<i32>} : memref<1x1x256xf32, #tpu.memory_space<vmem>>, vector<1x1x16xf32>,
      %610 = vector.extract_strided_slice %589 {offsets = [5, 0], sizes = [1, 16], strides = [1, 1]} : vector<16x16xf32> to vector<1x16xf32>
      %c0_305 = arith.constant 0 : index
      %c0_306 = arith.constant 0 : index
      %c80_307 = arith.constant 80 : index
      %611 = vector.load %arg4[%c0_305, %c0_306, %c80_307] : memref<1x1x256xf32, #tpu.memory_space<vmem>>, vector<1x1x16xf32>
      %612 = vector.shape_cast %611 : vector<1x1x16xf32> to vector<1x16xf32>
      %613 = vector.shape_cast %610 : vector<1x16xf32> to vector<1x1x16xf32>
      tpu.vector_store %arg4[%c0_305, %c0_306, %c80_307], %613 {strides = array<i32>} : memref<1x1x256xf32, #tpu.memory_space<vmem>>, vector<1x1x16xf32>,
      %614 = vector.extract_strided_slice %589 {offsets = [6, 0], sizes = [1, 16], strides = [1, 1]} : vector<16x16xf32> to vector<1x16xf32>
      %c0_308 = arith.constant 0 : index
      %c0_309 = arith.constant 0 : index
      %c96_310 = arith.constant 96 : index
      %615 = vector.load %arg4[%c0_308, %c0_309, %c96_310] : memref<1x1x256xf32, #tpu.memory_space<vmem>>, vector<1x1x16xf32>
      %616 = vector.shape_cast %615 : vector<1x1x16xf32> to vector<1x16xf32>
      %617 = vector.shape_cast %614 : vector<1x16xf32> to vector<1x1x16xf32>
      tpu.vector_store %arg4[%c0_308, %c0_309, %c96_310], %617 {strides = array<i32>} : memref<1x1x256xf32, #tpu.memory_space<vmem>>, vector<1x1x16xf32>,
      %618 = vector.extract_strided_slice %589 {offsets = [7, 0], sizes = [1, 16], strides = [1, 1]} : vector<16x16xf32> to vector<1x16xf32>
      %c0_311 = arith.constant 0 : index
      %c0_312 = arith.constant 0 : index
      %c112 = arith.constant 112 : index
      %619 = vector.load %arg4[%c0_311, %c0_312, %c112] : memref<1x1x256xf32, #tpu.memory_space<vmem>>, vector<1x1x16xf32>
      %620 = vector.shape_cast %619 : vector<1x1x16xf32> to vector<1x16xf32>
      %621 = vector.shape_cast %618 : vector<1x16xf32> to vector<1x1x16xf32>
      tpu.vector_store %arg4[%c0_311, %c0_312, %c112], %621 {strides = array<i32>} : memref<1x1x256xf32, #tpu.memory_space<vmem>>, vector<1x1x16xf32>,
      %622 = vector.extract_strided_slice %589 {offsets = [8, 0], sizes = [1, 16], strides = [1, 1]} : vector<16x16xf32> to vector<1x16xf32>
      %c0_313 = arith.constant 0 : index
      %c0_314 = arith.constant 0 : index
      %c128 = arith.constant 128 : index
      %623 = vector.load %arg4[%c0_313, %c0_314, %c128] : memref<1x1x256xf32, #tpu.memory_space<vmem>>, vector<1x1x16xf32>
      %624 = vector.shape_cast %623 : vector<1x1x16xf32> to vector<1x16xf32>
      %625 = vector.shape_cast %622 : vector<1x16xf32> to vector<1x1x16xf32>
      tpu.vector_store %arg4[%c0_313, %c0_314, %c128], %625 {strides = array<i32>} : memref<1x1x256xf32, #tpu.memory_space<vmem>>, vector<1x1x16xf32>,
      %626 = vector.extract_strided_slice %589 {offsets = [9, 0], sizes = [1, 16], strides = [1, 1]} : vector<16x16xf32> to vector<1x16xf32>
      %c0_315 = arith.constant 0 : index
      %c0_316 = arith.constant 0 : index
      %c144 = arith.constant 144 : index
      %627 = vector.load %arg4[%c0_315, %c0_316, %c144] : memref<1x1x256xf32, #tpu.memory_space<vmem>>, vector<1x1x16xf32>
      %628 = vector.shape_cast %627 : vector<1x1x16xf32> to vector<1x16xf32>
      %629 = vector.shape_cast %626 : vector<1x16xf32> to vector<1x1x16xf32>
      tpu.vector_store %arg4[%c0_315, %c0_316, %c144], %629 {strides = array<i32>} : memref<1x1x256xf32, #tpu.memory_space<vmem>>, vector<1x1x16xf32>,
      %630 = vector.extract_strided_slice %589 {offsets = [10, 0], sizes = [1, 16], strides = [1, 1]} : vector<16x16xf32> to vector<1x16xf32>
      %c0_317 = arith.constant 0 : index
      %c0_318 = arith.constant 0 : index
      %c160 = arith.constant 160 : index
      %631 = vector.load %arg4[%c0_317, %c0_318, %c160] : memref<1x1x256xf32, #tpu.memory_space<vmem>>, vector<1x1x16xf32>
      %632 = vector.shape_cast %631 : vector<1x1x16xf32> to vector<1x16xf32>
      %633 = vector.shape_cast %630 : vector<1x16xf32> to vector<1x1x16xf32>
      tpu.vector_store %arg4[%c0_317, %c0_318, %c160], %633 {strides = array<i32>} : memref<1x1x256xf32, #tpu.memory_space<vmem>>, vector<1x1x16xf32>,
      %634 = vector.extract_strided_slice %589 {offsets = [11, 0], sizes = [1, 16], strides = [1, 1]} : vector<16x16xf32> to vector<1x16xf32>
      %c0_319 = arith.constant 0 : index
      %c0_320 = arith.constant 0 : index
      %c176 = arith.constant 176 : index
      %635 = vector.load %arg4[%c0_319, %c0_320, %c176] : memref<1x1x256xf32, #tpu.memory_space<vmem>>, vector<1x1x16xf32>
      %636 = vector.shape_cast %635 : vector<1x1x16xf32> to vector<1x16xf32>
      %637 = vector.shape_cast %634 : vector<1x16xf32> to vector<1x1x16xf32>
      tpu.vector_store %arg4[%c0_319, %c0_320, %c176], %637 {strides = array<i32>} : memref<1x1x256xf32, #tpu.memory_space<vmem>>, vector<1x1x16xf32>,
      %638 = vector.extract_strided_slice %589 {offsets = [12, 0], sizes = [1, 16], strides = [1, 1]} : vector<16x16xf32> to vector<1x16xf32>
      %c0_321 = arith.constant 0 : index
      %c0_322 = arith.constant 0 : index
      %c192 = arith.constant 192 : index
      %639 = vector.load %arg4[%c0_321, %c0_322, %c192] : memref<1x1x256xf32, #tpu.memory_space<vmem>>, vector<1x1x16xf32>
      %640 = vector.shape_cast %639 : vector<1x1x16xf32> to vector<1x16xf32>
      %641 = vector.shape_cast %638 : vector<1x16xf32> to vector<1x1x16xf32>
      tpu.vector_store %arg4[%c0_321, %c0_322, %c192], %641 {strides = array<i32>} : memref<1x1x256xf32, #tpu.memory_space<vmem>>, vector<1x1x16xf32>,
      %642 = vector.extract_strided_slice %589 {offsets = [13, 0], sizes = [1, 16], strides = [1, 1]} : vector<16x16xf32> to vector<1x16xf32>
      %c0_323 = arith.constant 0 : index
      %c0_324 = arith.constant 0 : index
      %c208 = arith.constant 208 : index
      %643 = vector.load %arg4[%c0_323, %c0_324, %c208] : memref<1x1x256xf32, #tpu.memory_space<vmem>>, vector<1x1x16xf32>
      %644 = vector.shape_cast %643 : vector<1x1x16xf32> to vector<1x16xf32>
      %645 = vector.shape_cast %642 : vector<1x16xf32> to vector<1x1x16xf32>
      tpu.vector_store %arg4[%c0_323, %c0_324, %c208], %645 {strides = array<i32>} : memref<1x1x256xf32, #tpu.memory_space<vmem>>, vector<1x1x16xf32>,
      %646 = vector.extract_strided_slice %589 {offsets = [14, 0], sizes = [1, 16], strides = [1, 1]} : vector<16x16xf32> to vector<1x16xf32>
      %c0_325 = arith.constant 0 : index
      %c0_326 = arith.constant 0 : index
      %c224 = arith.constant 224 : index
      %647 = vector.load %arg4[%c0_325, %c0_326, %c224] : memref<1x1x256xf32, #tpu.memory_space<vmem>>, vector<1x1x16xf32>
      %648 = vector.shape_cast %647 : vector<1x1x16xf32> to vector<1x16xf32>
      %649 = vector.shape_cast %646 : vector<1x16xf32> to vector<1x1x16xf32>
      tpu.vector_store %arg4[%c0_325, %c0_326, %c224], %649 {strides = array<i32>} : memref<1x1x256xf32, #tpu.memory_space<vmem>>, vector<1x1x16xf32>,
      %650 = vector.extract_strided_slice %589 {offsets = [15, 0], sizes = [1, 16], strides = [1, 1]} : vector<16x16xf32> to vector<1x16xf32>
      %c0_327 = arith.constant 0 : index
      %c0_328 = arith.constant 0 : index
      %c240 = arith.constant 240 : index
      %651 = vector.load %arg4[%c0_327, %c0_328, %c240] : memref<1x1x256xf32, #tpu.memory_space<vmem>>, vector<1x1x16xf32>
      %652 = vector.shape_cast %651 : vector<1x1x16xf32> to vector<1x16xf32>
      %653 = vector.shape_cast %650 : vector<1x16xf32> to vector<1x1x16xf32>
      tpu.vector_store %arg4[%c0_327, %c0_328, %c240], %653 {strides = array<i32>} : memref<1x1x256xf32, #tpu.memory_space<vmem>>, vector<1x1x16xf32>,
    } else {
    }
    return
  }
  func.func @transform_0(%arg0: i32, %arg1: i32) -> i32 {
    %c0_i32 = arith.constant 0 : i32
    %c0_i32_0 = arith.constant 0 : i32
    return %c0_i32 : i32
  }
  func.func @transform_1(%arg0: i32, %arg1: i32) -> (i32, i32, i32) {
    %c0_i32 = arith.constant 0 : i32
    %c0_i32_0 = arith.constant 0 : i32
    return %arg0, %arg1, %c0_i32 : i32, i32, i32
  }
  func.func @transform_2(%arg0: i32, %arg1: i32) -> (i32, i32, i32) {
    %c0_i32 = arith.constant 0 : i32
    %c0_i32_0 = arith.constant 0 : i32
    %c0_i32_1 = arith.constant 0 : i32
    return %arg0, %c0_i32, %c0_i32_0 : i32, i32, i32
  }
}

</mosaic_0001>

<bundles_post_ra>
// kernel: tpu_custom_call.1
= control target key start
LH: loop header
LB: loop body
LE: loop exit
PB: predicated region body
PF: predicated region fallthrough
CT: control target
= control target key end

     0   :  { %s4041_s0 = inlined_call_operand.hbm [shape: f32[98], index: 0, kind: input, shape index: {}]   ;;  %s4042_s1 = inlined_call_operand.hbm [shape: f32[2,4,256], index: 1, kind: input, shape index: {}]   ;;  %s4043_s2 = inlined_call_operand.hbm [shape: f32[2,1,256], index: 2, kind: output, shape index: {}]  }
   0x1   :  { %4069 = sst [smem:[#allocation20_spill]] %s4041_s0 }
   0x2   :  { %4070 = sst [smem:[#allocation21_spill]] %s4042_s1 }
   0x3   :  { %7 = vsyncpa [#allocation9], 0 }
   0x4   :  { %8 = vsyncpa [#allocation7], 0 }
   0x5   :  { %10 = vsyncpa [#allocation7 + $0x1], 0 }
   0x6   :  { %11 = vsyncpa [#allocation8], 0 }
   0x7   :  { %13 = vsyncpa [#allocation8 + $0x1], 0  ;;  %s2431_s9 = smov 0   ;;  %s2433_s10 = smov 0  }
   0x8   :  { %s2435_s11 = smov 0   ;;  %s2437_s12 = smov 0  }
   0x9   :  { %s2439_s13 = smov 0   ;;  %s2441_s14 = smov 0  }
   0xa LB: > { %4071 = sst [smem:[#allocation15_spill]] %s2371_s10  ;;  %s2040_s15 = sadd.s32 4294967295, %s2387_s14   ;;  %s2387_s14 = sphi %s2441_s14, %s19_s14   ;;  %s2383_s13 = sphi %s2439_s13, %s4137_s13   ;;  %s2379_s12 = sphi %s2437_s12, %s4136_s12   ;;  %s2375_s11 = sphi %s2435_s11, %s4135_s11   ;;  %s2371_s10 = sphi %s2433_s10, %s4134_s10   ;;  %s2367_s9 = sphi %s2431_s9, %s4133_s9  }
   0xb   : > { %4072 = sst [smem:[#allocation16_spill]] %s2375_s11  ;;  %s2041_s16 = sadd.s32 4294967294, %s2387_s14  }
   0xc   : > { %4073 = sst [smem:[#allocation17_spill]] %s2383_s13  ;;  %p74_p0 = scmp.ne.s32.totalorder %s2371_s10, %s2367_s9 }
   0xd   : > { %p2465_p1 = scmp.eq.s32.totalorder %s2040_s15, 0  ;;  %p2469_p2 = scmp.eq.s32.totalorder %s2040_s15, 1 }
   0xe   : > { %p104_p3 = scmp.eq.s32.totalorder %s2041_s16, 1  ;;  %p2042_p5 = scmp.ge.s32.totalorder %s2387_s14, 1 }
   0xf   : > { %p2475_p4 = por %p2465_p1, %p74_p0  ;;  %p111_p7 = scmp.lt.s32.totalorder %s2387_s14, 3 }
  0x10   : > { %p2480_p6 = por %p104_p3, %p74_p0  ;;  %s31_s22 = sadd.s32 1, %s2383_s13 }
  0x11   : > { %p2485_p8 = pnand %p2042_p5, %p111_p7  ;;  %p33_p12 = scmp.ge.s32.totalorder %s31_s22, 2 }
  0x12   : > { %s4077_s20 = scalar_select %p2480_p6, 1, 0 }
  0x13   : > { %p2166_p10 = pneg %p2485_p8  ;;  %s61_s23 = sadd.s32 1, %s2375_s11 }
  0x14   : > { %p68_p13 = scmp.ne.s32.totalorder %s2375_s11, %s2371_s10  ;;  %p69_p0 = scmp.eq.s32.totalorder %s2387_s14, 0 }
  0x15   : > { %p2167_p11 = pnand %p2166_p10, %p2465_p1  ;;  %s2389_s24 = smov [#allocation6]  }
  0x16   : > { %s4079_s0 = sld [smem:[#allocation20_spill]]  ;;  %s4139_s22 = smov (%p33_p12, %s31_s22), 0 }
  0x17   : > { %4080 = sst [smem:[#allocation18_spill]] %s4139_s22  ;;  %p2504_p3 = por %p69_p0, %p68_p13 }
  0x18   : > { %p2510_p5 = por %p2469_p2, %p68_p13  ;;  %s56_s29 = ssub.s32 %s2383_s13, %s4139_s22 }
  0x19   : > { %p2179_p7 = scmp.lt.s32.totalorder %s2387_s14, 2  ;;  %p59_p10 = scmp.eq.s32.totalorder %s56_s29, 0 }
  0x1a   : > { %s4082_s28 = scalar_select %p2510_p5, 1, 0 }
  0x1b   : > { %s133_s30 = sand.u32 1, %s2375_s11   ;;  %s2156_s5 = sshll.u32 %s2383_s13, 7 }
  0x1c   : > { %2169 = dma.hbm_to_smem (!%p2167_p11), %s4079_s0, 16, %s2389_s24, [#allocation9]  }
  0x1d   : > { %s2045_s3 = sshll.u32 %s133_s30, 3  ;;  %s4084_s1 = sld [smem:[#allocation21_spill]] }
  0x1e   : > { %s2519_s4 = scalar_select %p59_p10, %s2375_s11, %s61_s23  }
  0x1f   : > { %s137_s15 = scalar_lea.vmem [#allocation10], %s2045_s3  ;;  %p2527_p2 = pnand %p2179_p7, %p2504_p3 }
  0x20   : > { %4083 = sst [smem:[#allocation19_spill]] %s2519_s4  ;;  %s147_s16 = sshll.u32 %s137_s15, 4  ;;  %s148_s16 = int_to_ptr.vmem [resolvable:$true] %s147_s16 }
  0x21   : > { %s134_s24 = scalar_lea.sflag [#allocation7], %s133_s30  ;;  %p2277_p11 = pneg %p2527_p2 }
  0x22   : > { %s2288_s25 = scalar_lea.vmem %s148_s16, 128  ;;  %s2390_s23 = smov [#allocation10]  }
  0x23   : > { %s145_s8 = scalar_lea.hbm %s4084_s1, %s2156_s5  ;;  %p2289_p12 = scmp.ne.s32.totalorder %s148_s16, %s2288_s25 }
  0x24   : > { %s2293_s26 = sshll.u32 %s2390_s23, 4  ;;  %s2294_s26 = int_to_ptr.vmem [resolvable:$false] %s2293_s26 }
  0x25   : > { %p2291_p13 = pnand %p2289_p12, %p2277_p11  ;;  %s2295_s29 = scalar_lea.vmem %s2294_s26, 256 }
  0x26   : > { %p2296_p10 = scmp.lt.s32.totalorder %s148_s16, %s2294_s26  ;;  %p2297_p9 = scmp.lt.s32.totalorder %s2295_s29, %s2288_s25 }
  0x27   : > { %p2292_p0 = pneg %p2291_p13 }
  0x28   : > { %p2298_p6 = por %p2297_p9, %p2296_p10 }
  0x2a   : > { %p2299_p5 = pnand %p2298_p6, %p2292_p0 }
  0x2c   : > { %2302 = shalt.err (!%p2299_p5)
}
  0x2d   : > { %2173 = dma.hbm_to_vmem [thread:$0]  (!%p2527_p2), %s145_s8, 128, %s148_s16, %s134_s24  }
  0x2e   : > { %156 = sbr.rel (%p2485_p8) target bundleno = 914 (0x392), region = 28 }
  0x33   : > { %2354 = dma.done.wait (%p2465_p1), [#allocation9], 16  }
  0x34   : > { %2356 = vsyncadd (%p2465_p1), [#allocation9], 4294967280  ;;  %s2542_s27 = sand.u32 1, %s2371_s10  }
  0x35   : > { %s2050_s30 = sshll.u32 %s2542_s27, 3  ;;  %s163_s3 = scalar_lea.sflag [#allocation7], %s2542_s27 }
  0x36   : > { %s166_s5 = scalar_lea.vmem [#allocation10], %s2050_s30 }
  0x37   : > { %2358 = dma.done.wait (%p2475_p4), %s163_s3, 128  }
  0x38   : > { %2360 = vsyncadd (%p2475_p4), %s163_s3, 4294967168 }
  0x39   : > { %171 = sfence }
  0x3a   : > { %v196_v0 = vld [vmem:[%s166_s5] sm:$0xff]  ;;  %vm201_vm0 = vcmask 1043456   ;;  %v2391_v1 = vmov -inf   ;;  %v2392_v5 = vmov 0.0   ;;  %vm310_vm1 = vcmask 179200   ;;  %s2394_s17 = smov 115  }
  0x3b   : > { %194 = vst [vmem:[#allocation3] sm:$0xff] %v2391_v1  ;;  %195 = vst [vmem:[#allocation3 + $0x8] sm:$0xff] %v2391_v1  ;;  %v199_v2 = vcombine.high %v196_v0, %v196_v0  ;;  %v242_v3 = vsel %vm201_vm0, %v196_v0, -inf  ;;  %v202_v6 = vsel %vm201_vm0, %v196_v0, 0.0  ;;  %v222_v13 = vlaneseq  ;;  %s2395_s19 = smov 3   ;;  %s2396_s21 = smov 99  }
  0x3c   : > { %v243_v4 = vrot.slane %v242_v3, 4  ;;  %192 = vst [vmem:[#allocation2] sm:$0xff] %v2392_v5  ;;  %193 = vst [vmem:[#allocation2 + $0x8] sm:$0xff] %v2392_v5  ;;  %v203_v8 = vrot.slane %v202_v6, 4  ;;  %v2393_v15 = vmov 1966171168  }
  0x3d   : > { %v249_v7 = vsel %vm201_vm0, %v199_v2, -inf  ;;  %v209_v9 = vsel %vm201_vm0, %v199_v2, 0.0  ;;  %315 = vst.msk [vmem:[#allocation5] sm:$0xff] %vm310_vm1, %v2392_v5  ;;  %311 = vst.msk [vmem:[#allocation4] sm:$0xff] %vm310_vm1, %v2392_v5  ;;  %v220_v16 = vunpack.c.l.s4 %v2393_v15  ;;  %v223_v24 = vshrl.u32 %v222_v13, 7  ;;  %s2397_s6 = smov 83  }
  0x3e   : > { %v244_v10 = vmax.f32 %v242_v3, %v243_v4  ;;  %v250_v11 = vrot.slane %v249_v7, 4  ;;  %v210_v12 = vrot.slane %v209_v9, 4  ;;  %v204_v14 = vadd.f32 %v203_v8, %v202_v6  ;;  %312 = vst.msk [vmem:[#allocation4 + $0x8] sm:$0xff] %vm310_vm1, %v2392_v5  ;;  %316 = vst.msk [vmem:[#allocation5 + $0x8] sm:$0xff] %vm310_vm1, %v2392_v5  ;;  %s2398_s7 = smov 67   ;;  %s2399_s8 = smov 51  }
  0x3f   : > { %v221_v26 = vunpack.c.0.s8 %v220_v16  ;;  %vm237_vm2 = vcmp.lt.s32.totalorder %v222_v13, 256  ;;  %s2400_s15 = smov 35   ;;  %s2401_s16 = smov 19   ;;  %vm313_vm3 = vcmask 177152   ;;  %vm322_vm4 = vcmask 147480  }
  0x40   : > { %v245_v17 = vrot.slane %v244_v10, 2  ;;  %v251_v18 = vmax.f32 %v249_v7, %v250_v11  ;;  %v211_v19 = vadd.f32 %v210_v12, %v209_v9  ;;  %v205_v20 = vrot.slane %v204_v14, 2  ;;  %317 = vst.msk [vmem:[#allocation5 + $0x10] sm:$0x3f] %vm313_vm3, %v2392_v5  ;;  %314 = vst.msk [vmem:[#allocation4 + $0x10] sm:$0x3f] %vm313_vm3, %v2392_v5 }
  0x41   : > { %v2557_v35 = vsub.s32 %v221_v26, %v223_v24  ;;  %s2602_s18 = sld [smem:[#allocation6 + $0x32]]  ;;  %s4057_s26 = smov 127   ;;  %vm3784_vm5 = vcmp.lt.s32.totalorder %v222_v13, 16  ;;  %vm3813_vm6 = vcmp.ge.s32.totalorder %v222_v13, 16  ;;  %vm3818_vm7 = vcmp.lt.s32.totalorder %v222_v13, 32 }
  0x42   : > { %v246_v21 = vmax.f32 %v244_v10, %v245_v17  ;;  %v252_v22 = vrot.slane %v251_v18, 2  ;;  %v212_v23 = vrot.slane %v211_v19, 2  ;;  %v206_v25 = vadd.f32 %v205_v20, %v204_v14  ;;  %v241_v42 = vld [vmem:[#allocation3] ss:$8 sm:$0x3]  ;;  %s2606_s24 = sld [smem:[#allocation6 + $0x33]]  ;;  %vm4064_vm8 = vmand %vm3813_vm6, %vm3818_vm7 }
  0x43   : > { %v197_v43 = vld [vmem:[#allocation2] ss:$8 sm:$0x3]  ;;  %s2611_s25 = sld [smem:[#allocation6 + $0x34]]  ;;  %s4047_s30 = smov 126   ;;  %vm3827_vm9 = vcmp.ge.s32.totalorder %v222_v13, 32 }
  0x44   : > { %v247_v27 = vrot.slane %v246_v21, 1  ;;  %v253_v28 = vmax.f32 %v251_v18, %v252_v22  ;;  %v213_v29 = vadd.f32 %v212_v23, %v211_v19  ;;  %v207_v30 = vrot.slane %v206_v25, 1  ;;  %s2618_s23 = sld [smem:[#allocation6 + $0x35]]  ;;  %s4088_s0 = smov 125  }
  0x45   : > { %s2626_s29 = sld [smem:[#allocation6 + $0x36]]  ;;  %s4091_s4 = smov 127   ;;  %vm3832_vm10 = vcmp.lt.s32.totalorder %v222_v13, 48  ;;  %vm3853_vm12 = vcmp.ge.s32.totalorder %v222_v13, 48  ;;  %vm3858_vm13 = vcmp.lt.s32.totalorder %v222_v13, 64  ;;  %vm3863_vm14 = vcmp.ge.s32.totalorder %v222_v13, 64 }
  0x46   : > { %v248_v31 = vmax.f32 %v246_v21, %v247_v27  ;;  %v254_v32 = vrot.slane %v253_v28, 1  ;;  %v214_v33 = vrot.slane %v213_v29, 1  ;;  %v208_v34 = vadd.f32 %v207_v30, %v206_v25  ;;  %s2629_s3 = sld [smem:[#allocation6 + $0x31]]  ;;  %vm4063_vm11 = vmand %vm3827_vm9, %vm3832_vm10  ;;  %p4130_p4 = scmp.ne.s32.totalorder %s4082_s28, 0 }
  0x47   : > { %v482_v23 = vstv %s2602_s18  ;;  %s2635_s5 = sld [smem:[#allocation6 + $0x37]]  ;;  %vm3868_vm15 = vcmp.lt.s32.totalorder %v222_v13, 80  ;;  %vm4061_vm0 = vmand %vm3853_vm12, %vm3858_vm13  ;;  %vm3886_vm3 = vcmp.lt.s32.totalorder %v222_v13, 96 }
  0x48   : > { %v255_v36 = vmax.f32 %v253_v28, %v254_v32  ;;  %v215_v37 = vadd.f32 %v214_v33, %v213_v29  ;;  %v510_v28 = vstv %s2606_s24  ;;  %s2737_s18 = sld [smem:[#allocation6 + $0x2]]  ;;  %vm4062_vm1 = vmand %vm3863_vm14, %vm3868_vm15 }
  0x49   : > { %v538_v32 = vstv %s2611_s25  ;;  %s2747_s24 = sld [smem:[#allocation6 + $0x3]]  ;;  %s4089_s25 = smov 124  }
  0x4a   : > { %v258_v38 = vcombine.low %v248_v31, %v255_v36  ;;  %v218_v39 = vcombine.low %v208_v34, %v215_v37  ;;  %v566_v37 = vstv %s2618_s23  ;;  %s2757_s1 = sld [smem:[#allocation6 + $0x4]]  ;;  %s4090_s23 = smov 123  }
  0x4b   : > { %s2767_s22 = sld [smem:[#allocation6 + $0x5]] }
  0x4c   : > { %v265_v40 = vrot.slane %v258_v38, %v2557_v35  ;;  %v225_v41 = vrot.slane %v218_v39, %v2557_v35  ;;  %s2801_s13 = sld [smem:[#allocation6 + $0x9]] }
  0x4d   : > { %s3275_s11 = sld [smem:[#allocation6 + $0xe]] }
  0x4e   : > { %v272_v44 = vrot.slane %v265_v40, %v2557_v35  ;;  %v232_v45 = vrot.slane %v225_v41, %v2557_v35  ;;  %v594_v41 = vstv %s2626_s29  ;;  %s2779_s29 = sld [smem:[#allocation6 + $0x6]] }
  0x4f   : > { %s3287_s10 = sld [smem:[#allocation6 + $0x3f]] }
  0x50   : > { %v274_v46 = vmax.f32 %v241_v42, %v272_v44  ;;  %v234_v47 = vadd.f32 %v232_v45, %v197_v43  ;;  %v462_v45 = vstv %s2629_s3  ;;  %s2680_s3 = sld [smem:[#allocation6 + $0x3c]] }
  0x52   : > { %275 = vst.msk [vmem:[#allocation3] ss:$8 sm:$0x3] %vm237_vm2, %v274_v46  ;;  %239 = vst.msk [vmem:[#allocation2] ss:$8 sm:$0x3] %vm237_vm2, %v234_v47  ;;  %v622_v47 = vstv %s2635_s5 }
  0x53   : > { %s2790_s5 = sld [smem:[#allocation6 + $0x8]]  ;;  %vm3881_vm2 = vcmp.ge.s32.totalorder %v222_v13, 80 }
  0x59   : > { %v296_v48 = vld [vmem:[#allocation3] sm:$0xff]  ;;  %v297_v50 = vld [vmem:[#allocation3 + $0x8] sm:$0xff]  ;;  %v280_v51 = vld [vmem:[#allocation2] sm:$0xff] }
  0x5a   : > { %v298_v49 = vrot.slane %v296_v48, 4  ;;  %v304_v54 = vrot.slane %v297_v50, 4  ;;  %v282_v55 = vrot.slane %v280_v51, 4  ;;  %v281_v1 = vld [vmem:[#allocation2 + $0x8] sm:$0xff] }
  0x5b   : > { %v288_v4 = vrot.slane %v281_v1, 4 }
  0x5c   : > { %v299_v52 = vmax.f32 %v296_v48, %v298_v49  ;;  %v305_v58 = vmax.f32 %v297_v50, %v304_v54  ;;  %v283_v59 = vadd.f32 %v282_v55, %v280_v51 }
  0x5d   : > { %v289_v8 = vadd.f32 %v288_v4, %v281_v1  ;;  %v750_v4 = vstv %s2680_s3  ;;  %s2849_s3 = sld [smem:[#allocation6 + $0xd]] }
  0x5e   : > { %v300_v53 = vrot.slane %v299_v52, 2  ;;  %v306_v61 = vrot.slane %v305_v58, 2  ;;  %v284_v62 = vrot.slane %v283_v59, 2 }
  0x5f   : > { %v290_v10 = vrot.slane %v289_v8, 2 }
  0x60   : > { %v301_v56 = vmax.f32 %v299_v52, %v300_v53  ;;  %v307_v63 = vmax.f32 %v305_v58, %v306_v61  ;;  %v285_v0 = vadd.f32 %v284_v62, %v283_v59 }
  0x61   : > { %v291_v11 = vadd.f32 %v290_v10, %v289_v8 }
  0x62   : > { %v302_v57 = vrot.slane %v301_v56, 1  ;;  %v308_v2 = vrot.slane %v307_v63, 1  ;;  %v286_v3 = vrot.slane %v285_v0, 1 }
  0x63   : > { %v292_v12 = vrot.slane %v291_v11, 1 }
  0x64   : > { %v303_v60 = vmax.f32 %v301_v56, %v302_v57  ;;  %v309_v6 = vmax.f32 %v307_v63, %v308_v2  ;;  %v287_v7 = vadd.f32 %v286_v3, %v285_v0 }
  0x65   : > { %v293_v14 = vadd.f32 %v292_v12, %v291_v11 }
  0x66   : > { %333 = vrot.lane.b32.xlu1 %v303_v60, %s2394_s17  ;;  %325 = vrot.lane.b32.xlu0 %v303_v60, %s2395_s19  ;;  %v294_v9 = vmul.f32 0.25, %v287_v7 }
  0x67   : > { %v295_v15 = vmul.f32 0.25, %v293_v14 }
  0x6a   : > { %341 = vrot.lane.b32.xlu1 %v303_v60, %s2396_s21  ;;  %349 = vrot.lane.b32.xlu0 %v303_v60, %s2397_s6 }
  0x6e   : > { %357 = vrot.lane.b32.xlu1 %v303_v60, %s2398_s7  ;;  %365 = vrot.lane.b32.xlu0 %v303_v60, %s2399_s8 }
  0x72   : > { %373 = vrot.lane.b32.xlu1 %v303_v60, %s2400_s15  ;;  %381 = vrot.lane.b32.xlu0 %v303_v60, %s2401_s16 }
  0x76   : > { %391 = vrot.lane.b32.xlu1 %v309_v6, %s2395_s19  ;;  %399 = vrot.lane.b32.xlu0 %v309_v6, %s2394_s17 }
  0x7a   : > { %407 = vrot.lane.b32.xlu1 %v309_v6, %s2396_s21  ;;  %319 = vrot.lane.b32.xlu0 %v294_v9, %s2395_s19 }
  0x7e   : > { %329 = vrot.lane.b32.xlu1 %v294_v9, %s2394_s17  ;;  %337 = vrot.lane.b32.xlu0 %v294_v9, %s2396_s21 }
  0x82   : > { %345 = vrot.lane.b32.xlu1 %v294_v9, %s2397_s6  ;;  %353 = vrot.lane.b32.xlu0 %v294_v9, %s2398_s7 }
  0x86   : > { %361 = vrot.lane.b32.xlu1 %v294_v9, %s2399_s8  ;;  %369 = vrot.lane.b32.xlu0 %v294_v9, %s2400_s15 }
  0x8a   : > { %377 = vrot.lane.b32.xlu1 %v294_v9, %s2401_s16  ;;  %386 = vrot.lane.b32.xlu0 %v295_v15, %s2395_s19  ;;  %s4053_s19 = smov 125  }
  0x8e   : > { %395 = vrot.lane.b32.xlu1 %v295_v15, %s2394_s17  ;;  %403 = vrot.lane.b32.xlu0 %v295_v15, %s2396_s21  ;;  %s2637_s17 = sld [smem:[#allocation6]] }
  0x8f   : > { %s2646_s21 = sld [smem:[#allocation6 + $0x39]] }
  0x92   : > { %411 = vrot.lane.b32.xlu1 %v295_v15, %s2397_s6  ;;  %419 = vrot.lane.b32.xlu0 %v295_v15, %s2398_s7 }
  0x94   : > { %v455_v46 = vstv %s2637_s17  ;;  %s2689_s17 = sld [smem:[#allocation6 + $0x3d]] }
  0x95   : > { %v666_v55 = vstv %s2646_s21  ;;  %s2814_s21 = sld [smem:[#allocation6 + $0xa]] }
  0x96   : > { %423 = vrot.lane.b32.xlu1 %v309_v6, %s2398_s7  ;;  %415 = vrot.lane.b32.xlu0 %v309_v6, %s2397_s6  ;;  %s4049_s6 = smov 124   ;;  %s2656_s7 = sld [smem:[#allocation6 + $0x3a]] }
  0x9a   : > { %431 = vrot.lane.b32.xlu1 %v309_v6, %s2399_s8  ;;  %427 = vrot.lane.b32.xlu0 %v295_v15, %s2399_s8  ;;  %s4051_s8 = smov 123   ;;  %v778_v10 = vstv %s2689_s17  ;;  %s2871_s17 = sld [smem:[#allocation6 + $0x10]] }
  0x9c   : > { %v694_v60 = vstv %s2656_s7  ;;  %s2825_s7 = sld [smem:[#allocation6 + $0xb]] }
  0x9e   : > { %439 = vrot.lane.b32.xlu1 %v309_v6, %s2400_s15  ;;  %435 = vrot.lane.b32.xlu0 %v295_v15, %s2400_s15  ;;  %s2669_s15 = sld [smem:[#allocation6 + $0x3b]] }
  0xa2   : > { %447 = vrot.lane.b32.xlu1 %v309_v6, %s2401_s16  ;;  %443 = vrot.lane.b32.xlu0 %v295_v15, %s2401_s16  ;;  %s4045_s16 = smov 122  }
  0xa4   : > { %v722_v0 = vstv %s2669_s15  ;;  %s2836_s15 = sld [smem:[#allocation6 + $0xc]] }
  0xd8   : > { %v334_v5 = vpop.permute.xlu1 %333  ;;  %v326_v16 = vpop.permute.xlu0 %325 }
  0xd9   : > { %336 = vst.msk [vmem:[#allocation5 + $0x4] sm:$0x1] %vm322_vm4, %v334_v5  ;;  %328 = vst.msk [vmem:[#allocation5 + $0x3] sm:$0x1] %vm322_vm4, %v326_v16 }
  0xdc   : > { %v342_v17 = vpop.permute.xlu1 %341  ;;  %v350_v18 = vpop.permute.xlu0 %349 }
  0xdd   : > { %344 = vst.msk [vmem:[#allocation5 + $0x5] sm:$0x1] %vm322_vm4, %v342_v17  ;;  %352 = vst.msk [vmem:[#allocation5 + $0x6] sm:$0x1] %vm322_vm4, %v350_v18 }
  0xe0   : > { %v358_v19 = vpop.permute.xlu1 %357  ;;  %v366_v20 = vpop.permute.xlu0 %365 }
  0xe1   : > { %360 = vst.msk [vmem:[#allocation5 + $0x7] sm:$0x1] %vm322_vm4, %v358_v19  ;;  %368 = vst.msk [vmem:[#allocation5 + $0x8] sm:$0x1] %vm322_vm4, %v366_v20 }
  0xe4   : > { %v374_v21 = vpop.permute.xlu1 %373  ;;  %v382_v22 = vpop.permute.xlu0 %381 }
  0xe5   : > { %376 = vst.msk [vmem:[#allocation5 + $0x9] sm:$0x1] %vm322_vm4, %v374_v21  ;;  %384 = vst.msk [vmem:[#allocation5 + $0xa] sm:$0x1] %vm322_vm4, %v382_v22 }
  0xe8   : > { %v460_v24 = vld [vmem:[#allocation5] sm:$0xff]  ;;  %v392_v25 = vpop.permute.xlu1 %391  ;;  %v400_v26 = vpop.permute.xlu0 %399 }
  0xe9   : > { %394 = vst.msk [vmem:[#allocation5 + $0xb] sm:$0x1] %vm322_vm4, %v392_v25  ;;  %402 = vst.msk [vmem:[#allocation5 + $0xc] sm:$0x1] %vm322_vm4, %v400_v26  ;;  %v483_v27 = vmul.f32 %v482_v23, %v460_v24  ;;  %v511_v31 = vmul.f32 %v510_v28, %v460_v24  ;;  %v539_v36 = vmul.f32 %v538_v32, %v460_v24  ;;  %v2666_v54 = vld [vmem:[#allocation5 + $0x1] sm:$0xff] }
  0xea   : > { %v567_v40 = vmul.f32 %v566_v37, %v460_v24  ;;  %v595_v44 = vmul.f32 %v594_v41, %v460_v24  ;;  %v463_v51 = vmul.f32 %v462_v45, %v460_v24  ;;  %v623_v53 = vmul.f32 %v622_v47, %v460_v24 }
  0xeb   : > { %487 = vrot.lane.b32.xlu0 %v483_v27, %s4057_s26  ;;  %v667_v59 = vmul.f32 %v666_v55, %v2666_v54  ;;  %v695_v63 = vmul.f32 %v694_v60, %v2666_v54  ;;  %v723_v3 = vmul.f32 %v722_v0, %v2666_v54  ;;  %v751_v8 = vmul.f32 %v750_v4, %v2666_v54 }
  0xec   : > { %v408_v29 = vpop.permute.xlu1 %407  ;;  %v320_v30 = vpop.permute.xlu0 %319  ;;  %v779_v16 = vmul.f32 %v778_v10, %v2666_v54  ;;  %v2734_v24 = vld [vmem:[#allocation5 + $0x2] sm:$0xff] }
  0xed   : > { %410 = vst.msk [vmem:[#allocation5 + $0xd] sm:$0x1] %vm322_vm4, %v408_v29  ;;  %323 = vst.msk [vmem:[#allocation4 + $0x3] sm:$0x1] %vm322_vm4, %v320_v30 }
  0xef   : > { %515 = vrot.lane.b32.xlu0 %v511_v31, %s4047_s30  ;;  %v497_v31 = vstv %s2737_s18  ;;  %s2906_s18 = sld [smem:[#allocation6 + $0x42]] }
  0xf0   : > { %v330_v33 = vpop.permute.xlu1 %329  ;;  %v338_v34 = vpop.permute.xlu0 %337 }
  0xf1   : > { %332 = vst.msk [vmem:[#allocation4 + $0x4] sm:$0x1] %vm322_vm4, %v330_v33  ;;  %340 = vst.msk [vmem:[#allocation4 + $0x5] sm:$0x1] %vm322_vm4, %v338_v34  ;;  %v525_v34 = vstv %s2747_s24  ;;  %s2917_s24 = sld [smem:[#allocation6 + $0x12]] }
  0xf3   : > { %543 = vrot.lane.b32.xlu0 %v539_v36, %s4053_s19 }
  0xf4   : > { %v346_v38 = vpop.permute.xlu1 %345  ;;  %v354_v39 = vpop.permute.xlu0 %353 }
  0xf5   : > { %348 = vst.msk [vmem:[#allocation4 + $0x6] sm:$0x1] %vm322_vm4, %v346_v38  ;;  %356 = vst.msk [vmem:[#allocation4 + $0x7] sm:$0x1] %vm322_vm4, %v354_v39  ;;  %v553_v39 = vstv %s2757_s1  ;;  %s2930_s1 = sld [smem:[#allocation6 + $0x43]] }
  0xf7   : > { %571 = vrot.lane.b32.xlu0 %v567_v40, %s4049_s6 }
  0xf8   : > { %v362_v42 = vpop.permute.xlu1 %361  ;;  %v370_v43 = vpop.permute.xlu0 %369 }
  0xf9   : > { %364 = vst.msk [vmem:[#allocation4 + $0x8] sm:$0x1] %vm322_vm4, %v362_v42  ;;  %372 = vst.msk [vmem:[#allocation4 + $0x9] sm:$0x1] %vm322_vm4, %v370_v43  ;;  %v581_v42 = vstv %s2767_s22  ;;  %s2943_s22 = sld [smem:[#allocation6 + $0x13]] }
  0xfb   : > { %599 = vrot.lane.b32.xlu0 %v595_v44, %s4051_s8 }
  0xfc   : > { %v2659_v48 = vld [vmem:[#allocation4] sm:$0xff]  ;;  %v378_v49 = vpop.permute.xlu1 %377  ;;  %v387_v50 = vpop.permute.xlu0 %386 }
  0xfd   : > { %v456_v52 = vmul.f32 %v455_v46, %v2659_v48  ;;  %380 = vst.msk [vmem:[#allocation4 + $0xa] sm:$0x1] %vm322_vm4, %v378_v49  ;;  %389 = vst.msk [vmem:[#allocation4 + $0xb] sm:$0x1] %vm322_vm4, %v387_v50  ;;  %v526_v36 = vmul.f32 %v525_v34, %v2659_v48  ;;  %v554_v40 = vmul.f32 %v553_v39, %v2659_v48  ;;  %v653_v50 = vstv %s2790_s5  ;;  %s2982_s5 = sld [smem:[#allocation6 + $0x45]] }
  0xfe   : > { %v582_v43 = vmul.f32 %v581_v42, %v2659_v48 }
  0xff   : > { %v2671_v56 = vadd.f32 %v463_v51, %v456_v52  ;;  %627 = vrot.lane.b32.xlu0 %v623_v53, %s4045_s16  ;;  %s2698_s16 = sld [smem:[#allocation6 + $0x3e]]  ;;  %v681_v52 = vstv %s2801_s13 }
 0x100   : > { %v396_v57 = vpop.permute.xlu1 %395  ;;  %v404_v58 = vpop.permute.xlu0 %403  ;;  %v2811_v49 = vld [vmem:[#allocation4 + $0x1] sm:$0xff]  ;;  %s2969_s13 = sld [smem:[#allocation6 + $0x14]] }
 0x101   : > { %398 = vst.msk [vmem:[#allocation4 + $0xc] sm:$0x1] %vm322_vm4, %v396_v57  ;;  %406 = vst.msk [vmem:[#allocation4 + $0xd] sm:$0x1] %vm322_vm4, %v404_v58  ;;  %v654_v51 = vmul.f32 %v653_v50, %v2811_v49  ;;  %v682_v53 = vmul.f32 %v681_v52, %v2811_v49  ;;  %v709_v57 = vstv %s2814_s21  ;;  %s2995_s21 = sld [smem:[#allocation6 + $0x16]] }
 0x102   : > { %v710_v58 = vmul.f32 %v709_v57, %v2811_v49 }
 0x103   : > { %671 = vrot.lane.b32.xlu0 %v667_v59, %s4057_s26 }
 0x104   : > { %v412_v61 = vpop.permute.xlu1 %411  ;;  %v420_v62 = vpop.permute.xlu0 %419 }
 0x105   : > { %414 = vst.msk [vmem:[#allocation4 + $0xe] sm:$0x1] %vm322_vm4, %v412_v61  ;;  %422 = vst.msk [vmem:[#allocation4 + $0xf] sm:$0x1] %vm322_vm4, %v420_v62  ;;  %v806_v18 = vstv %s2698_s16  ;;  %v737_v61 = vstv %s2825_s7  ;;  %s2860_s16 = sld [smem:[#allocation6 + $0xf]] }
 0x106   : > { %v807_v22 = vmul.f32 %v806_v18, %v2666_v54  ;;  %v738_v62 = vmul.f32 %v737_v61, %v2811_v49  ;;  %s3010_s7 = sld [smem:[#allocation6 + $0x47]] }
 0x107   : > { %699 = vrot.lane.b32.xlu0 %v695_v63, %s4047_s30  ;;  %s2709_s30 = sld [smem:[#allocation6 + $0x40]] }
 0x108   : > { %v424_v1 = vpop.permute.xlu1 %423  ;;  %v416_v2 = vpop.permute.xlu0 %415 }
 0x109   : > { %426 = vst.msk [vmem:[#allocation5 + $0xf] sm:$0x1] %vm322_vm4, %v424_v1  ;;  %418 = vst.msk [vmem:[#allocation5 + $0xe] sm:$0x1] %vm322_vm4, %v416_v2 }
 0x10b   : > { %727 = vrot.lane.b32.xlu0 %v723_v3, %s4053_s19  ;;  %s4087_s19 = smov 126   ;;  %v793_v3 = vstv %s2849_s3  ;;  %s3040_s3 = sld [smem:[#allocation6 + $0x48]] }
 0x10c   : > { %v432_v6 = vpop.permute.xlu1 %431  ;;  %v428_v7 = vpop.permute.xlu0 %427  ;;  %v2706_v9 = vld [vmem:[#allocation4 + $0x8] sm:$0xff] }
 0x10d   : > { %434 = vst.msk [vmem:[#allocation5 + $0x10] sm:$0x1] %vm322_vm4, %v432_v6  ;;  %430 = vst.msk [vmem:[#allocation4 + $0x10] sm:$0x1] %vm322_vm4, %v428_v7  ;;  %v457_v15 = vmul.f32 %v455_v46, %v2706_v9  ;;  %v850_v25 = vstv %s2709_s30  ;;  %v499_v6 = vmul.f32 %v497_v31, %v2706_v9  ;;  %v2881_v7 = vld [vmem:[#allocation4 + $0x2] sm:$0xff]  ;;  %s2884_s30 = sld [smem:[#allocation6 + $0x41]] }
 0x10e   : > { %v851_v26 = vmul.f32 %v850_v25, %v2734_v24 }
 0x10f   : > { %755 = vrot.lane.b32.xlu0 %v751_v8, %s4049_s6  ;;  %s2721_s6 = sld [smem:[#allocation6 + $0x1]]  ;;  %v837_v8 = vstv %s2860_s16 }
 0x110   : > { %v461_v11 = vld [vmem:[#allocation5 + $0x8] sm:$0xff]  ;;  %v440_v12 = vpop.permute.xlu1 %439  ;;  %v436_v14 = vpop.permute.xlu0 %435  ;;  %s3053_s16 = sld [smem:[#allocation6 + $0x18]] }
 0x111   : > { %v464_v5 = vmul.f32 %v462_v45, %v461_v11  ;;  %442 = vst.msk [vmem:[#allocation5 + $0x11] sm:$0x1] %vm322_vm4, %v440_v12  ;;  %438 = vst.msk [vmem:[#allocation4 + $0x11] sm:$0x1] %vm322_vm4, %v436_v14  ;;  %v484_v17 = vmul.f32 %v482_v23, %v461_v11  ;;  %v512_v23 = vmul.f32 %v510_v28, %v461_v11  ;;  %v609_v45 = vstv %s2779_s29  ;;  %s2956_s29 = sld [smem:[#allocation6 + $0x44]] }
 0x112   : > { %v540_v27 = vmul.f32 %v538_v32, %v461_v11  ;;  %v568_v30 = vmul.f32 %v566_v37, %v461_v11  ;;  %v498_v32 = vmul.f32 %v497_v31, %v2659_v48  ;;  %v596_v33 = vmul.f32 %v594_v41, %v461_v11 }
 0x113   : > { %v2723_v19 = vadd.f32 %v464_v5, %v457_v15  ;;  %783 = vrot.lane.b32.xlu0 %v779_v16, %s4051_s8  ;;  %489 = vrot.lane.b32.xlu1 %v484_v17, %s4057_s26  ;;  %s4086_s8 = smov 122   ;;  %v624_v37 = vmul.f32 %v622_v47, %v461_v11  ;;  %v610_v46 = vmul.f32 %v609_v45, %v2659_v48  ;;  %v865_v12 = vstv %s2871_s17  ;;  %s3066_s17 = sld [smem:[#allocation6 + $0x49]] }
 0x114   : > { %v448_v20 = vpop.permute.xlu1 %447  ;;  %v444_v21 = vpop.permute.xlu0 %443  ;;  %v2776_v38 = vld [vmem:[#allocation5 + $0x9] sm:$0xff]  ;;  %v527_v11 = vmul.f32 %v525_v34, %v2706_v9  ;;  %v866_v14 = vmul.f32 %v865_v12, %v2881_v7  ;;  %v555_v15 = vmul.f32 %v553_v39, %v2706_v9  ;;  %v878_v5 = vstv %s2884_s30  ;;  %s3081_s30 = sld [smem:[#allocation6 + $0x19]] }
 0x115   : > { %450 = vst.msk [vmem:[#allocation5 + $0x12] sm:$0x1] %vm322_vm4, %v448_v20  ;;  %446 = vst.msk [vmem:[#allocation4 + $0x12] sm:$0x1] %vm322_vm4, %v444_v21  ;;  %v469_v29 = vstv %s2721_s6  ;;  %v668_v41 = vmul.f32 %v666_v55, %v2776_v38  ;;  %v696_v44 = vmul.f32 %v694_v60, %v2776_v38  ;;  %v724_v47 = vmul.f32 %v722_v0, %v2776_v38  ;;  %s2895_s6 = sld [smem:[#allocation6 + $0x11]] }
 0x116   : > { %v470_v28 = vmul.f32 %v469_v29, %v2659_v48  ;;  %v752_v48 = vmul.f32 %v750_v4, %v2776_v38  ;;  %v780_v55 = vmul.f32 %v778_v10, %v2776_v38  ;;  %v808_v59 = vmul.f32 %v806_v18, %v2776_v38  ;;  %vm4065_vm4 = vmand %vm3881_vm2, %vm3886_vm3 }
 0x117   : > { %811 = vrot.lane.b32.xlu0 %v807_v22, %s4086_s8  ;;  %517 = vrot.lane.b32.xlu1 %v512_v23, %s4087_s19  ;;  %v765_v0 = vstv %s2836_s15  ;;  %v471_v2 = vmul.f32 %v469_v29, %v2706_v9  ;;  %v794_v4 = vmul.f32 %v793_v3, %v2811_v49  ;;  %v838_v10 = vmul.f32 %v837_v8, %v2881_v7  ;;  %v2927_v22 = vld [vmem:[#allocation4 + $0x9] sm:$0xff]  ;;  %s3025_s15 = sld [smem:[#allocation6 + $0x17]] }
 0x118   : > { %v2846_v60 = vld [vmem:[#allocation5 + $0xa] sm:$0xff]  ;;  %v766_v1 = vmul.f32 %v765_v0, %v2811_v49  ;;  %v879_v16 = vmul.f32 %v878_v5, %v2734_v24  ;;  %v583_v17 = vmul.f32 %v581_v42, %v2706_v9  ;;  %v611_v21 = vmul.f32 %v609_v45, %v2706_v9 }
 0x119   : > { %v852_v63 = vmul.f32 %v850_v25, %v2846_v60  ;;  %v906_v23 = vstv %s2906_s18  ;;  %v655_v9 = vmul.f32 %v653_v50, %v2927_v22  ;;  %v934_v31 = vstv %s2930_s1  ;;  %s3111_s18 = sld [smem:[#allocation6 + $0x1a]] }
 0x11a   : > { %v711_v34 = vmul.f32 %v709_v57, %v2927_v22  ;;  %v977_v45 = vstv %s2969_s13  ;;  %v795_v50 = vmul.f32 %v793_v3, %v2927_v22  ;;  %v3022_v57 = vld [vmem:[#allocation4 + $0x3] sm:$0xff]  ;;  %v880_v3 = vmul.f32 %v878_v5, %v2846_v60  ;;  %s3139_s1 = sld [smem:[#allocation6 + $0x1b]] }
 0x11b   : > { %855 = vrot.lane.b32.xlu0 %v851_v26, %s4057_s26  ;;  %545 = vrot.lane.b32.xlu1 %v540_v27, %s4088_s0  ;;  %v893_v18 = vstv %s2895_s6  ;;  %v907_v26 = vmul.f32 %v906_v23, %v2734_v24  ;;  %v921_v27 = vstv %s2917_s24  ;;  %v908_v5 = vmul.f32 %v906_v23, %v2846_v60  ;;  %s3096_s6 = sld [smem:[#allocation6 + $0x4a]] }
 0x11c   : > { %v894_v20 = vmul.f32 %v893_v18, %v2881_v7  ;;  %v1090_v23 = vstv %s3066_s17  ;;  %s3125_s24 = sld [smem:[#allocation6 + $0x4b]] }
 0x11d   : > { %s3171_s13 = sld [smem:[#allocation6 + $0x1d]] }
 0x11e   : > { %s3285_s17 = sld [smem:[#allocation6 + $0x51]] }
 0x11f   : > { %474 = vrot.lane.b32.xlu0 %v470_v28, %s4057_s26  ;;  %573 = vrot.lane.b32.xlu1 %v568_v30, %s4089_s25  ;;  %v922_v28 = vmul.f32 %v921_v27, %v2881_v7  ;;  %v683_v30 = vmul.f32 %v681_v52, %v2927_v22 }
 0x123   : > { %502 = vrot.lane.b32.xlu0 %v498_v32, %s4087_s19  ;;  %601 = vrot.lane.b32.xlu1 %v596_v33, %s4090_s23  ;;  %v935_v33 = vmul.f32 %v934_v31, %v2734_v24 }
 0x127   : > { %530 = vrot.lane.b32.xlu0 %v526_v36, %s4088_s0  ;;  %629 = vrot.lane.b32.xlu1 %v624_v37, %s4086_s8  ;;  %v949_v36 = vstv %s2943_s22  ;;  %s3153_s22 = sld [smem:[#allocation6 + $0x4c]] }
 0x128   : > { %v950_v39 = vmul.f32 %v949_v36, %v2881_v7 }
 0x12b   : > { %558 = vrot.lane.b32.xlu0 %v554_v40, %s4089_s25  ;;  %673 = vrot.lane.b32.xlu1 %v668_v41, %s4057_s26  ;;  %v739_v40 = vmul.f32 %v737_v61, %v2927_v22  ;;  %v962_v41 = vstv %s2956_s29  ;;  %s3158_s29 = sld [smem:[#allocation6 + $0x7]] }
 0x12f   : > { %586 = vrot.lane.b32.xlu0 %v582_v43, %s4090_s23  ;;  %701 = vrot.lane.b32.xlu1 %v696_v44, %s4087_s19  ;;  %v963_v43 = vmul.f32 %v962_v41, %v2734_v24  ;;  %v767_v44 = vmul.f32 %v765_v0, %v2927_v22  ;;  %v1034_v0 = vstv %s3010_s7  ;;  %s3229_s7 = sld [smem:[#allocation6 + $0x4f]] }
 0x133   : > { %614 = vrot.lane.b32.xlu0 %v610_v46, %s4086_s8  ;;  %729 = vrot.lane.b32.xlu1 %v724_v47, %s4088_s0  ;;  %v978_v47 = vmul.f32 %v977_v45, %v2881_v7 }
 0x137   : > { %658 = vrot.lane.b32.xlu0 %v654_v51, %s4057_s26  ;;  %757 = vrot.lane.b32.xlu1 %v752_v48, %s4089_s25  ;;  %v3007_v51 = vld [vmem:[#allocation4 + $0xa] sm:$0xff]  ;;  %v990_v48 = vstv %s2982_s5  ;;  %s3189_s5 = sld [smem:[#allocation6 + $0x4e]] }
 0x13b   : > { %686 = vrot.lane.b32.xlu0 %v682_v53, %s4087_s19  ;;  %785 = vrot.lane.b32.xlu1 %v780_v55, %s4090_s23  ;;  %v991_v53 = vmul.f32 %v990_v48, %v2734_v24  ;;  %v839_v55 = vmul.f32 %v837_v8, %v3007_v51 }
 0x13f   : > { %714 = vrot.lane.b32.xlu0 %v710_v58, %s4088_s0  ;;  %813 = vrot.lane.b32.xlu1 %v808_v59, %s4086_s8  ;;  %v1021_v58 = vstv %s2995_s21  ;;  %s3206_s21 = sld [smem:[#allocation6 + $0x1e]] }
 0x140   : > { %v1022_v61 = vmul.f32 %v1021_v58, %v3022_v57 }
 0x143   : > { %742 = vrot.lane.b32.xlu0 %v738_v62, %s4089_s25  ;;  %857 = vrot.lane.b32.xlu1 %v852_v63, %s4057_s26  ;;  %v867_v62 = vmul.f32 %v865_v12, %v3007_v51  ;;  %v3037_v63 = vld [vmem:[#allocation5 + $0x3] sm:$0xff] }
 0x147   : > { %770 = vrot.lane.b32.xlu0 %v766_v1, %s4090_s23  ;;  %476 = vrot.lane.b32.xlu1 %v471_v2, %s4057_s26  ;;  %v1035_v2 = vmul.f32 %v1034_v0, %v3037_v63 }
 0x14b   : > { %798 = vrot.lane.b32.xlu0 %v794_v4, %s4086_s8  ;;  %504 = vrot.lane.b32.xlu1 %v499_v6, %s4087_s19  ;;  %v1049_v4 = vstv %s3025_s15  ;;  %s3242_s15 = sld [smem:[#allocation6 + $0x1f]] }
 0x14c   : > { %v1050_v8 = vmul.f32 %v1049_v4, %v3022_v57 }
 0x14f   : > { %842 = vrot.lane.b32.xlu0 %v838_v10, %s4057_s26  ;;  %532 = vrot.lane.b32.xlu1 %v527_v11, %s4088_s0  ;;  %v895_v10 = vmul.f32 %v893_v18, %v3007_v51  ;;  %v1062_v11 = vstv %s3040_s3  ;;  %s3256_s3 = sld [smem:[#allocation6 + $0x50]] }
 0x153   : > { %870 = vrot.lane.b32.xlu0 %v866_v14, %s4087_s19  ;;  %560 = vrot.lane.b32.xlu1 %v555_v15, %s4089_s25  ;;  %v1063_v15 = vmul.f32 %v1062_v11, %v3037_v63 }
 0x157   : > { %883 = vrot.lane.b32.xlu0 %v879_v16, %s4087_s19  ;;  %588 = vrot.lane.b32.xlu1 %v583_v17, %s4090_s23  ;;  %v1077_v16 = vstv %s3053_s16  ;;  %s3270_s16 = sld [smem:[#allocation6 + $0x20]] }
 0x15b   : > { %898 = vrot.lane.b32.xlu0 %v894_v20, %s4088_s0  ;;  %616 = vrot.lane.b32.xlu1 %v611_v21, %s4086_s8  ;;  %v1078_v20 = vmul.f32 %v1077_v16, %v3022_v57  ;;  %v923_v21 = vmul.f32 %v921_v27, %v3007_v51  ;;  %v1105_v27 = vstv %s3081_s30  ;;  %s3300_s30 = sld [smem:[#allocation6 + $0x21]] }
 0x15d   : > { %v2934_v25 = vpop.permute.xlu0 %487 }
 0x15f   : > { %911 = vrot.lane.b32.xlu0 %v907_v26, %s4088_s0  ;;  %660 = vrot.lane.b32.xlu1 %v655_v9, %s4057_s26 }
 0x161   : > { %v2947_v29 = vpop.permute.xlu0 %515 }
 0x163   : > { %926 = vrot.lane.b32.xlu0 %v922_v28, %s4089_s25  ;;  %688 = vrot.lane.b32.xlu1 %v683_v30, %s4087_s19  ;;  %v1091_v28 = vmul.f32 %v1090_v23, %v3037_v63  ;;  %v936_v30 = vmul.f32 %v934_v31, %v2846_v60 }
 0x165   : > { %v2960_v32 = vpop.permute.xlu0 %543 }
 0x167   : > { %939 = vrot.lane.b32.xlu0 %v935_v33, %s4089_s25  ;;  %716 = vrot.lane.b32.xlu1 %v711_v34, %s4088_s0 }
 0x169   : > { %v2973_v37 = vpop.permute.xlu0 %571 }
 0x16b   : > { %954 = vrot.lane.b32.xlu0 %v950_v39, %s4090_s23  ;;  %744 = vrot.lane.b32.xlu1 %v739_v40, %s4089_s25  ;;  %v1106_v39 = vmul.f32 %v1105_v27, %v3022_v57  ;;  %v951_v40 = vmul.f32 %v949_v36, %v3007_v51 }
 0x16d   : > { %v2986_v42 = vpop.permute.xlu0 %599 }
 0x16f   : > { %967 = vrot.lane.b32.xlu0 %v963_v43, %s4090_s23  ;;  %772 = vrot.lane.b32.xlu1 %v767_v44, %s4090_s23  ;;  %v1118_v43 = vstv %s3096_s6  ;;  %s3314_s6 = sld [smem:[#allocation6 + $0x52]] }
 0x170   : > { %v1119_v36 = vmul.f32 %v1118_v43, %v3037_v63 }
 0x171   : > { %v2999_v46 = vpop.permute.xlu0 %627 }
 0x173   : > { %982 = vrot.lane.b32.xlu0 %v978_v47, %s4086_s8  ;;  %800 = vrot.lane.b32.xlu1 %v795_v50, %s4086_s8 }
 0x175   : > { %v3014_v52 = vpop.permute.xlu0 %671 }
 0x177   : > { %995 = vrot.lane.b32.xlu0 %v991_v53, %s4086_s8  ;;  %844 = vrot.lane.b32.xlu1 %v839_v55, %s4057_s26  ;;  %v1133_v55 = vstv %s3111_s18  ;;  %s3334_s18 = sld [smem:[#allocation6 + $0x22]] }
 0x179   : > { %v3029_v59 = vpop.permute.xlu0 %699 }
 0x17b   : > { %1026 = vrot.lane.b32.xlu0 %v1022_v61, %s4057_s26  ;;  %872 = vrot.lane.b32.xlu1 %v867_v62, %s4087_s19 }
 0x17d   : > { %v3044_v1 = vpop.permute.xlu0 %727 }
 0x17f   : > { %1039 = vrot.lane.b32.xlu0 %v1035_v2, %s4057_s26  ;;  %885 = vrot.lane.b32.xlu1 %v880_v3, %s4087_s19  ;;  %v1134_v2 = vmul.f32 %v1133_v55, %v3022_v57  ;;  %s3173_s26 = sld [smem:[#allocation6 + $0x38]] }
 0x181   : > { %v3057_v6 = vpop.permute.xlu0 %755 }
 0x183   : > { %1054 = vrot.lane.b32.xlu0 %v1050_v8, %s4087_s19  ;;  %900 = vrot.lane.b32.xlu1 %v895_v10, %s4088_s0  ;;  %v1146_v8 = vstv %s3125_s24  ;;  %s3346_s24 = sld [smem:[#allocation6 + $0x53]] }
 0x185   : > { %v3070_v12 = vpop.permute.xlu1 %489  ;;  %v3072_v14 = vpop.permute.xlu0 %783 }
 0x187   : > { %1067 = vrot.lane.b32.xlu0 %v1063_v15, %s4087_s19  ;;  %913 = vrot.lane.b32.xlu1 %v908_v5, %s4088_s0  ;;  %v992_v5 = vmul.f32 %v990_v48, %v2846_v60 }
 0x189   : > { %v3085_v17 = vpop.permute.xlu1 %517  ;;  %v3087_v18 = vpop.permute.xlu0 %811 }
 0x18b   : > { %1082 = vrot.lane.b32.xlu0 %v1078_v20, %s4088_s0  ;;  %928 = vrot.lane.b32.xlu1 %v923_v21, %s4089_s25  ;;  %v3168_v20 = vld [vmem:[#allocation4 + $0xb] sm:$0xff] }
 0x18d   : > { %v3100_v26 = vpop.permute.xlu1 %545  ;;  %v3102_v9 = vpop.permute.xlu0 %855 }
 0x18f   : > { %1095 = vrot.lane.b32.xlu0 %v1091_v28, %s4088_s0  ;;  %941 = vrot.lane.b32.xlu1 %v936_v30, %s4089_s25  ;;  %v1161_v28 = vstv %s3139_s1  ;;  %s3361_s1 = sld [smem:[#allocation6 + $0x24]] }
 0x191   : > { %v3115_v33 = vpop.permute.xlu1 %573  ;;  %v475_v34 = vpop.permute.xlu0 %474 }
 0x192   : > { %v480_v31 = vadd.f32 %v475_v34, %v2671_v56  ;;  %v964_v56 = vmul.f32 %v962_v41, %v2846_v60  ;;  %v979_v41 = vmul.f32 %v977_v45, %v3007_v51  ;;  %v1147_v45 = vmul.f32 %v1146_v8, %v3037_v63 }
 0x193   : > { %1110 = vrot.lane.b32.xlu0 %v1106_v39, %s4089_s25  ;;  %956 = vrot.lane.b32.xlu1 %v951_v40, %s4090_s23  ;;  %v1162_v34 = vmul.f32 %v1161_v28, %v3022_v57  ;;  %v1023_v39 = vmul.f32 %v1021_v58, %v3168_v20  ;;  %v3186_v40 = vld [vmem:[#allocation5 + $0xb] sm:$0xff] }
 0x194   : > { %v493_v44 = vadd.f32 %v2934_v25, %v480_v31 }
 0x195   : > { %v3130_v47 = vpop.permute.xlu1 %601  ;;  %v503_v50 = vpop.permute.xlu0 %502 }
 0x196   : > { %v508_v53 = vadd.f32 %v503_v50, %v493_v44  ;;  %v1174_v44 = vstv %s3153_s22  ;;  %v639_v50 = vstv %s3158_s29  ;;  %s3381_s22 = sld [smem:[#allocation6 + $0x55]] }
 0x197   : > { %1123 = vrot.lane.b32.xlu0 %v1119_v36, %s4089_s25  ;;  %969 = vrot.lane.b32.xlu1 %v964_v56, %s4090_s23  ;;  %v1175_v56 = vmul.f32 %v1174_v44, %v3037_v63  ;;  %s3408_s29 = sld [smem:[#allocation6 + $0x56]] }
 0x198   : > { %v521_v25 = vadd.f32 %v2947_v29, %v508_v53  ;;  %v1036_v53 = vmul.f32 %v1034_v0, %v3186_v40 }
 0x199   : > { %v3144_v61 = vpop.permute.xlu1 %629  ;;  %v531_v62 = vpop.permute.xlu0 %530 }
 0x19a   : > { %v536_v3 = vadd.f32 %v531_v62, %v521_v25  ;;  %v3203_v62 = vld [vmem:[#allocation4 + $0x4] sm:$0xff] }
 0x19b   : > { %1138 = vrot.lane.b32.xlu0 %v1134_v2, %s4090_s23  ;;  %984 = vrot.lane.b32.xlu1 %v979_v41, %s4086_s8  ;;  %v1205_v2 = vstv %s3171_s13  ;;  %v640_v41 = vmul.f32 %v639_v50, %v2811_v49  ;;  %v1218_v49 = vstv %s3189_s5  ;;  %s3420_s13 = sld [smem:[#allocation6 + $0x26]] }
 0x19c   : > { %v549_v29 = vadd.f32 %v2960_v32, %v536_v3  ;;  %s3422_s5 = sld [smem:[#allocation6 + $0x15]] }
 0x19d   : > { %v3160_v10 = vpop.permute.xlu1 %673  ;;  %v559_v15 = vpop.permute.xlu0 %558 }
 0x19e   : > { %v564_v21 = vadd.f32 %v559_v15, %v549_v29  ;;  %v1051_v15 = vmul.f32 %v1049_v4, %v3168_v20 }
 0x19f   : > { %1151 = vrot.lane.b32.xlu0 %v1147_v45, %s4090_s23  ;;  %997 = vrot.lane.b32.xlu1 %v992_v5, %s4086_s8  ;;  %v1206_v45 = vmul.f32 %v1205_v2, %v3203_v62 }
 0x1a0   : > { %v577_v32 = vadd.f32 %v2973_v37, %v564_v21 }
 0x1a1   : > { %v3178_v30 = vpop.permute.xlu1 %701  ;;  %v587_v48 = vpop.permute.xlu0 %586 }
 0x1a2   : > { %v592_v31 = vadd.f32 %v587_v48, %v577_v32  ;;  %v3226_v32 = vld [vmem:[#allocation5 + $0x4] sm:$0xff] }
 0x1a3   : > { %1166 = vrot.lane.b32.xlu0 %v1162_v34, %s4086_s8  ;;  %1028 = vrot.lane.b32.xlu1 %v1023_v39, %s4091_s4  ;;  %v1219_v34 = vmul.f32 %v1218_v49, %v3226_v32 }
 0x1a4   : > { %v605_v37 = vadd.f32 %v2986_v42, %v592_v31  ;;  %v646_v42 = vstv %s3173_s26  ;;  %v1233_v31 = vstv %s3206_s21  ;;  %s3394_s26 = sld [smem:[#allocation6 + $0x25]] }
 0x1a5   : > { %v3195_v36 = vpop.permute.xlu1 %729  ;;  %v615_v58 = vpop.permute.xlu0 %614  ;;  %v647_v5 = vmul.f32 %v646_v42, %v2666_v54  ;;  %v1064_v54 = vmul.f32 %v1062_v11, %v3186_v40  ;;  %v1079_v11 = vmul.f32 %v1077_v16, %v3168_v20  ;;  %v1092_v16 = vmul.f32 %v1090_v23, %v3186_v40  ;;  %s3427_s21 = sld [smem:[#allocation6 + $0x46]] }
 0x1a6   : > { %v620_v25 = vadd.f32 %v615_v58, %v605_v37  ;;  %v1107_v23 = vmul.f32 %v1105_v27, %v3168_v20 }
 0x1a7   : > { %1179 = vrot.lane.b32.xlu0 %v1175_v56, %s4086_s8  ;;  %1041 = vrot.lane.b32.xlu1 %v1036_v53, %s4091_s4  ;;  %v1234_v53 = vmul.f32 %v1233_v31, %v3203_v62 }
 0x1a8   : > { %v633_v3 = vadd.f32 %v2999_v46, %v620_v25 }
 0x1a9   : > { %v3215_v0 = vpop.permute.xlu1 %757  ;;  %v659_v29 = vpop.permute.xlu0 %658 }
 0x1aa   : > { %v642_v21 = vadd.f32 %v640_v41, %v633_v3  ;;  %v1246_v41 = vstv %s3229_s7  ;;  %s3436_s7 = sld [smem:[#allocation6 + $0x57]] }
 0x1ab   : > { %1056 = vrot.lane.b32.xlu1 %v1051_v15, %s4087_s19  ;;  %1210 = vrot.lane.b32.xlu0 %v1206_v45, %s4091_s4  ;;  %v1247_v15 = vmul.f32 %v1246_v41, %v3226_v32 }
 0x1ac   : > { %v649_v46 = vadd.f32 %v647_v5, %v642_v21  ;;  %v1261_v5 = vstv %s3242_s15  ;;  %s3448_s15 = sld [smem:[#allocation6 + $0x27]] }
 0x1ad   : > { %v3233_v4 = vpop.permute.xlu1 %785  ;;  %v687_v48 = vpop.permute.xlu0 %686 }
 0x1ae   : > { %v664_v39 = vadd.f32 %v659_v29, %v649_v46 }
 0x1af   : > { %1069 = vrot.lane.b32.xlu1 %v1064_v54, %s4087_s19  ;;  %1223 = vrot.lane.b32.xlu0 %v1219_v34, %s4091_s4 }
 0x1b0   : > { %v677_v37 = vadd.f32 %v3014_v52, %v664_v39  ;;  %v1274_v39 = vstv %s3256_s3  ;;  %s3465_s3 = sld [smem:[#allocation6 + $0x58]] }
 0x1b1   : > { %v3247_v58 = vpop.permute.xlu1 %813  ;;  %v715_v56 = vpop.permute.xlu0 %714 }
 0x1b2   : > { %v692_v25 = vadd.f32 %v687_v48, %v677_v37  ;;  %v1262_v48 = vmul.f32 %v1261_v5, %v3203_v62 }
 0x1b3   : > { %1084 = vrot.lane.b32.xlu1 %v1079_v11, %s4088_s0  ;;  %1238 = vrot.lane.b32.xlu0 %v1234_v53, %s4087_s19  ;;  %v1275_v11 = vmul.f32 %v1274_v39, %v3226_v32 }
 0x1b4   : > { %v705_v52 = vadd.f32 %v3029_v59, %v692_v25 }
 0x1b5   : > { %v3261_v3 = vpop.permute.xlu1 %857  ;;  %v743_v29 = vpop.permute.xlu0 %742 }
 0x1b6   : > { %v720_v45 = vadd.f32 %v715_v56, %v705_v52  ;;  %v1289_v52 = vstv %s3270_s16  ;;  %s3509_s16 = sld [smem:[#allocation6 + $0x29]] }
 0x1b7   : > { %1097 = vrot.lane.b32.xlu1 %v1092_v16, %s4088_s0  ;;  %1251 = vrot.lane.b32.xlu0 %v1247_v15, %s4087_s19  ;;  %v1135_v15 = vmul.f32 %v1133_v55, %v3168_v20 }
 0x1b8   : > { %v733_v59 = vadd.f32 %v3044_v1, %v720_v45  ;;  %v1290_v45 = vmul.f32 %v1289_v52, %v3203_v62 }
 0x1b9   : > { %v477_v21 = vpop.permute.xlu1 %476  ;;  %v771_v46 = vpop.permute.xlu0 %770 }
 0x1ba   : > { %v748_v54 = vadd.f32 %v743_v29, %v733_v59  ;;  %v481_v34 = vadd.f32 %v477_v21, %v2723_v19  ;;  %v1120_v19 = vmul.f32 %v1118_v43, %v3186_v40  ;;  %v823_v43 = vstv %s3275_s11  ;;  %s3486_s11 = sld [smem:[#allocation6 + $0x28]] }
 0x1bb   : > { %1112 = vrot.lane.b32.xlu1 %v1107_v23, %s4089_s25  ;;  %1266 = vrot.lane.b32.xlu0 %v1262_v48, %s4088_s0 }
 0x1bc   : > { %v761_v1 = vadd.f32 %v3057_v6, %v748_v54  ;;  %v494_v27 = vadd.f32 %v3070_v12, %v481_v34  ;;  %v1148_v34 = vmul.f32 %v1146_v8, %v3186_v40 }
 0x1bd   : > { %v505_v37 = vpop.permute.xlu1 %504  ;;  %v799_v56 = vpop.permute.xlu0 %798 }
 0x1be   : > { %v776_v53 = vadd.f32 %v771_v46, %v761_v1  ;;  %v509_v25 = vadd.f32 %v505_v37, %v494_v27  ;;  %v1302_v46 = vstv %s3285_s17  ;;  %s3520_s17 = sld [smem:[#allocation6 + $0x5a]] }
 0x1bf   : > { %1125 = vrot.lane.b32.xlu1 %v1120_v19, %s4089_s25  ;;  %1279 = vrot.lane.b32.xlu0 %v1275_v11, %s4088_s0  ;;  %v1303_v1 = vmul.f32 %v1302_v46, %v3226_v32  ;;  %v1163_v11 = vmul.f32 %v1161_v28, %v3168_v20 }
 0x1c0   : > { %v789_v6 = vadd.f32 %v3072_v14, %v776_v53  ;;  %v522_v12 = vadd.f32 %v3085_v17, %v509_v25  ;;  %v830_v14 = vstv %s3287_s10  ;;  %v824_v17 = vmul.f32 %v823_v43, %v2881_v7  ;;  %s3497_s10 = sld [smem:[#allocation6 + $0x59]] }
 0x1c1   : > { %v533_v29 = vpop.permute.xlu1 %532  ;;  %v843_v16 = vpop.permute.xlu0 %842  ;;  %v831_v27 = vmul.f32 %v830_v14, %v2734_v24 }
 0x1c2   : > { %v804_v59 = vadd.f32 %v799_v56, %v789_v6  ;;  %v537_v21 = vadd.f32 %v533_v29, %v522_v12  ;;  %v1317_v56 = vstv %s3300_s30  ;;  %v1330_v6 = vstv %s3314_s6  ;;  %s3533_s30 = sld [smem:[#allocation6 + $0x2b]] }
 0x1c3   : > { %1140 = vrot.lane.b32.xlu1 %v1135_v15, %s4090_s23  ;;  %1294 = vrot.lane.b32.xlu0 %v1290_v45, %s4089_s25  ;;  %v1318_v24 = vmul.f32 %v1317_v56, %v3203_v62  ;;  %v1331_v15 = vmul.f32 %v1330_v6, %v3226_v32  ;;  %s3546_s6 = sld [smem:[#allocation6 + $0x5c]] }
 0x1c4   : > { %v817_v55 = vadd.f32 %v3087_v18, %v804_v59  ;;  %v550_v23 = vadd.f32 %v3100_v26, %v537_v21  ;;  %v3358_v59 = vld [vmem:[#allocation4 + $0xc] sm:$0xff]  ;;  %v1345_v21 = vstv %s3334_s18  ;;  %s3559_s18 = sld [smem:[#allocation6 + $0x2c]] }
 0x1c5   : > { %v561_v48 = vpop.permute.xlu1 %560  ;;  %v871_v54 = vpop.permute.xlu0 %870 }
 0x1c6   : > { %v826_v37 = vadd.f32 %v824_v17, %v817_v55  ;;  %v565_v7 = vadd.f32 %v561_v48, %v550_v23  ;;  %v1207_v23 = vmul.f32 %v1205_v2, %v3358_v59  ;;  %v1346_v48 = vmul.f32 %v1345_v21, %v3203_v62 }
 0x1c7   : > { %1153 = vrot.lane.b32.xlu1 %v1148_v34, %s4090_s23  ;;  %1307 = vrot.lane.b32.xlu0 %v1303_v1, %s4089_s25  ;;  %v648_v34 = vmul.f32 %v646_v42, %v2776_v38 }
 0x1c8   : > { %v833_v18 = vadd.f32 %v831_v27, %v826_v37  ;;  %v578_v26 = vadd.f32 %v3115_v33, %v565_v7  ;;  %v3378_v27 = vld [vmem:[#allocation5 + $0xc] sm:$0xff] }
 0x1c9   : > { %v589_v8 = vpop.permute.xlu1 %588  ;;  %v884_v19 = vpop.permute.xlu0 %883  ;;  %v1220_v37 = vmul.f32 %v1218_v49, %v3378_v27  ;;  %v3391_v7 = vld [vmem:[#allocation4 + $0x5] sm:$0xff] }
 0x1ca   : > { %v848_v53 = vadd.f32 %v843_v16, %v833_v18  ;;  %v593_v25 = vadd.f32 %v589_v8, %v578_v26  ;;  %v1176_v16 = vmul.f32 %v1174_v44, %v3186_v40  ;;  %v1389_v18 = vstv %s3361_s1  ;;  %s3583_s1 = sld [smem:[#allocation6 + $0x2d]] }
 0x1cb   : > { %1168 = vrot.lane.b32.xlu1 %v1163_v11, %s4086_s8  ;;  %1322 = vrot.lane.b32.xlu0 %v1318_v24, %s4090_s23  ;;  %v1235_v11 = vmul.f32 %v1233_v31, %v3358_v59  ;;  %v1390_v24 = vmul.f32 %v1389_v18, %v3391_v7 }
 0x1cc   : > { %v861_v33 = vadd.f32 %v3102_v9, %v848_v53  ;;  %v606_v12 = vadd.f32 %v3130_v47, %v593_v25  ;;  %v641_v9 = vmul.f32 %v639_v50, %v2927_v22  ;;  %v1358_v22 = vstv %s3346_s24  ;;  %v3405_v25 = vld [vmem:[#allocation5 + $0x5] sm:$0xff]  ;;  %s3572_s24 = sld [smem:[#allocation6 + $0x5d]] }
 0x1cd   : > { %v617_v28 = vpop.permute.xlu1 %616  ;;  %v899_v29 = vpop.permute.xlu0 %898  ;;  %v1359_v38 = vmul.f32 %v1358_v22, %v3226_v32 }
 0x1ce   : > { %v621_v45 = vadd.f32 %v617_v28, %v606_v12  ;;  %v876_v47 = vadd.f32 %v871_v54, %v861_v33  ;;  %v1402_v33 = vstv %s3381_s22  ;;  %s3587_s22 = sld [smem:[#allocation6 + $0x1c]] }
 0x1cf   : > { %1181 = vrot.lane.b32.xlu1 %v1176_v16, %s4086_s8  ;;  %1335 = vrot.lane.b32.xlu0 %v1331_v15, %s4090_s23  ;;  %v1403_v16 = vmul.f32 %v1402_v33, %v3405_v25 }
 0x1d0   : > { %v634_v44 = vadd.f32 %v3144_v61, %v621_v45  ;;  %v889_v61 = vadd.f32 %v884_v19, %v876_v47  ;;  %v1417_v45 = vstv %s3394_s26  ;;  %s3595_s26 = sld [smem:[#allocation6 + $0x4d]] }
 0x1d1   : > { %v661_v17 = vpop.permute.xlu1 %660  ;;  %v912_v55 = vpop.permute.xlu0 %911 }
 0x1d2   : > { %v643_v1 = vadd.f32 %v641_v9, %v634_v44  ;;  %v904_v26 = vadd.f32 %v899_v29, %v889_v61  ;;  %v1248_v29 = vmul.f32 %v1246_v41, %v3378_v27  ;;  %v1263_v44 = vmul.f32 %v1261_v5, %v3358_v59 }
 0x1d3   : > { %1212 = vrot.lane.b32.xlu1 %v1207_v23, %s4091_s4  ;;  %1350 = vrot.lane.b32.xlu0 %v1346_v48, %s4086_s8  ;;  %v1430_v48 = vstv %s3408_s29  ;;  %v1276_v61 = vmul.f32 %v1274_v39, %v3378_v27  ;;  %s3601_s29 = sld [smem:[#allocation6 + $0x5e]] }
 0x1d4   : > { %v650_v50 = vadd.f32 %v648_v34, %v643_v1 }
 0x1d5   : > { %v689_v2 = vpop.permute.xlu1 %688  ;;  %v927_v54 = vpop.permute.xlu0 %926 }
 0x1d6   : > { %v665_v42 = vadd.f32 %v661_v17, %v650_v50  ;;  %v1418_v17 = vmul.f32 %v1417_v45, %v3391_v7  ;;  %v1431_v50 = vmul.f32 %v1430_v48, %v3405_v25 }
 0x1d7   : > { %1225 = vrot.lane.b32.xlu1 %v1220_v37, %s4091_s4  ;;  %1363 = vrot.lane.b32.xlu0 %v1359_v38, %s4086_s8  ;;  %v1445_v37 = vstv %s3420_s13  ;;  %v1007_v38 = vstv %s3422_s5  ;;  %s3615_s13 = sld [smem:[#allocation6 + $0x2e]] }
 0x1d8   : > { %v678_v8 = vadd.f32 %v3160_v10, %v665_v42  ;;  %v917_v10 = vadd.f32 %v912_v55, %v904_v26  ;;  %v1014_v42 = vstv %s3427_s21  ;;  %s3631_s5 = sld [smem:[#allocation6 + $0x5f]] }
 0x1d9   : > { %v717_v49 = vpop.permute.xlu1 %716  ;;  %v940_v19 = vpop.permute.xlu0 %939  ;;  %s3645_s21 = sld [smem:[#allocation6 + $0x2f]] }
 0x1da   : > { %v693_v53 = vadd.f32 %v689_v2, %v678_v8 }
 0x1db   : > { %1240 = vrot.lane.b32.xlu1 %v1235_v11, %s4087_s19  ;;  %1394 = vrot.lane.b32.xlu0 %v1390_v24, %s4091_s4  ;;  %v1008_v11 = vmul.f32 %v1007_v38, %v3022_v57 }
 0x1dc   : > { %v706_v12 = vadd.f32 %v3178_v30, %v693_v53  ;;  %v932_v30 = vadd.f32 %v927_v54, %v917_v10  ;;  %v825_v10 = vmul.f32 %v823_v43, %v3007_v51  ;;  %v1473_v51 = vstv %s3448_s15  ;;  %s3667_s15 = sld [smem:[#allocation6 + $0x30]] }
 0x1dd   : > { %v745_v28 = vpop.permute.xlu1 %744  ;;  %v955_v31 = vpop.permute.xlu0 %954 }
 0x1de   : > { %v721_v15 = vadd.f32 %v717_v49, %v706_v12  ;;  %v945_v55 = vadd.f32 %v940_v19, %v932_v30  ;;  %v1291_v49 = vmul.f32 %v1289_v52, %v3358_v59  ;;  %v1446_v19 = vmul.f32 %v1445_v37, %v3391_v7 }
 0x1df   : > { %1253 = vrot.lane.b32.xlu1 %v1248_v29, %s4087_s19  ;;  %1407 = vrot.lane.b32.xlu0 %v1403_v16, %s4091_s4  ;;  %v1015_v52 = vmul.f32 %v1014_v42, %v3037_v63  ;;  %v1304_v29 = vmul.f32 %v1302_v46, %v3378_v27  ;;  %v832_v63 = vmul.f32 %v830_v14, %v2846_v60 }
 0x1e0   : > { %v734_v9 = vadd.f32 %v3195_v36, %v721_v15  ;;  %v960_v34 = vadd.f32 %v955_v31, %v945_v55  ;;  %v1474_v60 = vmul.f32 %v1473_v51, %v3391_v7 }
 0x1e1   : > { %v773_v41 = vpop.permute.xlu1 %772  ;;  %v968_v47 = vpop.permute.xlu0 %967 }
 0x1e2   : > { %v749_v23 = vadd.f32 %v745_v28, %v734_v9  ;;  %v973_v54 = vadd.f32 %v968_v47, %v960_v34  ;;  %v1319_v9 = vmul.f32 %v1317_v56, %v3358_v59  ;;  %v1332_v56 = vmul.f32 %v1330_v6, %v3378_v27 }
 0x1e3   : > { %1268 = vrot.lane.b32.xlu1 %v1263_v44, %s4088_s0  ;;  %1422 = vrot.lane.b32.xlu0 %v1418_v17, %s4087_s19  ;;  %v1347_v6 = vmul.f32 %v1345_v21, %v3358_v59 }
 0x1e4   : > { %v762_v36 = vadd.f32 %v3215_v0, %v749_v23  ;;  %v1501_v23 = vstv %s3486_s11  ;;  %s3725_s11 = sld [smem:[#allocation6 + $0x54]] }
 0x1e5   : > { %v801_v1 = vpop.permute.xlu1 %800  ;;  %v983_v5 = vpop.permute.xlu0 %982 }
 0x1e6   : > { %v777_v2 = vadd.f32 %v773_v41, %v762_v36  ;;  %v988_v39 = vadd.f32 %v983_v5, %v973_v54  ;;  %v1486_v41 = vstv %s3465_s3  ;;  %v1502_v5 = vmul.f32 %v1501_v23, %v3391_v7  ;;  %s3678_s3 = sld [smem:[#allocation6 + $0x61]] }
 0x1e7   : > { %1281 = vrot.lane.b32.xlu1 %v1276_v61, %s4088_s0  ;;  %1435 = vrot.lane.b32.xlu0 %v1431_v50, %s4087_s19  ;;  %v1487_v55 = vmul.f32 %v1486_v41, %v3405_v25  ;;  %v1514_v61 = vstv %s3497_s10  ;;  %s2409_s10 = smov 32  }
 0x1e8   : > { %v790_v0 = vadd.f32 %v3233_v4, %v777_v2  ;;  %v1458_v4 = vstv %s3436_s7  ;;  %v1515_v21 = vmul.f32 %v1514_v61, %v3405_v25  ;;  %s3656_s7 = sld [smem:[#allocation6 + $0x60]] }
 0x1e9   : > { %v845_v26 = vpop.permute.xlu1 %844  ;;  %v996_v8 = vpop.permute.xlu0 %995  ;;  %v1459_v16 = vmul.f32 %v1458_v4, %v3405_v25 }
 0x1ea   : > { %v805_v24 = vadd.f32 %v801_v1, %v790_v0  ;;  %v1001_v53 = vadd.f32 %v996_v8, %v988_v39  ;;  %v1360_v39 = vmul.f32 %v1358_v22, %v3378_v27  ;;  %v3530_v8 = vld [vmem:[#allocation4 + $0xd] sm:$0xff] }
 0x1eb   : > { %1296 = vrot.lane.b32.xlu1 %v1291_v49, %s4089_s25  ;;  %1450 = vrot.lane.b32.xlu0 %v1446_v19, %s4088_s0  ;;  %v1529_v49 = vstv %s3509_s16  ;;  %s2410_s16 = smov 64  }
 0x1ec   : > { %v818_v12 = vadd.f32 %v3247_v58, %v805_v24  ;;  %v1010_v57 = vadd.f32 %v1008_v11, %v1001_v53  ;;  %v1391_v53 = vmul.f32 %v1389_v18, %v3530_v8 }
 0x1ed   : > { %v873_v28 = vpop.permute.xlu1 %872  ;;  %v1027_v31 = vpop.permute.xlu0 %1026 }
 0x1ee   : > { %v827_v15 = vadd.f32 %v825_v10, %v818_v12  ;;  %v1017_v30 = vadd.f32 %v1015_v52, %v1010_v57  ;;  %v1530_v52 = vmul.f32 %v1529_v49, %v3391_v7  ;;  %v3543_v12 = vld [vmem:[#allocation5 + $0xd] sm:$0xff]  ;;  %v1542_v57 = vstv %s3520_s17  ;;  %s2411_s17 = smov 48  }
 0x1ef   : > { %1309 = vrot.lane.b32.xlu1 %v1304_v29, %s4089_s25  ;;  %1463 = vrot.lane.b32.xlu0 %v1459_v16, %s4088_s0  ;;  %v1404_v16 = vmul.f32 %v1402_v33, %v3543_v12  ;;  %v1419_v33 = vmul.f32 %v1417_v45, %v3530_v8 }
 0x1f0   : > { %v834_v58 = vadd.f32 %v832_v63, %v827_v15  ;;  %v1032_v34 = vadd.f32 %v1027_v31, %v1017_v30  ;;  %v1543_v63 = vmul.f32 %v1542_v57, %v3405_v25  ;;  %v3556_v30 = vld [vmem:[#allocation4 + $0x6] sm:$0xff] }
 0x1f1   : > { %v886_v43 = vpop.permute.xlu1 %885  ;;  %v1040_v46 = vpop.permute.xlu0 %1039 }
 0x1f2   : > { %v849_v14 = vadd.f32 %v845_v26, %v834_v58  ;;  %v1045_v2 = vadd.f32 %v1040_v46, %v1032_v34  ;;  %v1573_v58 = vstv %s3533_s30  ;;  %s2412_s30 = smov 80  }
 0x1f3   : > { %1324 = vrot.lane.b32.xlu1 %v1319_v9, %s4090_s23  ;;  %1478 = vrot.lane.b32.xlu0 %v1474_v60, %s4089_s25  ;;  %v1574_v60 = vmul.f32 %v1573_v58, %v3556_v30 }
 0x1f4   : > { %v862_v47 = vadd.f32 %v3261_v3, %v849_v14 }
 0x1f5   : > { %v901_v44 = vpop.permute.xlu1 %900  ;;  %v1055_v17 = vpop.permute.xlu0 %1054 }
 0x1f6   : > { %v877_v36 = vadd.f32 %v873_v28, %v862_v47  ;;  %v1060_v26 = vadd.f32 %v1055_v17, %v1045_v2  ;;  %v1586_v17 = vstv %s3546_s6  ;;  %v1447_v2 = vmul.f32 %v1445_v37, %v3530_v8  ;;  %s2413_s6 = smov 96  }
 0x1f7   : > { %1337 = vrot.lane.b32.xlu1 %v1332_v56, %s4090_s23  ;;  %1491 = vrot.lane.b32.xlu0 %v1487_v55, %s4089_s25  ;;  %v1016_v37 = vmul.f32 %v1014_v42, %v3186_v40  ;;  %v1191_v40 = vstv %s3587_s22 }
 0x1f8   : > { %v890_v50 = vadd.f32 %v886_v43, %v877_v36  ;;  %v1432_v36 = vmul.f32 %v1430_v48, %v3543_v12 }
 0x1f9   : > { %v914_v3 = vpop.permute.xlu1 %913  ;;  %v1068_v1 = vpop.permute.xlu0 %1067 }
 0x1fa   : > { %v905_v19 = vadd.f32 %v901_v44, %v890_v50  ;;  %v1073_v11 = vadd.f32 %v1068_v1, %v1060_v26  ;;  %v3569_v44 = vld [vmem:[#allocation5 + $0x6] sm:$0xff]  ;;  %v1614_v26 = vstv %s3572_s24  ;;  %s2157_s24 = sshll.u32 %s2379_s12, 5  ;;  %s1933_s12 = scalar_lea.sflag [#allocation8], %s2542_s27 }
 0x1fb   : > { %1352 = vrot.lane.b32.xlu1 %v1347_v6, %s4086_s8  ;;  %1506 = vrot.lane.b32.xlu0 %v1502_v5, %s4090_s23  ;;  %v1587_v34 = vmul.f32 %v1586_v17, %v3569_v44  ;;  %v1601_v6 = vstv %s3559_s18  ;;  %s2414_s18 = smov 112  }
 0x1fc   : > { %v918_v28 = vadd.f32 %v914_v3, %v905_v19 }
 0x1fd   : > { %v929_v54 = vpop.permute.xlu1 %928  ;;  %v1083_v0 = vpop.permute.xlu0 %1082 }
 0x1fe   : > { %v1088_v10 = vadd.f32 %v1083_v0, %v1073_v11  ;;  %v933_v43 = vadd.f32 %v929_v54, %v918_v28  ;;  %v1602_v54 = vmul.f32 %v1601_v6, %v3556_v30  ;;  %v1009_v0 = vmul.f32 %v1007_v38, %v3168_v20 }
 0x1ff   : > { %1365 = vrot.lane.b32.xlu1 %v1360_v39, %s4086_s8  ;;  %1519 = vrot.lane.b32.xlu0 %v1515_v21, %s4090_s23  ;;  %v1460_v38 = vmul.f32 %v1458_v4, %v3543_v12  ;;  %v1475_v28 = vmul.f32 %v1473_v51, %v3530_v8 }
 0x201   : > { %v942_v24 = vpop.permute.xlu1 %941  ;;  %v1096_v22 = vpop.permute.xlu0 %1095 }
 0x202   : > { %v1101_v31 = vadd.f32 %v1096_v22, %v1088_v10  ;;  %v946_v14 = vadd.f32 %v942_v24, %v933_v43  ;;  %v1615_v24 = vmul.f32 %v1614_v26, %v3569_v44  ;;  %v1198_v10 = vstv %s3595_s26 }
 0x203   : > { %1396 = vrot.lane.b32.xlu1 %v1391_v53, %s4091_s4  ;;  %1534 = vrot.lane.b32.xlu0 %v1530_v52, %s4086_s8  ;;  %v1629_v53 = vstv %s3583_s1 }
 0x205   : > { %v957_v29 = vpop.permute.xlu1 %956  ;;  %v1111_v18 = vpop.permute.xlu0 %1110 }
 0x206   : > { %v1116_v15 = vadd.f32 %v1111_v18, %v1101_v31  ;;  %v961_v56 = vadd.f32 %v957_v29, %v946_v14  ;;  %v1630_v31 = vmul.f32 %v1629_v53, %v3556_v30  ;;  %v1192_v29 = vmul.f32 %v1191_v40, %v3203_v62 }
 0x207   : > { %1409 = vrot.lane.b32.xlu1 %v1404_v16, %s4091_s4  ;;  %1547 = vrot.lane.b32.xlu0 %v1543_v63, %s4086_s8  ;;  %v1642_v16 = vstv %s3601_s29  ;;  %v1199_v63 = vmul.f32 %v1198_v10, %v3226_v32  ;;  %v1488_v62 = vmul.f32 %v1486_v41, %v3543_v12  ;;  %v1503_v41 = vmul.f32 %v1501_v23, %v3530_v8  ;;  %s3993_s29 = scalar_lea.hbm %s4043_s2, %s2157_s24 }
 0x209   : > { %v970_v46 = vpop.permute.xlu1 %969  ;;  %v1124_v9 = vpop.permute.xlu0 %1123 }
 0x20a   : > { %v1129_v47 = vadd.f32 %v1124_v9, %v1116_v15  ;;  %v974_v3 = vadd.f32 %v970_v46, %v961_v56  ;;  %v1643_v46 = vmul.f32 %v1642_v16, %v3569_v44  ;;  %v1670_v56 = vstv %s3631_s5  ;;  %s2415_s5 = smov [#allocation11]  }
 0x20b   : > { %1424 = vrot.lane.b32.xlu1 %v1419_v33, %s4087_s19  ;;  %1578 = vrot.lane.b32.xlu0 %v1574_v60, %s4091_s4  ;;  %v1657_v33 = vstv %s3615_s13  ;;  %v1671_v23 = vmul.f32 %v1670_v56, %v3569_v44 }
 0x20d   : > { %v985_v55 = vpop.permute.xlu1 %984  ;;  %v1139_v45 = vpop.permute.xlu0 %1138 }
 0x20e   : > { %v1144_v1 = vadd.f32 %v1139_v45, %v1129_v47  ;;  %v989_v5 = vadd.f32 %v985_v55, %v974_v3  ;;  %v1658_v47 = vmul.f32 %v1657_v33, %v3556_v30 }
 0x20f   : > { %1437 = vrot.lane.b32.xlu1 %v1432_v36, %s4087_s19  ;;  %1591 = vrot.lane.b32.xlu0 %v1587_v34, %s4091_s4  ;;  %v1516_v34 = vmul.f32 %v1514_v61, %v3543_v12  ;;  %v1531_v61 = vmul.f32 %v1529_v49, %v3530_v8  ;;  %v1544_v49 = vmul.f32 %v1542_v57, %v3543_v12 }
 0x211   : > { %v998_v50 = vpop.permute.xlu1 %997  ;;  %v1152_v48 = vpop.permute.xlu0 %1151 }
 0x212   : > { %v1002_v39 = vadd.f32 %v998_v50, %v989_v5  ;;  %v1157_v21 = vadd.f32 %v1152_v48, %v1144_v1  ;;  %v1685_v1 = vstv %s3645_s21  ;;  %s2307_s21 = sshll.u32 %s2415_s5, 4  ;;  %s2308_s21 = int_to_ptr.vmem [resolvable:$false] %s2307_s21 }
 0x213   : > { %1452 = vrot.lane.b32.xlu1 %v1447_v2, %s4088_s0  ;;  %1606 = vrot.lane.b32.xlu0 %v1602_v54, %s4087_s19  ;;  %v1686_v2 = vmul.f32 %v1685_v1, %v3556_v30 }
 0x214   : > { %v1011_v19 = vadd.f32 %v1009_v0, %v1002_v39  ;;  %v1698_v0 = vstv %s3656_s7  ;;  %s2309_s7 = scalar_lea.vmem %s2308_s21, 64 }
 0x215   : > { %v1029_v11 = vpop.permute.xlu1 %1028  ;;  %v1167_v20 = vpop.permute.xlu0 %1166 }
 0x216   : > { %v1018_v22 = vadd.f32 %v1016_v37, %v1011_v19  ;;  %v1172_v42 = vadd.f32 %v1167_v20, %v1157_v21  ;;  %v1699_v19 = vmul.f32 %v1698_v0, %v3569_v44  ;;  %v3688_v20 = vld [vmem:[#allocation4 + $0xe] sm:$0xff] }
 0x217   : > { %1465 = vrot.lane.b32.xlu1 %v1460_v38, %s4088_s0  ;;  %1619 = vrot.lane.b32.xlu0 %v1615_v24, %s4087_s19  ;;  %v1713_v38 = vstv %s3667_s15 }
 0x218   : > { %v1033_v32 = vadd.f32 %v1029_v11, %v1018_v22  ;;  %v1714_v57 = vmul.f32 %v1713_v38, %v3556_v30 }
 0x219   : > { %v1042_v52 = vpop.permute.xlu1 %1041  ;;  %v1180_v4 = vpop.permute.xlu0 %1179 }
 0x21a   : > { %v1185_v18 = vadd.f32 %v1180_v4, %v1172_v42  ;;  %v1046_v55 = vadd.f32 %v1042_v52, %v1033_v32  ;;  %v1575_v42 = vmul.f32 %v1573_v58, %v3688_v20 }
 0x21b   : > { %1480 = vrot.lane.b32.xlu1 %v1475_v28, %s4089_s25  ;;  %1634 = vrot.lane.b32.xlu0 %v1630_v31, %s4088_s0  ;;  %v3699_v28 = vld [vmem:[#allocation5 + $0xe] sm:$0xff]  ;;  %v1726_v31 = vstv %s3678_s3 }
 0x21c   : > { %v1194_v51 = vadd.f32 %v1192_v29, %v1185_v18  ;;  %v1727_v58 = vmul.f32 %v1726_v31, %v3569_v44 }
 0x21d   : > { %v1057_v15 = vpop.permute.xlu1 %1056  ;;  %v1211_v43 = vpop.permute.xlu0 %1210 }
 0x21e   : > { %v1201_v9 = vadd.f32 %v1199_v63, %v1194_v51  ;;  %v1061_v3 = vadd.f32 %v1057_v15, %v1046_v55  ;;  %v1588_v63 = vmul.f32 %v1586_v17, %v3699_v28 }
 0x21f   : > { %1493 = vrot.lane.b32.xlu1 %v1488_v62, %s4089_s25  ;;  %1647 = vrot.lane.b32.xlu0 %v1643_v46, %s4088_s0 }
 0x220   : > { %v1216_v52 = vadd.f32 %v1211_v43, %v1201_v9  ;;  %v1603_v9 = vmul.f32 %v1601_v6, %v3688_v20 }
 0x221   : > { %v1070_v60 = vpop.permute.xlu1 %1069  ;;  %v1224_v14 = vpop.permute.xlu0 %1223 }
 0x222   : > { %v1074_v5 = vadd.f32 %v1070_v60, %v1061_v3  ;;  %v1229_v51 = vadd.f32 %v1224_v14, %v1216_v52 }
 0x223   : > { %1508 = vrot.lane.b32.xlu1 %v1503_v41, %s4090_s23  ;;  %1662 = vrot.lane.b32.xlu0 %v1658_v47, %s4089_s25  ;;  %v1616_v47 = vmul.f32 %v1614_v26, %v3699_v28  ;;  %v1193_v26 = vmul.f32 %v1191_v40, %v3358_v59 }
 0x225   : > { %v1085_v45 = vpop.permute.xlu1 %1084  ;;  %v1239_v36 = vpop.permute.xlu0 %1238 }
 0x226   : > { %v1089_v54 = vadd.f32 %v1085_v45, %v1074_v5  ;;  %v1244_v43 = vadd.f32 %v1239_v36, %v1229_v51 }
 0x227   : > { %1521 = vrot.lane.b32.xlu1 %v1516_v34, %s4090_s23  ;;  %1675 = vrot.lane.b32.xlu0 %v1671_v23, %s4089_s25  ;;  %v1631_v23 = vmul.f32 %v1629_v53, %v3688_v20  ;;  %v1644_v53 = vmul.f32 %v1642_v16, %v3699_v28 }
 0x229   : > { %v1098_v50 = vpop.permute.xlu1 %1097  ;;  %v1252_v48 = vpop.permute.xlu0 %1251 }
 0x22a   : > { %v1102_v39 = vadd.f32 %v1098_v50, %v1089_v54  ;;  %v1257_v32 = vadd.f32 %v1252_v48, %v1244_v43  ;;  %v1200_v48 = vmul.f32 %v1198_v10, %v3378_v27  ;;  %v1382_v27 = vstv %s3725_s11 }
 0x22b   : > { %1536 = vrot.lane.b32.xlu1 %v1531_v61, %s4086_s8  ;;  %1690 = vrot.lane.b32.xlu0 %v1686_v2, %s4090_s23 }
 0x22d   : > { %v1113_v21 = vpop.permute.xlu1 %1112  ;;  %v1267_v37 = vpop.permute.xlu0 %1266 }
 0x22e   : > { %v1117_v11 = vadd.f32 %v1113_v21, %v1102_v39  ;;  %v1272_v17 = vadd.f32 %v1267_v37, %v1257_v32 }
 0x22f   : > { %1549 = vrot.lane.b32.xlu1 %v1544_v49, %s4086_s8  ;;  %1703 = vrot.lane.b32.xlu0 %v1699_v19, %s4090_s23  ;;  %v1659_v19 = vmul.f32 %v1657_v33, %v3688_v20 }
 0x231   : > { %v1126_v24 = vpop.permute.xlu1 %1125  ;;  %v1280_v22 = vpop.permute.xlu0 %1279 }
 0x232   : > { %v1130_v4 = vadd.f32 %v1126_v24, %v1117_v11  ;;  %v1285_v55 = vadd.f32 %v1280_v22, %v1272_v17  ;;  %v1383_v24 = vmul.f32 %v1382_v27, %v3405_v25  ;;  %v1700_v25 = vmul.f32 %v1698_v0, %v3699_v28 }
 0x233   : > { %1580 = vrot.lane.b32.xlu1 %v1575_v42, %s4091_s4  ;;  %1718 = vrot.lane.b32.xlu0 %v1714_v57, %s4086_s8  ;;  %v1672_v57 = vmul.f32 %v1670_v56, %v3699_v28 }
 0x235   : > { %v1141_v29 = vpop.permute.xlu1 %1140  ;;  %v1295_v18 = vpop.permute.xlu0 %1294 }
 0x236   : > { %v1145_v15 = vadd.f32 %v1141_v29, %v1130_v4  ;;  %v1300_v45 = vadd.f32 %v1295_v18, %v1285_v55 }
 0x237   : > { %1593 = vrot.lane.b32.xlu1 %v1588_v63, %s4091_s4  ;;  %1731 = vrot.lane.b32.xlu0 %v1727_v58, %s4086_s8  ;;  %s3720_s4 = sld [smem:[#allocation6 + $0x23]]  ;;  %v1715_v58 = vmul.f32 %v1713_v38, %v3688_v20 }
 0x239   : > { %v1154_v62 = vpop.permute.xlu1 %1153  ;;  %v1308_v46 = vpop.permute.xlu0 %1307 }
 0x23a   : > { %v1158_v60 = vadd.f32 %v1154_v62, %v1145_v15  ;;  %v1313_v3 = vadd.f32 %v1308_v46, %v1300_v45 }
 0x23b   : > { %1608 = vrot.lane.b32.xlu1 %v1603_v9, %s4087_s19 }
 0x23d   : > { %v1169_v41 = vpop.permute.xlu1 %1168  ;;  %v1323_v14 = vpop.permute.xlu0 %1322  ;;  %v1375_v59 = vstv %s3720_s4 }
 0x23e   : > { %v1173_v6 = vadd.f32 %v1169_v41, %v1158_v60  ;;  %v1328_v50 = vadd.f32 %v1323_v14, %v1313_v3  ;;  %v1376_v10 = vmul.f32 %v1375_v59, %v3391_v7  ;;  %v1687_v7 = vmul.f32 %v1685_v1, %v3688_v20 }
 0x23f   : > { %1621 = vrot.lane.b32.xlu1 %v1616_v47, %s4087_s19  ;;  %v1728_v1 = vmul.f32 %v1726_v31, %v3699_v28  ;;  %s3770_s19 = sld [smem:[#allocation6 + $0x5b]] }
 0x241   : > { %v1182_v36 = vpop.permute.xlu1 %1181  ;;  %v1336_v34 = vpop.permute.xlu0 %1335 }
 0x242   : > { %v1186_v5 = vadd.f32 %v1182_v36, %v1173_v6  ;;  %v1341_v21 = vadd.f32 %v1336_v34, %v1328_v50 }
 0x243   : > { %1636 = vrot.lane.b32.xlu1 %v1631_v23, %s4088_s0 }
 0x244   : > { %v1195_v61 = vadd.f32 %v1193_v26, %v1186_v5 }
 0x245   : > { %v1213_v2 = vpop.permute.xlu1 %1212  ;;  %v1351_v54 = vpop.permute.xlu0 %1350 }
 0x246   : > { %v1202_v39 = vadd.f32 %v1200_v48, %v1195_v61  ;;  %v1356_v40 = vadd.f32 %v1351_v54, %v1341_v21  ;;  %v1377_v21 = vmul.f32 %v1375_v59, %v3530_v8 }
 0x247   : > { %1649 = vrot.lane.b32.xlu1 %v1644_v53, %s4088_s0  ;;  %s3768_s0 = sld [smem:[#allocation6 + $0x2a]] }
 0x248   : > { %v1217_v51 = vadd.f32 %v1213_v2, %v1202_v39 }
 0x249   : > { %v1226_v37 = vpop.permute.xlu1 %1225  ;;  %v1364_v49 = vpop.permute.xlu0 %1363 }
 0x24a   : > { %v1369_v11 = vadd.f32 %v1364_v49, %v1356_v40  ;;  %v1230_v62 = vadd.f32 %v1226_v37, %v1217_v51 }
 0x24b   : > { %1664 = vrot.lane.b32.xlu1 %v1659_v19, %s4089_s25  ;;  %v1384_v19 = vmul.f32 %v1382_v27, %v3543_v12 }
 0x24c   : > { %v1378_v16 = vadd.f32 %v1376_v10, %v1369_v11 }
 0x24d   : > { %v1241_v22 = vpop.permute.xlu1 %1240  ;;  %v1395_v42 = vpop.permute.xlu0 %1394 }
 0x24e   : > { %v1385_v52 = vadd.f32 %v1383_v24, %v1378_v16  ;;  %v1245_v46 = vadd.f32 %v1241_v22, %v1230_v62  ;;  %v1559_v22 = vstv %s3768_s0 }
 0x24f   : > { %1677 = vrot.lane.b32.xlu1 %v1672_v57, %s4089_s25 }
 0x250   : > { %v1400_v32 = vadd.f32 %v1395_v42, %v1385_v52 }
 0x251   : > { %v1254_v33 = vpop.permute.xlu1 %1253  ;;  %v1408_v4 = vpop.permute.xlu0 %1407 }
 0x252   : > { %v1258_v60 = vadd.f32 %v1254_v33, %v1245_v46  ;;  %v1413_v38 = vadd.f32 %v1408_v4, %v1400_v32  ;;  %v1566_v33 = vstv %s3770_s19  ;;  %v1560_v4 = vmul.f32 %v1559_v22, %v3556_v30 }
 0x253   : > { %1692 = vrot.lane.b32.xlu1 %v1687_v7, %s4090_s23  ;;  %v1567_v8 = vmul.f32 %v1566_v33, %v3569_v44 }
 0x255   : > { %v1269_v29 = vpop.permute.xlu1 %1268  ;;  %v1423_v18 = vpop.permute.xlu0 %1422 }
 0x256   : > { %v1273_v17 = vadd.f32 %v1269_v29, %v1258_v60  ;;  %v1428_v55 = vadd.f32 %v1423_v18, %v1413_v38 }
 0x257   : > { %1705 = vrot.lane.b32.xlu1 %v1700_v25, %s4090_s23  ;;  %s2408_s23 = smov 16  }
 0x259   : > { %v1282_v63 = vpop.permute.xlu1 %1281  ;;  %v1436_v56 = vpop.permute.xlu0 %1435 }
 0x25a   : > { %v1286_v47 = vadd.f32 %v1282_v63, %v1273_v17  ;;  %v1441_v34 = vadd.f32 %v1436_v56, %v1428_v55 }
 0x25b   : > { %1720 = vrot.lane.b32.xlu1 %v1715_v58, %s4086_s8 }
 0x25d   : > { %v1297_v15 = vpop.permute.xlu1 %1296  ;;  %v1451_v43 = vpop.permute.xlu0 %1450 }
 0x25e   : > { %v1301_v45 = vadd.f32 %v1297_v15, %v1286_v47  ;;  %v1456_v23 = vadd.f32 %v1451_v43, %v1441_v34 }
 0x25f   : > { %1733 = vrot.lane.b32.xlu1 %v1728_v1, %s4086_s8  ;;  %s2051_s8 = sshll.u32 %s2542_s27, 1 }
 0x260   : > { %s3789_s25 = scalar_lea.vmem [#allocation11], %s2051_s8 }
 0x261   : > { %v1310_v0 = vpop.permute.xlu1 %1309  ;;  %v1464_v9 = vpop.permute.xlu0 %1463  ;;  %s1947_s1 = sshll.u32 %s3789_s25, 4  ;;  %s1948_s1 = int_to_ptr.vmem [resolvable:$true] %s1947_s1 }
 0x262   : > { %v1314_v31 = vadd.f32 %v1310_v0, %v1301_v45  ;;  %v1469_v50 = vadd.f32 %v1464_v9, %v1456_v23  ;;  %s2303_s13 = scalar_lea.vmem %s1948_s1, 32  ;;  %p2310_p9 = scmp.lt.s32.totalorder %s1948_s1, %s2308_s21 }
 0x263   : > { %p2304_p1 = scmp.ne.s32.totalorder %s1948_s1, %s2303_s13  ;;  %p2311_p3 = scmp.lt.s32.totalorder %s2309_s7, %s2303_s13 }
 0x265   : > { %v1325_v41 = vpop.permute.xlu1 %1324  ;;  %v1479_v14 = vpop.permute.xlu0 %1478  ;;  %p2305_p6 = pnand %p2304_p1, %p4130_p4  ;;  %p2312_p5 = por %p2311_p3, %p2310_p9 }
 0x266   : > { %v1329_v3 = vadd.f32 %v1325_v41, %v1314_v31  ;;  %v1484_v61 = vadd.f32 %v1479_v14, %v1469_v50 }
 0x267   : > { %p2306_p8 = pneg %p2305_p6 }
 0x269   : > { %v1338_v6 = vpop.permute.xlu1 %1337  ;;  %v1492_v36 = vpop.permute.xlu0 %1491  ;;  %p2313_p7 = pnand %p2312_p5, %p2306_p8 }
 0x26a   : > { %v1342_v48 = vadd.f32 %v1338_v6, %v1329_v3  ;;  %v1497_v39 = vadd.f32 %v1492_v36, %v1484_v61 }
 0x26d   : > { %v1353_v26 = vpop.permute.xlu1 %1352  ;;  %v1507_v5 = vpop.permute.xlu0 %1506 }
 0x26e   : > { %v1357_v2 = vadd.f32 %v1353_v26, %v1342_v48  ;;  %v1512_v37 = vadd.f32 %v1507_v5, %v1497_v39 }
 0x271   : > { %v1366_v54 = vpop.permute.xlu1 %1365  ;;  %v1520_v53 = vpop.permute.xlu0 %1519 }
 0x272   : > { %v1370_v40 = vadd.f32 %v1366_v54, %v1357_v2  ;;  %v1525_v16 = vadd.f32 %v1520_v53, %v1512_v37  ;;  %v1561_v53 = vmul.f32 %v1559_v22, %v3688_v20  ;;  %v1568_v37 = vmul.f32 %v1566_v33, %v3699_v28 }
 0x274   : > { %v1379_v49 = vadd.f32 %v1377_v21, %v1370_v40 }
 0x275   : > { %v1397_v10 = vpop.permute.xlu1 %1396  ;;  %v1535_v11 = vpop.permute.xlu0 %1534 }
 0x276   : > { %v1386_v24 = vadd.f32 %v1384_v19, %v1379_v49  ;;  %v1540_v42 = vadd.f32 %v1535_v11, %v1525_v16 }
 0x278   : > { %v1401_v15 = vadd.f32 %v1397_v10, %v1386_v24 }
 0x279   : > { %v1410_v57 = vpop.permute.xlu1 %1409  ;;  %v1548_v52 = vpop.permute.xlu0 %1547 }
 0x27a   : > { %v1553_v7 = vadd.f32 %v1548_v52, %v1540_v42  ;;  %v1414_v62 = vadd.f32 %v1410_v57, %v1401_v15 }
 0x27c   : > { %v1562_v29 = vadd.f32 %v1560_v4, %v1553_v7 }
 0x27d   : > { %v1425_v59 = vpop.permute.xlu1 %1424  ;;  %v1579_v18 = vpop.permute.xlu0 %1578 }
 0x27e   : > { %v1569_v25 = vadd.f32 %v1567_v8, %v1562_v29  ;;  %v1429_v46 = vadd.f32 %v1425_v59, %v1414_v62 }
 0x280   : > { %v1584_v9 = vadd.f32 %v1579_v18, %v1569_v25 }
 0x281   : > { %v1438_v63 = vpop.permute.xlu1 %1437  ;;  %v1592_v12 = vpop.permute.xlu0 %1591 }
 0x282   : > { %v1442_v32 = vadd.f32 %v1438_v63, %v1429_v46  ;;  %v1597_v41 = vadd.f32 %v1592_v12, %v1584_v9 }
 0x285   : > { %v1453_v27 = vpop.permute.xlu1 %1452  ;;  %v1607_v56 = vpop.permute.xlu0 %1606 }
 0x286   : > { %v1457_v60 = vadd.f32 %v1453_v27, %v1442_v32  ;;  %v1612_v38 = vadd.f32 %v1607_v56, %v1597_v41 }
 0x289   : > { %v1466_v58 = vpop.permute.xlu1 %1465  ;;  %v1620_v51 = vpop.permute.xlu0 %1619 }
 0x28a   : > { %v1470_v14 = vadd.f32 %v1466_v58, %v1457_v60  ;;  %v1625_v6 = vadd.f32 %v1620_v51, %v1612_v38 }
 0x28d   : > { %v1481_v43 = vpop.permute.xlu1 %1480  ;;  %v1635_v1 = vpop.permute.xlu0 %1634 }
 0x28e   : > { %v1485_v47 = vadd.f32 %v1481_v43, %v1470_v14  ;;  %v1640_v34 = vadd.f32 %v1635_v1, %v1625_v6 }
 0x291   : > { %v1494_v0 = vpop.permute.xlu1 %1493  ;;  %v1648_v30 = vpop.permute.xlu0 %1647 }
 0x292   : > { %v1498_v36 = vadd.f32 %v1494_v0, %v1485_v47  ;;  %v1653_v26 = vadd.f32 %v1648_v30, %v1640_v34 }
 0x295   : > { %v1509_v44 = vpop.permute.xlu1 %1508  ;;  %v1663_v17 = vpop.permute.xlu0 %1662 }
 0x296   : > { %v1513_v31 = vadd.f32 %v1509_v44, %v1498_v36  ;;  %v1668_v50 = vadd.f32 %v1663_v17, %v1653_v26 }
 0x299   : > { %v1522_v55 = vpop.permute.xlu1 %1521  ;;  %v1676_v45 = vpop.permute.xlu0 %1675 }
 0x29a   : > { %v1526_v5 = vadd.f32 %v1522_v55, %v1513_v31  ;;  %v1681_v54 = vadd.f32 %v1676_v45, %v1668_v50 }
 0x29d   : > { %v1537_v23 = vpop.permute.xlu1 %1536  ;;  %v1691_v3 = vpop.permute.xlu0 %1690 }
 0x29e   : > { %v1541_v48 = vadd.f32 %v1537_v23, %v1526_v5  ;;  %v1696_v21 = vadd.f32 %v1691_v3, %v1681_v54 }
 0x2a1   : > { %v1550_v61 = vpop.permute.xlu1 %1549  ;;  %v1704_v2 = vpop.permute.xlu0 %1703 }
 0x2a2   : > { %v1554_v39 = vadd.f32 %v1550_v61, %v1541_v48  ;;  %v1709_v10 = vadd.f32 %v1704_v2, %v1696_v21 }
 0x2a4   : > { %v1563_v40 = vadd.f32 %v1561_v53, %v1554_v39 }
 0x2a5   : > { %v1581_v49 = vpop.permute.xlu1 %1580  ;;  %v1719_v19 = vpop.permute.xlu0 %1718 }
 0x2a6   : > { %v1570_v11 = vadd.f32 %v1568_v37, %v1563_v40  ;;  %v1724_v16 = vadd.f32 %v1719_v19, %v1709_v10 }
 0x2a8   : > { %v1585_v22 = vadd.f32 %v1581_v49, %v1570_v11 }
 0x2a9   : > { %v1594_v24 = vpop.permute.xlu1 %1593  ;;  %v1732_v42 = vpop.permute.xlu0 %1731 }
 0x2aa   : > { %v1737_v57 = vadd.f32 %v1732_v42, %v1724_v16  ;;  %v1598_v28 = vadd.f32 %v1594_v24, %v1585_v22 }
 0x2ac   : > { %v2149_v52 = vmul.f32 -1.442695, %v1737_v57 }
 0x2ad   : > { %v1609_v4 = vpop.permute.xlu1 %1608 }
 0x2ae   : > { %2256 = vpow2.f32 %v2149_v52  ;;  %v1613_v33 = vadd.f32 %v1609_v4, %v1598_v28  ;;  %v4116_v28 = vmov 0 }
 0x2b1   : > { %v1622_v7 = vpop.permute.xlu1 %1621 }
 0x2b2   : > { %v1626_v63 = vadd.f32 %v1622_v7, %v1613_v33 }
 0x2b5   : > { %v1637_v29 = vpop.permute.xlu1 %1636 }
 0x2b6   : > { %v1641_v12 = vadd.f32 %v1637_v29, %v1626_v63 }
 0x2b9   : > { %v1650_v20 = vpop.permute.xlu1 %1649 }
 0x2ba   : > { %v1654_v56 = vadd.f32 %v1650_v20, %v1641_v12 }
 0x2bb   : > { %v2257_v8 = vpop.eup %2256 }
 0x2bc   : > { %v1745_v59 = vadd.f32 1.0, %v2257_v8 }
 0x2bd   : > { %v1665_v18 = vpop.permute.xlu1 %1664 }
 0x2be   : > { %2258 = vrcp.f32 %v1745_v59  ;;  %v1669_v58 = vadd.f32 %v1665_v18, %v1654_v56 }
 0x2c1   : > { %v1678_v25 = vpop.permute.xlu1 %1677 }
 0x2c2   : > { %v1682_v43 = vadd.f32 %v1678_v25, %v1669_v58 }
 0x2c5   : > { %v1693_v27 = vpop.permute.xlu1 %1692 }
 0x2c6   : > { %v1697_v62 = vadd.f32 %v1693_v27, %v1682_v43 }
 0x2c9   : > { %v1706_v51 = vpop.permute.xlu1 %1705 }
 0x2ca   : > { %v1710_v30 = vadd.f32 %v1706_v51, %v1697_v62 }
 0x2cb   : > { %v2259_v1 = vpop.eup %2258 }
 0x2cc   : > { %v1761_v46 = vrot.slane %v2259_v1, %v2557_v35  ;;  %1753 = vst.msk [vmem:[%s3789_s25] sm:$0x1] %vm3784_vm5, %v2259_v1  ;;  %v1800_v17 = vcombine.high %v2259_v1, %v2259_v1 }
 0x2cd   : > { %v1721_v0 = vpop.permute.xlu1 %1720 }
 0x2ce   : > { %v1762_v9 = vcombine.high %v1761_v46, %v1761_v46  ;;  %v1725_v32 = vadd.f32 %v1721_v0, %v1710_v30  ;;  %v1769_v44 = vrot.slane %v1761_v46, %v2557_v35  ;;  %v1807_v55 = vrot.slane %v1800_v17, %v2557_v35 }
 0x2d0   : > { %v1776_v60 = vrot.slane %v1762_v9, %v2557_v35  ;;  %v1784_v47 = vcombine.high %v1769_v44, %v1769_v44  ;;  %v1814_v45 = vrot.slane %v1807_v55, %v2557_v35  ;;  %v1822_v36 = vcombine.high %v1807_v55, %v1807_v55 }
 0x2d1   : > { %v1734_v41 = vpop.permute.xlu1 %1733 }
 0x2d2   : > { %v1738_v14 = vadd.f32 %v1734_v41, %v1725_v32  ;;  %1777 = vrot.lane.b32.xlu0 %v1776_v60, %s2408_s23  ;;  %v1792_v6 = vcombine.high %v1776_v60, %v1776_v60  ;;  %v1829_v34 = vrot.slane %v1822_v36, %v2557_v35  ;;  %v1837_v3 = vcombine.high %v1814_v45, %v1814_v45 }
 0x2d4   : > { %v2150_v38 = vmul.f32 -1.442695, %v1738_v14  ;;  %v1845_v26 = vcombine.high %v1829_v34, %v1829_v34 }
 0x2d6   : > { %2260 = vpow2.f32 %v2150_v38  ;;  %1785 = vrot.lane.b32.xlu0 %v1784_v47, %s2409_s10 }
 0x2da   : > { %1815 = vrot.lane.b32.xlu0 %v1814_v45, %s2410_s16 }
 0x2de   : > { %1793 = vrot.lane.b32.xlu0 %v1792_v6, %s2411_s17 }
 0x2e2   : > { %1830 = vrot.lane.b32.xlu0 %v1829_v34, %s2412_s30 }
 0x2e3   : > { %v2261_v31 = vpop.eup %2260 }
 0x2e4   : > { %v1746_v23 = vadd.f32 1.0, %v2261_v31 }
 0x2e6   : > { %2262 = vrcp.f32 %v1746_v23  ;;  %1838 = vrot.lane.b32.xlu0 %v1837_v3, %s2413_s6 }
 0x2ea   : > { %1846 = vrot.lane.b32.xlu0 %v1845_v26, %s2414_s18 }
 0x2f3   : > { %v2263_v5 = vpop.eup %2262 }
 0x2f4   : > { %v1861_v50 = vrot.slane %v2263_v5, %v2557_v35  ;;  %1853 = vst.msk [vmem:[%s3789_s25 + $0x1] sm:$0x1] %vm3784_vm5, %v2263_v5  ;;  %v1891_v54 = vcombine.high %v2263_v5, %v2263_v5  ;;  %vm3907_vm5 = vcmp.ge.s32.totalorder %v222_v13, 96 }
 0x2f6   : > { %v1862_v48 = vcombine.high %v1861_v50, %v1861_v50  ;;  %v1869_v2 = vrot.slane %v1861_v50, %v2557_v35  ;;  %v1898_v39 = vrot.slane %v1891_v54, %v2557_v35 }
 0x2f8   : > { %v1876_v61 = vrot.slane %v1862_v48, %v2557_v35  ;;  %v1881_v53 = vcombine.high %v1869_v2, %v1869_v2  ;;  %v1905_v21 = vrot.slane %v1898_v39, %v2557_v35  ;;  %v1910_v37 = vcombine.high %v1898_v39, %v1898_v39 }
 0x2fa   : > { %1877 = vrot.lane.b32.xlu1 %v1876_v61, %s2408_s23  ;;  %v1886_v40 = vcombine.high %v1876_v61, %v1876_v61  ;;  %v1917_v49 = vrot.slane %v1910_v37, %v2557_v35  ;;  %v1922_v19 = vcombine.high %v1905_v21, %v1905_v21 }
 0x2fc   : > { %v1927_v10 = vcombine.high %v1917_v49, %v1917_v49 }
 0x2fe   : > { %1882 = vrot.lane.b32.xlu1 %v1881_v53, %s2409_s10 }
 0x302   : > { %1906 = vrot.lane.b32.xlu1 %v1905_v21, %s2410_s16 }
 0x306   : > { %1887 = vrot.lane.b32.xlu1 %v1886_v40, %s2411_s17 }
 0x30a   : > { %1918 = vrot.lane.b32.xlu1 %v1917_v49, %s2412_s30 }
 0x30e   : > { %1923 = vrot.lane.b32.xlu1 %v1922_v19, %s2413_s6 }
 0x312   : > { %1928 = vrot.lane.b32.xlu1 %v1927_v10, %s2414_s18 }
 0x344   : > { %v1778_v42 = vpop.permute.xlu0 %1777 }
 0x345   : > { %1783 = vst.msk [vmem:[%s3789_s25] sm:$0x1] %vm4064_vm8, %v1778_v42  ;;  %vm3932_vm8 = vcmp.lt.s32.totalorder %v222_v13, 128 }
 0x348   : > { %v1786_v57 = vpop.permute.xlu0 %1785 }
 0x349   : > { %1791 = vst.msk [vmem:[%s3789_s25] sm:$0x1] %vm4063_vm11, %v1786_v57  ;;  %vm3927_vm11 = vcmp.ge.s32.totalorder %v222_v13, 112 }
 0x34c   : > { %v1816_v7 = vpop.permute.xlu0 %1815 }
 0x350   : > { %v1794_v59 = vpop.permute.xlu0 %1793 }
 0x351   : > { %1799 = vst.msk [vmem:[%s3789_s25] sm:$0x1] %vm4061_vm0, %v1794_v59  ;;  %vm3912_vm0 = vcmp.lt.s32.totalorder %v222_v13, 112 }
 0x352   : > { %1821 = vst.msk [vmem:[%s3789_s25] sm:$0x1] %vm4062_vm1, %v1816_v7  ;;  %v4117_v28 = vsel %vm3912_vm0, 4294967295, %v4116_v28  ;;  %vm4066_vm1 = vmand %vm3907_vm5, %vm3912_vm0 }
 0x353   : > { %vm4123_vm0 = vmand %vm3827_vm9, %vm3832_vm10  ;;  %vm4127_vm9 = vnez %v4117_v28 }
 0x354   : > { %v1831_v33 = vpop.permute.xlu0 %1830  ;;  %vm4128_vm10 = vmand %vm3907_vm5, %vm4127_vm9 }
 0x355   : > { %1836 = vst.msk [vmem:[%s3789_s25] sm:$0x1] %vm4065_vm4, %v1831_v33  ;;  %vm4068_vm4 = vmand %vm3927_vm11, %vm3932_vm8 }
 0x358   : > { %v1839_v12 = vpop.permute.xlu0 %1838 }
 0x359   : > { %1844 = vst.msk [vmem:[%s3789_s25] sm:$0x1] %vm4066_vm1, %v1839_v12  ;;  %vm4122_vm1 = vmand %vm3813_vm6, %vm3818_vm7 }
 0x35a   : > { %vm4125_vm6 = vmand %vm3863_vm14, %vm3868_vm15 }
 0x35b   : > { %vm4126_vm7 = vmand %vm3881_vm2, %vm3886_vm3 }
 0x35c   : > { %v1847_v27 = vpop.permute.xlu0 %1846 }
 0x35d   : > { %1852 = vst.msk [vmem:[%s3789_s25] sm:$0x1] %vm4068_vm4, %v1847_v27  ;;  %vm4124_vm4 = vmand %vm3853_vm12, %vm3858_vm13 }
 0x35e   : > { %vm4129_vm12 = vmand %vm3927_vm11, %vm3932_vm8 }
 0x36c   : > { %v1878_v13 = vpop.permute.xlu1 %1877 }
 0x36d   : > { %1880 = vst.msk [vmem:[%s3789_s25 + $0x1] sm:$0x1] %vm4122_vm1, %v1878_v13 }
 0x370   : > { %v1883_v56 = vpop.permute.xlu1 %1882 }
 0x371   : > { %1885 = vst.msk [vmem:[%s3789_s25 + $0x1] sm:$0x1] %vm4123_vm0, %v1883_v56 }
 0x374   : > { %v1907_v58 = vpop.permute.xlu1 %1906 }
 0x378   : > { %v1888_v51 = vpop.permute.xlu1 %1887 }
 0x379   : > { %1890 = vst.msk [vmem:[%s3789_s25 + $0x1] sm:$0x1] %vm4124_vm4, %v1888_v51 }
 0x37a   : > { %1909 = vst.msk [vmem:[%s3789_s25 + $0x1] sm:$0x1] %vm4125_vm6, %v1907_v58 }
 0x37c   : > { %v1919_v15 = vpop.permute.xlu1 %1918 }
 0x37d   : > { %1921 = vst.msk [vmem:[%s3789_s25 + $0x1] sm:$0x1] %vm4126_vm7, %v1919_v15 }
 0x380   : > { %v1924_v43 = vpop.permute.xlu1 %1923 }
 0x381   : > { %1926 = vst.msk [vmem:[%s3789_s25 + $0x1] sm:$0x1] %vm4128_vm10, %v1924_v43 }
 0x384   : > { %v1929_v1 = vpop.permute.xlu1 %1928 }
 0x385   : > { %1931 = vst.msk [vmem:[%s3789_s25 + $0x1] sm:$0x1] %vm4129_vm12, %v1929_v1 }
 0x386   : > { %2316 = shalt.err (!%p2313_p7)
}
 0x387   : > { %s2317_s15 = scalar_lea.hbm %s3993_s29, 32  ;;  %s2321_s4 = scalar_lea.hbm %s4043_s2, 64 }
 0x388   : > { %p2318_p2 = scmp.ne.s32.totalorder %s3993_s29, %s2317_s15  ;;  %p2322_p13 = scmp.lt.s32.totalorder %s3993_s29, %s4043_s2 }
 0x389   : > { %p2323_p0 = scmp.lt.s32.totalorder %s2321_s4, %s2317_s15 }
 0x38a   : > { %p2319_p11 = pnand %p2318_p2, %p4130_p4 }
 0x38b   : > { %p2324_p10 = por %p2323_p0, %p2322_p13 }
 0x38c   : > { %p2320_p12 = pneg %p2319_p11 }
 0x38e   : > { %p2325_p1 = pnand %p2324_p10, %p2320_p12 }
 0x390   : > { %2328 = shalt.err (!%p2325_p1)
}
 0x391   : > { %2164 = dma.vmem_to_hbm [thread:$0]  (%p4130_p4), %s1948_s1, 32, %s3993_s29, %s1933_s12  }
 0x392 PF: > { %s1959_s19 = sand.u32 1, %s2367_s9   ;;  %p4131_p6 = scmp.ne.s32.totalorder %s4077_s20, 0 }
 0x393   : > { %p4132_p8 = scmp.ge.s32.totalorder %s2387_s14, 2  ;;  %s1960_s8 = scalar_lea.sflag [#allocation8], %s1959_s19 }
 0x395   : > { %p2175_p9 = pnand %p4132_p8, %p4131_p6 }
 0x397   : > { %p2176_p3 = pneg %p2175_p9 }
 0x399   : > { %2362 = dma.done.wait (%p2176_p3), %s1960_s8, 32  }
 0x39a   : > { %2364 = vsyncadd (%p2176_p3), %s1960_s8, 4294967264  ;;  %s19_s14 = sadd.s32 1, %s2387_s14   ;;  %s4133_s9 = sld [smem:[#allocation15_spill]] }
 0x39b   : > { %p16_p5 = scmp.ge.s32.totalorder %s19_s14, 4   ;;  %s4134_s10 = sld [smem:[#allocation16_spill]] }
 0x39c   : > { %s4135_s11 = sld [smem:[#allocation19_spill]] }
 0x39d   : > { %s4136_s12 = sld [smem:[#allocation17_spill]]  ;;  %18 = sbr.rel (!%p16_p5) target bundleno = 10 (0xa), region = 86 }
 0x39e   : > { %s4137_s13 = sld [smem:[#allocation18_spill]] }
 0x3a2   :  { %1965 = vsyncpa [#allocation7], 1 }
 0x3a3   :  { %1967 = vsyncpa [#allocation7 + $0x1], 1 }
 0x3a4   :  { %1968 = vsyncpa [#allocation8], 1 }
 0x3a5   :  { %1970 = vsyncpa [#allocation8 + $0x1], 1 }
 0x3a6   :  { %1971 = vsyncpa [#allocation9], 1 }
 0x3a7   :  { %1973 = vsyncpa [#allocation9 + $0x1], 1 }

</bundles_post_ra>
